<compile_context>
chip_gen: v7x
topology: tpu7x:2x2x1
jax: 0.10.0
libtpu: 0.0.40
codegen_flags: <defaults>
</compile_context>

<pallas_src>
import functools

import jax
import jax.numpy as jnp
from jax.experimental import pallas as pl
from jax.experimental.pallas import tpu as pltpu


COMPUTE_DTYPE = jnp.bfloat16   # MXU-native operand dtype; accumulation is f32
LN_EPS = 1e-5
NEG_INF = -1e30                # large-finite "masked" score (avoids inf-inf NaNs)


# --------------------------- per-generation tuning ---------------------------

def _tpu_vmem_capacity_bytes():
    try:
        return int(pltpu.get_tpu_info().vmem_capacity_bytes)
    except Exception:
        return 128 * 1024 * 1024


_VMEM_CAP = _tpu_vmem_capacity_bytes()
if _VMEM_CAP >= 128 * 1024 * 1024:          # v5e / v6e: lots of VMEM headroom
    VMEM_LIMIT = 80 * 1024 * 1024
    TILE_M, TILE_N, TILE_K = 256, 1024, 512
else:                                        # v7x: 64 MiB physical per TensorCore
    VMEM_LIMIT = min(44 * 1024 * 1024, (_VMEM_CAP * 3) // 4)
    TILE_M, TILE_N, TILE_K = 128, 512, 512


# ------------------------------ tiling helpers -------------------------------

def _round_up(x, m):
    return ((x + m - 1) // m) * m


def _tile(dim, preferred, align):
    """Largest tile <= preferred that divides `dim` and is `align`-aligned,
    otherwise the full dim (a full-extent block is always a legal Pallas block)."""
    if dim <= preferred:
        return dim
    t = (preferred // align) * align
    while t >= align:
        if dim % t == 0:
            return t
        t -= align
    return dim


def _kv_chunk(kv_len, max_chunk):
    """Chunk length along the kv axis: lane/sublane friendly divisor of kv_len."""
    if kv_len <= max_chunk:
        return kv_len
    c = (max_chunk // 128) * 128
    while c >= 128:
        if kv_len % c == 0:
            return c
        c -= 128
    c = (max_chunk // 8) * 8
    while c >= 8:
        if kv_len % c == 0:
            return c
        c -= 8
    return kv_len


def _head_group(n_head, d_head):
    """Heads per attention program: smallest group giving 128-lane-dense blocks."""
    for g in range(1, n_head + 1):
        if n_head % g == 0 and (g * d_head) % 128 == 0:
            return g
    return n_head  # fall back: all heads (block width == full D, always legal)


# --------------------------- fused tiled linear ------------------------------

def _fused_linear_kernel(*refs, nk, has_ln, has_bias, has_residual, apply_gelu,
                         compute_dtype, eps):
    idx = 0
    x_ref = refs[idx]; idx += 1
    w_ref = refs[idx]; idx += 1
    if has_ln:
        ln_w_ref = refs[idx]; ln_b_ref = refs[idx + 1]; idx += 2
    if has_bias:
        b_ref = refs[idx]; idx += 1
    if has_residual:
        r_ref = refs[idx]; idx += 1
    o_ref = refs[idx]; idx += 1
    acc_ref = refs[idx]; idx += 1
    xn_ref = refs[idx] if has_ln else None

    k = pl.program_id(2)

    @pl.when(k == 0)
    def _():
        acc_ref[...] = jnp.zeros_like(acc_ref)

    if has_ln:
        # LayerNorm prologue: computed ONCE per row tile (first column tile only)
        # and cached in VMEM; the remaining N/bn column tiles reuse the bf16 copy.
        @pl.when(pl.program_id(1) == 0)
        def _():
            xf = x_ref[...].astype(jnp.float32)
            mu = jnp.mean(xf, axis=-1, keepdims=True)
            var = jnp.mean((xf - mu) ** 2, axis=-1, keepdims=True)
            xf = (xf - mu) * jax.lax.rsqrt(var + eps)
            xn_ref[...] = (xf * ln_w_ref[...] + ln_b_ref[...]).astype(compute_dtype)
        x = xn_ref[...]
    else:
        x = x_ref[...].astype(compute_dtype)

    # Standard (bm,bk) @ (bk,bn) MXU matmul, f32 accumulation (weights pre-transposed).
    acc_ref[...] += jnp.dot(x, w_ref[...].astype(compute_dtype),
                            preferred_element_type=jnp.float32)

    @pl.when(k == nk - 1)
    def _():  # fused epilogue: bias, exact GELU, residual add, single store
        out = acc_ref[...]
        if has_bias:
            out = out + b_ref[...].astype(jnp.float32)
        if apply_gelu:
            out = out * 0.5 * (1.0 + jax.lax.erf(out * 0.7071067811865476))
        if has_residual:
            out = out + r_ref[...].astype(jnp.float32)
        o_ref[...] = out.astype(o_ref.dtype)


def fused_linear(x, w, bias=None, *, ln=None, apply_gelu=False, residual=None,
                 out_dtype=None, compute_dtype=COMPUTE_DTYPE,
                 tm=None, tn=None, tk=None):
    """out = [residual +] [gelu]( LN?(x) @ w + bias ), tiled on the MXU.

    x: (M, K); w: (K, N) pre-transposed/pre-cast weight (no per-tile transposes);
    bias: (N,) or None; ln: optional (weight, bias) each (K,), cached LN prologue;
    residual: optional (M, N) added in the epilogue.
    """
    M, K = x.shape
    Kw, N = w.shape
    assert Kw == K
    tm = tm or TILE_M
    tn = tn or TILE_N
    tk = tk or TILE_K
    bm = _tile(M, tm, 16)                       # 16-row align for bf16 sublane packing
    bn = _tile(N, tn, 128)
    bk = K if ln is not None else _tile(K, tk, 128)   # LN needs whole rows
    nm, nn, nk = M // bm, N // bn, K // bk
    has_ln = ln is not None

    # Decode-friendly megacore: when the row axis has a single block, put the column
    # axis first so the "parallel" split lands on a non-unit axis (v7x, 2 TCs).
    swap = (not has_ln) and nm == 1 and nn > 1
    if swap:
        grid = (nn, nm, nk)
        x_map = lambda j, i, k: (i, k)
        w_map = lambda j, i, k: (k, j)
        v_map = lambda j, i, k: (0, j)
        o_map = lambda j, i, k: (i, j)
        dims = ("parallel", "parallel", "arbitrary")
    else:
        grid = (nm, nn, nk)
        x_map = lambda i, j, k: (i, k)
        w_map = lambda i, j, k: (k, j)
        v_map = lambda i, j, k: (0, j)
        o_map = lambda i, j, k: (i, j)
        # The cached-LN prologue needs the column axis to iterate inside the row axis
        # on one core, so it is marked "arbitrary" (no megacore split on j).
        dims = (("parallel", "arbitrary", "arbitrary") if has_ln
                else ("parallel", "parallel", "arbitrary"))

    in_specs = [pl.BlockSpec((bm, bk), x_map), pl.BlockSpec((bk, bn), w_map)]
    args = [x, w]
    if has_ln:
        ln_w, ln_b = ln
        ln_map = lambda i, j, k: (0, 0)
        in_specs += [pl.BlockSpec((1, bk), ln_map), pl.BlockSpec((1, bk), ln_map)]
        args += [ln_w.reshape(1, K), ln_b.reshape(1, K)]
    if bias is not None:
        in_specs.append(pl.BlockSpec((1, bn), v_map))
        args.append(bias.reshape(1, N))
    if residual is not None:
        in_specs.append(pl.BlockSpec((bm, bn), o_map))
        args.append(residual)

    scratch = [pltpu.VMEM((bm, bn), jnp.float32)]
    if has_ln:
        scratch.append(pltpu.VMEM((bm, bk), compute_dtype))   # cached LN(x) row tile

    kernel = functools.partial(
        _fused_linear_kernel, nk=nk, has_ln=has_ln, has_bias=bias is not None,
        has_residual=residual is not None, apply_gelu=apply_gelu,
        compute_dtype=compute_dtype, eps=LN_EPS)

    # TODO(synk): pipeline_mode=pl.Buffered(3) on the weight spec for weight-streaming
    # bound (small-M decode) layers on v5e/v6e; left at the default double-buffering.
    return pl.pallas_call(
        kernel,
        grid=grid,
        in_specs=in_specs,
        out_specs=pl.BlockSpec((bm, bn), o_map),
        out_shape=jax.ShapeDtypeStruct((M, N), out_dtype or x.dtype),
        scratch_shapes=scratch,
        compiler_params=pltpu.CompilerParams(
            dimension_semantics=dims, vmem_limit_bytes=VMEM_LIMIT),
    )(*args)


# ------------------------ flash (online-softmax) attention -------------------

def _flash_attention_kernel(q_ref, k_ref, v_ref, o_ref, m_ref, l_ref, acc_ref, *,
                            n_heads, d_head, causal, kv_valid):
    kv_i = pl.program_id(2)
    nkv = pl.num_programs(2)
    q_len = q_ref.shape[0]
    ckv = k_ref.shape[0]

    @pl.when(kv_i == 0)
    def _():
        m_ref[...] = jnp.full_like(m_ref, NEG_INF)
        l_ref[...] = jnp.zeros_like(l_ref)
        acc_ref[...] = jnp.zeros_like(acc_ref)

    need_mask = causal or (kv_valid is not None)
    if need_mask:
        col = jax.lax.broadcasted_iota(jnp.int32, (q_len, ckv), 1) + kv_i * ckv
        if causal:
            row = jax.lax.broadcasted_iota(jnp.int32, (q_len, ckv), 0)
            keep = col <= row
        else:
            keep = col < kv_valid

    # Static unroll over the (small, lane-dense) head group; kv streaming bounds the
    # per-head live ranges to (q_len, ckv) f32.
    for h in range(n_heads):
        c0 = h * d_head
        q = q_ref[:, c0:c0 + d_head]          # scale already folded into wq/bq
        k = k_ref[:, c0:c0 + d_head]
        v = v_ref[:, c0:c0 + d_head]
        s = jax.lax.dot_general(q, k, (((1,), (1,)), ((), ())),
                                preferred_element_type=jnp.float32)
        if need_mask:
            s = jnp.where(keep, s, NEG_INF)
        m_prev = m_ref[h]                     # (q_len, 1)
        m_new = jnp.maximum(m_prev, jnp.max(s, axis=-1, keepdims=True))
        alpha = jnp.exp(m_prev - m_new)
        p = jnp.exp(s - m_new)
        l_ref[h] = alpha * l_ref[h] + jnp.sum(p, axis=-1, keepdims=True)
        acc_ref[h] = alpha * acc_ref[h] + jax.lax.dot_general(
            p.astype(v.dtype), v, (((1,), (0,)), ((), ())),
            preferred_element_type=jnp.float32)
        m_ref[h] = m_new

    @pl.when(kv_i == nkv - 1)
    def _():
        for h in range(n_heads):
            c0 = h * d_head
            inv = pl.reciprocal(l_ref[h], approx=True)   # EUP slot, not a VALU divide
            o_ref[:, c0:c0 + d_head] = (acc_ref[h] * inv).astype(o_ref.dtype)


def attention(q_src, k_src, v_src, *, n_batch, n_head, d_head, q_len, kv_len,
              causal=False, kv_valid=None, q_off=0, k_off=0, v_off=0,
              out_dtype=COMPUTE_DTYPE, max_kv_chunk=512):
    """Multi-head flash attention reading q/k/v straight from 2-D projection outputs.

    q_src: (n_batch*q_len, *) with this tensor's heads starting at column q_off.
    k_src/v_src: (n_batch*kv_len, *) with heads starting at columns k_off / v_off.
    causal: generate the triangular mask in-kernel (no mask DMA).
    kv_valid: number of valid kv rows (< kv_len) when kv was zero-padded.
    Returns (n_batch*q_len, n_head*d_head) -- no reshape/transpose round trips.
    """
    g = _head_group(n_head, d_head)
    blk_d = g * d_head
    n_hb = n_head // g
    qo, ko, vo = q_off // blk_d, k_off // blk_d, v_off // blk_d
    ckv = _kv_chunk(kv_len, max_kv_chunk)
    nkv = kv_len // ckv
    if kv_valid is not None and kv_valid >= kv_len:
        kv_valid = None

    kernel = functools.partial(_flash_attention_kernel, n_heads=g, d_head=d_head,
                               causal=causal, kv_valid=kv_valid)
    return pl.pallas_call(
        kernel,
        grid=(n_batch, n_hb, nkv),
        in_specs=[pl.BlockSpec((q_len, blk_d), lambda b, h, kv: (b, qo + h)),
                  pl.BlockSpec((ckv, blk_d), lambda b, h, kv: (b * nkv + kv, ko + h)),
                  pl.BlockSpec((ckv, blk_d), lambda b, h, kv: (b * nkv + kv, vo + h))],
        out_specs=pl.BlockSpec((q_len, blk_d), lambda b, h, kv: (b, h)),
        out_shape=jax.ShapeDtypeStruct((n_batch * q_len, n_head * d_head), out_dtype),
        scratch_shapes=[pltpu.VMEM((g, q_len, 1), jnp.float32),      # running max
                        pltpu.VMEM((g, q_len, 1), jnp.float32),      # running sum
                        pltpu.VMEM((g, q_len, d_head), jnp.float32)],  # running acc
        compiler_params=pltpu.CompilerParams(
            dimension_semantics=("parallel", "parallel", "arbitrary"),
            vmem_limit_bytes=VMEM_LIMIT),
    )(q_src, k_src, v_src)


# -------------------------------- model glue ---------------------------------

def residual_block(x, xa2d, p, *, n_batch, q_len, kv_len, kv_valid, n_head):
    D = x.shape[-1]
    dh = D // n_head

    # --- causal self attention (mask generated in-kernel) ---
    if "attn_wqkv" in p:  # packed QKV projection, LN fused into its prologue
        qkv = fused_linear(x, p["attn_wqkv"], p["attn_bqkv"],
                           ln=(p["attn_ln_w"], p["attn_ln_b"]), out_dtype=COMPUTE_DTYPE)
        a = attention(qkv, qkv, qkv, n_batch=n_batch, n_head=n_head, d_head=dh,
                      q_len=q_len, kv_len=q_len, causal=True,
                      q_off=0, k_off=D, v_off=2 * D)
    else:  # head width too small to pack lane-densely: separate projections
        ln = (p["attn_ln_w"], p["attn_ln_b"])
        q = fused_linear(x, p["attn_wq"], p["attn_bq"], ln=ln, out_dtype=COMPUTE_DTYPE)
        k = fused_linear(x, p["attn_wk"], None, ln=ln, out_dtype=COMPUTE_DTYPE)
        v = fused_linear(x, p["attn_wv"], p["attn_bv"], ln=ln, out_dtype=COMPUTE_DTYPE)
        a = attention(q, k, v, n_batch=n_batch, n_head=n_head, d_head=dh,
                      q_len=q_len, kv_len=q_len, causal=True)
    x = fused_linear(a, p["attn_wo"], p["attn_bo"], residual=x, out_dtype=jnp.float32)

    # --- cross attention over (zero-padded, in-kernel masked) audio features ---
    q = fused_linear(x, p["cross_wq"], p["cross_bq"],
                     ln=(p["cross_ln_w"], p["cross_ln_b"]), out_dtype=COMPUTE_DTYPE)
    # TODO(synk): cross K/V could be cached across decode steps (the module's `cache`
    # arg); recomputed here since this kernel implements one full forward.
    if "cross_wkv" in p:
        kv = fused_linear(xa2d, p["cross_wkv"], p["cross_bkv"], out_dtype=COMPUTE_DTYPE)
        a = attention(q, kv, kv, n_batch=n_batch, n_head=n_head, d_head=dh,
                      q_len=q_len, kv_len=kv_len, kv_valid=kv_valid,
                      k_off=0, v_off=D)
    else:
        k = fused_linear(xa2d, p["cross_wk"], None, out_dtype=COMPUTE_DTYPE)
        v = fused_linear(xa2d, p["cross_wv"], p["cross_bv"], out_dtype=COMPUTE_DTYPE)
        a = attention(q, k, v, n_batch=n_batch, n_head=n_head, d_head=dh,
                      q_len=q_len, kv_len=kv_len, kv_valid=kv_valid)
    x = fused_linear(a, p["cross_wo"], p["cross_bo"], residual=x, out_dtype=jnp.float32)

    # --- MLP: LN + w1 + GELU in one call, residual fused into w2's epilogue ---
    h1 = fused_linear(x, p["mlp_w1"], p["mlp_b1"],
                      ln=(p["mlp_ln_w"], p["mlp_ln_b"]),
                      apply_gelu=True, out_dtype=COMPUTE_DTYPE)
    x = fused_linear(h1, p["mlp_w2"], p["mlp_b2"], residual=x, out_dtype=jnp.float32)
    return x


def text_decoder_forward(tokens, xa, params, *, n_head):
    """tokens: (N, T) int32; xa: (N, S, D) float32 -> logits (N, T, n_vocab) float32."""
    N, T = tokens.shape
    V, D = params["tok_emb"].shape  # unpadded vocab size (static from array shape)
    S = xa.shape[1]

    # TODO(synk): token-embedding gather is an irregular lookup; left in plain JAX.
    x = jnp.take(params["tok_emb"], tokens, axis=0) + params["pos_emb"][:T]
    x = x.astype(xa.dtype).reshape(N * T, D)

    # Zero-pad the audio context so cross-attention K/V streams in lane/sublane
    # friendly chunks; padded columns are masked in-kernel (kv_valid).
    S_pad = _round_up(S, 8) if S <= 512 else _round_up(S, 128)
    xa_p = xa if S_pad == S else jnp.pad(xa, ((0, 0), (0, S_pad - S), (0, 0)))
    xa2d = xa_p.reshape(N * S_pad, D)

    for blk in params["blocks"]:
        x = residual_block(x, xa2d, blk, n_batch=N, q_len=T,
                           kv_len=S_pad, kv_valid=S, n_head=n_head)

    # Final LN fused (and cached per row tile) into the logits matmul; the embedding
    # is pre-transposed to (D, V_pad) with the vocab padded to a lane-dense multiple.
    logits = fused_linear(x, params["emb_t"], None,
                          ln=(params["ln_w"], params["ln_b"]),
                          out_dtype=jnp.float32)
    return logits[:, :V].reshape(N, T, V)


# ------------------------------ parameter prep -------------------------------

def init_params(key, n_vocab, n_layer, n_ctx, n_state, n_head):
    """Raw f32 parameters in torch layout (weights are (out_features, in_features))."""
    n_mlp = n_state * 4
    keys = iter(jax.random.split(key, 8 + n_layer * 32))

    def nrm(shape, std=0.02):
        return std * jax.random.normal(next(keys), shape, dtype=jnp.float32)

    def attn_params():
        return {"wq": nrm((n_state, n_state)), "bq": nrm((n_state,)),
                "wk": nrm((n_state, n_state)),
                "wv": nrm((n_state, n_state)), "bv": nrm((n_state,)),
                "wo": nrm((n_state, n_state)), "bo": nrm((n_state,))}

    blocks = []
    for _ in range(n_layer):
        blocks.append({
            "attn_ln_w": jnp.ones((n_state,), jnp.float32),
            "attn_ln_b": jnp.zeros((n_state,), jnp.float32),
            "attn": attn_params(),
            "cross_ln_w": jnp.ones((n_state,), jnp.float32),
            "cross_ln_b": jnp.zeros((n_state,), jnp.float32),
            "cross": attn_params(),
            "mlp_ln_w": jnp.ones((n_state,), jnp.float32),
            "mlp_ln_b": jnp.zeros((n_state,), jnp.float32),
            "mlp_w1": nrm((n_mlp, n_state)), "mlp_b1": nrm((n_mlp,)),
            "mlp_w2": nrm((n_state, n_mlp)), "mlp_b2": nrm((n_state,)),
        })

    mask = jnp.triu(jnp.full((n_ctx, n_ctx), float("-inf"), dtype=jnp.float32), k=1)
    return {"tok_emb": nrm((n_vocab, n_state)), "pos_emb": nrm((n_ctx, n_state)),
            "blocks": blocks,
            "ln_w": jnp.ones((n_state,), jnp.float32),
            "ln_b": jnp.zeros((n_state,), jnp.float32),
            "mask": mask}


def prepare_params(raw, *, n_head, compute_dtype=COMPUTE_DTYPE, vocab_pad=512):
    """One-time kernel-friendly prep: (in, out)-layout bf16 weights (no per-tile
    transposes), attention scale folded into wq/bq, packed QKV/KV, padded vocab."""
    V, D = raw["tok_emb"].shape
    dh = D // n_head
    q_scale = float(dh) ** -0.5              # softmax scale folded into the q proj
    packed = (_head_group(n_head, dh) * dh) % 128 == 0

    def wt(w):                                # torch (out, in) -> (in, out) bf16
        return jnp.asarray(w.T, compute_dtype)

    blocks = []
    for b in raw["blocks"]:
        a, c = b["attn"], b["cross"]
        nb = {"attn_ln_w": b["attn_ln_w"], "attn_ln_b": b["attn_ln_b"],
              "cross_ln_w": b["cross_ln_w"], "cross_ln_b": b["cross_ln_b"],
              "mlp_ln_w": b["mlp_ln_w"], "mlp_ln_b": b["mlp_ln_b"],
              "attn_wo": wt(a["wo"]), "attn_bo": a["bo"],
              "cross_wq": wt(c["wq"] * q_scale), "cross_bq": c["bq"] * q_scale,
              "cross_wo": wt(c["wo"]), "cross_bo": c["bo"],
              "mlp_w1": wt(b["mlp_w1"]), "mlp_b1": b["mlp_b1"],
              "mlp_w2": wt(b["mlp_w2"]), "mlp_b2": b["mlp_b2"]}
        if packed:
            nb["attn_wqkv"] = wt(jnp.concatenate(
                [a["wq"] * q_scale, a["wk"], a["wv"]], axis=0))
            nb["attn_bqkv"] = jnp.concatenate(
                [a["bq"] * q_scale, jnp.zeros((D,), jnp.float32), a["bv"]])
            nb["cross_wkv"] = wt(jnp.concatenate([c["wk"], c["wv"]], axis=0))
            nb["cross_bkv"] = jnp.concatenate([jnp.zeros((D,), jnp.float32), c["bv"]])
        else:
            nb["attn_wq"] = wt(a["wq"] * q_scale); nb["attn_bq"] = a["bq"] * q_scale
            nb["attn_wk"] = wt(a["wk"])
            nb["attn_wv"] = wt(a["wv"]); nb["attn_bv"] = a["bv"]
            nb["cross_wk"] = wt(c["wk"])
            nb["cross_wv"] = wt(c["wv"]); nb["cross_bv"] = c["bv"]
        blocks.append(nb)

    vp = _round_up(V, vocab_pad)
    emb_t = jnp.asarray(raw["tok_emb"].T, compute_dtype)   # (D, V)
    if vp != V:
        emb_t = jnp.pad(emb_t, ((0, 0), (0, vp - V)))

    return {"tok_emb": raw["tok_emb"],   # f32 (V, D): gather + static vocab size
            "emb_t": emb_t,              # bf16 (D, V_pad): logits matmul weight
            "pos_emb": raw["pos_emb"],
            "ln_w": raw["ln_w"], "ln_b": raw["ln_b"], "blocks": blocks}


# ----------------------------- pure-JAX reference ----------------------------

def reference_forward(tokens, xa, raw, *, n_head):
    def ln(h, w, b, eps=LN_EPS):
        m = jnp.mean(h, axis=-1, keepdims=True)
        v = jnp.mean((h - m) ** 2, axis=-1, keepdims=True)
        return (h - m) / jnp.sqrt(v + eps) * w + b

    def attn(hq, hkv, p, msk):
        N, T, D = hq.shape
        S = hkv.shape[1]
        dh = D // n_head
        sc = dh ** (-0.25)
        q = hq @ p["wq"].T + p["bq"]
        k = hkv @ p["wk"].T
        v = hkv @ p["wv"].T + p["bv"]
        q = q.reshape(N, T, n_head, dh).transpose(0, 2, 1, 3) * sc
        k = k.reshape(N, S, n_head, dh).transpose(0, 2, 3, 1) * sc
        v = v.reshape(N, S, n_head, dh).transpose(0, 2, 1, 3)
        s = q @ k
        if msk is not None:
            s = s + msk
        o = (jax.nn.softmax(s, axis=-1) @ v).transpose(0, 2, 1, 3).reshape(N, T, D)
        return o @ p["wo"].T + p["bo"]

    T = tokens.shape[1]
    x = raw["tok_emb"][tokens] + raw["pos_emb"][:T]
    x = x.astype(xa.dtype)
    msk = raw["mask"][:T, :T]
    for b in raw["blocks"]:
        h = ln(x, b["attn_ln_w"], b["attn_ln_b"])
        x = x + attn(h, h, b["attn"], msk)
        h = ln(x, b["cross_ln_w"], b["cross_ln_b"])
        x = x + attn(h, xa, b["cross"], None)
        h = ln(x, b["mlp_ln_w"], b["mlp_ln_b"])
        g1 = h @ b["mlp_w1"].T + b["mlp_b1"]
        g1 = g1 * 0.5 * (1.0 + jax.lax.erf(g1 * 0.7071067811865476))
        x = x + g1 @ b["mlp_w2"].T + b["mlp_b2"]
    x = ln(x, raw["ln_w"], raw["ln_b"])
    return (x @ raw["tok_emb"].T).astype(jnp.float32)


# ------------------------------------ main ------------------------------------

if __name__ == "__main__":
    n_vocab, n_text_layer, n_text_ctx, n_text_state, n_text_head = 64, 2, 8, 32, 4
    batch, n_ctx, n_audio_ctx = 2, 8, 12   # S=12 exercises the kv-padding + mask path

    key = jax.random.PRNGKey(0)
    kp, kt, ka = jax.random.split(key, 3)

    raw = init_params(kp, n_vocab, n_text_layer, n_text_ctx, n_text_state, n_text_head)
    tokens = jax.random.randint(kt, (batch, n_ctx), 0, n_vocab, dtype=jnp.int32)
    xa = jax.random.normal(ka, (batch, n_audio_ctx, n_text_state), dtype=jnp.float32)

    params = prepare_params(raw, n_head=n_text_head)
    fwd = jax.jit(functools.partial(text_decoder_forward, n_head=n_text_head))
    logits = fwd(tokens, xa, params)
    jax.block_until_ready(logits)

    assert logits.shape == (batch, n_ctx, n_vocab), logits.shape
    assert logits.dtype == jnp.float32
    assert bool(jnp.all(jnp.isfinite(logits)))

    ref = reference_forward(tokens, xa, raw, n_head=n_text_head)
    err = float(jnp.max(jnp.abs(logits - ref)))
    assert err < 5e-2, f"max abs err vs f32 reference: {err}"

    # --- extra path checks not covered by the tiny model ---
    # (1) column-first ("decode megacore") matmul grid: one row tile, many column tiles.
    kx, kw = jax.random.split(jax.random.PRNGKey(1))
    xs = jax.random.normal(kx, (16, 256), dtype=jnp.float32)
    ws = (0.05 * jax.random.normal(kw, (256, 2048), dtype=jnp.float32)).astype(COMPUTE_DTYPE)
    y = fused_linear(xs, ws, out_dtype=jnp.float32)
    y_ref = jnp.dot(xs.astype(COMPUTE_DTYPE), ws, preferred_element_type=jnp.float32)
    jax.block_until_ready(y)
    err_mm = float(jnp.max(jnp.abs(y - y_ref)))
    assert err_mm < 5e-2 * (1.0 + float(jnp.max(jnp.abs(y_ref)))), err_mm

    # (2) multi-chunk online-softmax attention with an in-kernel causal mask.
    kq, kk, kv_ = jax.random.split(jax.random.PRNGKey(2), 3)
    Tq, dh_t = 32, 128
    qt = (0.3 * jax.random.normal(kq, (Tq, dh_t))).astype(COMPUTE_DTYPE)
    kt_ = (0.3 * jax.random.normal(kk, (Tq, dh_t))).astype(COMPUTE_DTYPE)
    vt = jax.random.normal(kv_, (Tq, dh_t)).astype(COMPUTE_DTYPE)
    o = attention(qt, kt_, vt, n_batch=1, n_head=1, d_head=dh_t, q_len=Tq,
                  kv_len=Tq, causal=True, max_kv_chunk=8)
    jax.block_until_ready(o)
    sf = jnp.dot(qt.astype(jnp.float32), kt_.astype(jnp.float32).T)
    sf = jnp.where(jnp.tril(jnp.ones((Tq, Tq), dtype=bool)), sf, -jnp.inf)
    o_ref = jnp.dot(jax.nn.softmax(sf, axis=-1), vt.astype(jnp.float32))
    err_at = float(jnp.max(jnp.abs(o.astype(jnp.float32) - o_ref)))
    assert err_at < 5e-2, err_at

    print("KERNEL_OK")
</pallas_src>

<mosaic_0001>
module attributes {stable_mosaic.version = 11 : i64} {
  func.func @_fused_linear_kernel(%arg0: i32, %arg1: i32, %arg2: i32, %arg3: memref<16x32xf32, #tpu.memory_space<vmem>>, %arg4: memref<32x32xbf16, #tpu.memory_space<vmem>>, %arg5: memref<1x32xf32, #tpu.memory_space<vmem>>, %arg6: memref<1x32xf32, #tpu.memory_space<vmem>>, %arg7: memref<1x32xf32, #tpu.memory_space<vmem>>, %arg8: memref<16x32xbf16, #tpu.memory_space<vmem>>, %arg9: memref<16x32xf32, #tpu.memory_space<vmem>>, %arg10: memref<16x32xbf16, #tpu.memory_space<vmem>>) attributes {dimension_semantics = [#tpu.dimension_semantics<parallel>, #tpu.dimension_semantics<arbitrary>, #tpu.dimension_semantics<arbitrary>], iteration_bounds = array<i64: 1, 1, 1>, scalar_prefetch = 0 : i64, scratch_operands = 2 : i64, tpu.core_type = #tpu.core_type<tc>, window_params = [{transform_indices = @transform_0, window_bounds = array<i64: 16, 32>}, {transform_indices = @transform_1, window_bounds = array<i64: 32, 32>}, {pipeline_mode = #tpu.pipeline_mode<synchronous>, transform_indices = @transform_2, window_bounds = array<i64: 1, 32>}, {pipeline_mode = #tpu.pipeline_mode<synchronous>, transform_indices = @transform_3, window_bounds = array<i64: 1, 32>}, {transform_indices = @transform_4, window_bounds = array<i64: 1, 32>}, {transform_indices = @transform_5, window_bounds = array<i64: 16, 32>}]} {
    %c0_i32 = arith.constant 0 : i32
    %0 = arith.cmpi eq, %arg2, %c0_i32 : i32
    %1 = arith.extui %0 : i1 to i32
    %c0_i32_0 = arith.constant 0 : i32
    %2 = arith.cmpi ne, %1, %c0_i32_0 : i32
    scf.if %2 {
      %cst_12 = arith.constant 0.000000e+00 : f32
      %15 = vector.broadcast %cst_12 : f32 to vector<16x32xf32>
      %c0_13 = arith.constant 0 : index
      %c0_14 = arith.constant 0 : index
      %16 = vector.load %arg9[%c0_13, %c0_14] : memref<16x32xf32, #tpu.memory_space<vmem>>, vector<16x32xf32>
      tpu.vector_store %arg9[%c0_13, %c0_14], %15 {strides = array<i32>} : memref<16x32xf32, #tpu.memory_space<vmem>>, vector<16x32xf32>,
    } else {
    }
    %c0_i32_1 = arith.constant 0 : i32
    %3 = arith.cmpi eq, %arg1, %c0_i32_1 : i32
    %4 = arith.extui %3 : i1 to i32
    %c0_i32_2 = arith.constant 0 : i32
    %5 = arith.cmpi ne, %4, %c0_i32_2 : i32
    scf.if %5 {
      %c0_12 = arith.constant 0 : index
      %c0_13 = arith.constant 0 : index
      %15 = vector.load %arg3[%c0_12, %c0_13] : memref<16x32xf32, #tpu.memory_space<vmem>>, vector<16x32xf32>
      %cst_14 = arith.constant dense<0.000000e+00> : vector<16xf32>
      %16 = vector.multi_reduction <add>, %15, %cst_14 [1] : vector<16x32xf32> to vector<16xf32>
      %17 = vector.shape_cast %16 : vector<16xf32> to vector<16x1xf32>
      %cst_15 = arith.constant 3.200000e+01 : f32
      %18 = vector.broadcast %cst_15 : f32 to vector<16x1xf32>
      %19 = arith.divf %17, %18 : vector<16x1xf32>
      %20 = vector.broadcast %19 : vector<16x1xf32> to vector<16x32xf32>
      %21 = arith.subf %15, %20 : vector<16x32xf32>
      %22 = arith.mulf %21, %21 : vector<16x32xf32>
      %cst_16 = arith.constant dense<0.000000e+00> : vector<16xf32>
      %23 = vector.multi_reduction <add>, %22, %cst_16 [1] : vector<16x32xf32> to vector<16xf32>
      %24 = vector.shape_cast %23 : vector<16xf32> to vector<16x1xf32>
      %cst_17 = arith.constant 3.200000e+01 : f32
      %25 = vector.broadcast %cst_17 : f32 to vector<16x1xf32>
      %26 = arith.divf %24, %25 : vector<16x1xf32>
      %27 = vector.broadcast %19 : vector<16x1xf32> to vector<16x32xf32>
      %28 = arith.subf %15, %27 : vector<16x32xf32>
      %cst_18 = arith.constant 9.99999974E-6 : f32
      %29 = vector.broadcast %cst_18 : f32 to vector<16x1xf32>
      %30 = arith.addf %26, %29 : vector<16x1xf32>
      %31 = math.rsqrt %30 : vector<16x1xf32>
      %32 = vector.broadcast %31 : vector<16x1xf32> to vector<16x32xf32>
      %33 = arith.mulf %28, %32 : vector<16x32xf32>
      %c0_19 = arith.constant 0 : index
      %c0_20 = arith.constant 0 : index
      %34 = vector.load %arg5[%c0_19, %c0_20] : memref<1x32xf32, #tpu.memory_space<vmem>>, vector<1x32xf32>
      %35 = vector.broadcast %34 : vector<1x32xf32> to vector<16x32xf32>
      %36 = arith.mulf %33, %35 : vector<16x32xf32>
      %c0_21 = arith.constant 0 : index
      %c0_22 = arith.constant 0 : index
      %37 = vector.load %arg6[%c0_21, %c0_22] : memref<1x32xf32, #tpu.memory_space<vmem>>, vector<1x32xf32>
      %38 = vector.broadcast %37 : vector<1x32xf32> to vector<16x32xf32>
      %39 = arith.addf %36, %38 : vector<16x32xf32>
      %40 = arith.truncf %39 : vector<16x32xf32> to vector<16x32xbf16>
      %c0_23 = arith.constant 0 : index
      %c0_24 = arith.constant 0 : index
      %41 = vector.load %arg10[%c0_23, %c0_24] : memref<16x32xbf16, #tpu.memory_space<vmem>>, vector<16x32xbf16>
      tpu.vector_store %arg10[%c0_23, %c0_24], %40 {strides = array<i32>} : memref<16x32xbf16, #tpu.memory_space<vmem>>, vector<16x32xbf16>,
    } else {
    }
    %c0 = arith.constant 0 : index
    %c0_3 = arith.constant 0 : index
    %6 = vector.load %arg10[%c0, %c0_3] : memref<16x32xbf16, #tpu.memory_space<vmem>>, vector<16x32xbf16>
    %c0_4 = arith.constant 0 : index
    %c0_5 = arith.constant 0 : index
    %7 = vector.load %arg9[%c0_4, %c0_5] : memref<16x32xf32, #tpu.memory_space<vmem>>, vector<16x32xf32>
    %c0_6 = arith.constant 0 : index
    %c0_7 = arith.constant 0 : index
    %8 = vector.load %arg4[%c0_6, %c0_7] : memref<32x32xbf16, #tpu.memory_space<vmem>>, vector<32x32xbf16>
    %cst = arith.constant dense<0.000000e+00> : vector<16x32xf32>
    %9 = tpu.matmul %6, %8, %cst {dimension_numbers = #tpu.dot_dimension_numbers<[1], [0], [0], [1], [0, 0, 1, 1], [], []>} : vector<16x32xbf16>, vector<32x32xbf16>, vector<16x32xf32> -> vector<16x32xf32>
    %10 = arith.addf %7, %9 : vector<16x32xf32>
    %c0_8 = arith.constant 0 : index
    %c0_9 = arith.constant 0 : index
    %11 = vector.load %arg9[%c0_8, %c0_9] : memref<16x32xf32, #tpu.memory_space<vmem>>, vector<16x32xf32>
    tpu.vector_store %arg9[%c0_8, %c0_9], %10 {strides = array<i32>} : memref<16x32xf32, #tpu.memory_space<vmem>>, vector<16x32xf32>,
    %c0_i32_10 = arith.constant 0 : i32
    %12 = arith.cmpi eq, %arg2, %c0_i32_10 : i32
    %13 = arith.extui %12 : i1 to i32
    %c0_i32_11 = arith.constant 0 : i32
    %14 = arith.cmpi ne, %13, %c0_i32_11 : i32
    scf.if %14 {
      %c0_12 = arith.constant 0 : index
      %c0_13 = arith.constant 0 : index
      %15 = vector.load %arg9[%c0_12, %c0_13] : memref<16x32xf32, #tpu.memory_space<vmem>>, vector<16x32xf32>
      %c0_14 = arith.constant 0 : index
      %c0_15 = arith.constant 0 : index
      %16 = vector.load %arg7[%c0_14, %c0_15] : memref<1x32xf32, #tpu.memory_space<vmem>>, vector<1x32xf32>
      %17 = vector.broadcast %16 : vector<1x32xf32> to vector<16x32xf32>
      %18 = arith.addf %15, %17 : vector<16x32xf32>
      %19 = arith.truncf %18 : vector<16x32xf32> to vector<16x32xbf16>
      %c0_16 = arith.constant 0 : index
      %c0_17 = arith.constant 0 : index
      %20 = vector.load %arg8[%c0_16, %c0_17] : memref<16x32xbf16, #tpu.memory_space<vmem>>, vector<16x32xbf16>
      tpu.vector_store %arg8[%c0_16, %c0_17], %19 {strides = array<i32>} : memref<16x32xbf16, #tpu.memory_space<vmem>>, vector<16x32xbf16>,
    } else {
    }
    return
  }
  func.func @transform_0(%arg0: i32, %arg1: i32, %arg2: i32) -> (i32, i32) {
    %c0_i32 = arith.constant 0 : i32
    return %arg0, %arg2 : i32, i32
  }
  func.func @transform_1(%arg0: i32, %arg1: i32, %arg2: i32) -> (i32, i32) {
    %c0_i32 = arith.constant 0 : i32
    return %arg2, %arg1 : i32, i32
  }
  func.func @transform_2(%arg0: i32, %arg1: i32, %arg2: i32) -> (i32, i32) {
    %c0_i32 = arith.constant 0 : i32
    %c0_i32_0 = arith.constant 0 : i32
    %c0_i32_1 = arith.constant 0 : i32
    return %c0_i32, %c0_i32_0 : i32, i32
  }
  func.func @transform_3(%arg0: i32, %arg1: i32, %arg2: i32) -> (i32, i32) {
    %c0_i32 = arith.constant 0 : i32
    %c0_i32_0 = arith.constant 0 : i32
    %c0_i32_1 = arith.constant 0 : i32
    return %c0_i32, %c0_i32_0 : i32, i32
  }
  func.func @transform_4(%arg0: i32, %arg1: i32, %arg2: i32) -> (i32, i32) {
    %c0_i32 = arith.constant 0 : i32
    %c0_i32_0 = arith.constant 0 : i32
    return %c0_i32, %arg1 : i32, i32
  }
  func.func @transform_5(%arg0: i32, %arg1: i32, %arg2: i32) -> (i32, i32) {
    %c0_i32 = arith.constant 0 : i32
    return %arg0, %arg1 : i32, i32
  }
}

module attributes {stable_mosaic.version = 11 : i64} {
  func.func @_fused_linear_kernel(%arg0: i32, %arg1: i32, %arg2: i32, %arg3: memref<16x32xf32, #tpu.memory_space<vmem>>, %arg4: memref<32x32xbf16, #tpu.memory_space<vmem>>, %arg5: memref<1x32xf32, #tpu.memory_space<vmem>>, %arg6: memref<1x32xf32, #tpu.memory_space<vmem>>, %arg7: memref<16x32xbf16, #tpu.memory_space<vmem>>, %arg8: memref<16x32xf32, #tpu.memory_space<vmem>>, %arg9: memref<16x32xbf16, #tpu.memory_space<vmem>>) attributes {dimension_semantics = [#tpu.dimension_semantics<parallel>, #tpu.dimension_semantics<arbitrary>, #tpu.dimension_semantics<arbitrary>], iteration_bounds = array<i64: 1, 1, 1>, scalar_prefetch = 0 : i64, scratch_operands = 2 : i64, tpu.core_type = #tpu.core_type<tc>, window_params = [{transform_indices = @transform_0, window_bounds = array<i64: 16, 32>}, {transform_indices = @transform_1, window_bounds = array<i64: 32, 32>}, {pipeline_mode = #tpu.pipeline_mode<synchronous>, transform_indices = @transform_2, window_bounds = array<i64: 1, 32>}, {pipeline_mode = #tpu.pipeline_mode<synchronous>, transform_indices = @transform_3, window_bounds = array<i64: 1, 32>}, {transform_indices = @transform_4, window_bounds = array<i64: 16, 32>}]} {
    %c0_i32 = arith.constant 0 : i32
    %0 = arith.cmpi eq, %arg2, %c0_i32 : i32
    %1 = arith.extui %0 : i1 to i32
    %c0_i32_0 = arith.constant 0 : i32
    %2 = arith.cmpi ne, %1, %c0_i32_0 : i32
    scf.if %2 {
      %cst_12 = arith.constant 0.000000e+00 : f32
      %15 = vector.broadcast %cst_12 : f32 to vector<16x32xf32>
      %c0_13 = arith.constant 0 : index
      %c0_14 = arith.constant 0 : index
      %16 = vector.load %arg8[%c0_13, %c0_14] : memref<16x32xf32, #tpu.memory_space<vmem>>, vector<16x32xf32>
      tpu.vector_store %arg8[%c0_13, %c0_14], %15 {strides = array<i32>} : memref<16x32xf32, #tpu.memory_space<vmem>>, vector<16x32xf32>,
    } else {
    }
    %c0_i32_1 = arith.constant 0 : i32
    %3 = arith.cmpi eq, %arg1, %c0_i32_1 : i32
    %4 = arith.extui %3 : i1 to i32
    %c0_i32_2 = arith.constant 0 : i32
    %5 = arith.cmpi ne, %4, %c0_i32_2 : i32
    scf.if %5 {
      %c0_12 = arith.constant 0 : index
      %c0_13 = arith.constant 0 : index
      %15 = vector.load %arg3[%c0_12, %c0_13] : memref<16x32xf32, #tpu.memory_space<vmem>>, vector<16x32xf32>
      %cst_14 = arith.constant dense<0.000000e+00> : vector<16xf32>
      %16 = vector.multi_reduction <add>, %15, %cst_14 [1] : vector<16x32xf32> to vector<16xf32>
      %17 = vector.shape_cast %16 : vector<16xf32> to vector<16x1xf32>
      %cst_15 = arith.constant 3.200000e+01 : f32
      %18 = vector.broadcast %cst_15 : f32 to vector<16x1xf32>
      %19 = arith.divf %17, %18 : vector<16x1xf32>
      %20 = vector.broadcast %19 : vector<16x1xf32> to vector<16x32xf32>
      %21 = arith.subf %15, %20 : vector<16x32xf32>
      %22 = arith.mulf %21, %21 : vector<16x32xf32>
      %cst_16 = arith.constant dense<0.000000e+00> : vector<16xf32>
      %23 = vector.multi_reduction <add>, %22, %cst_16 [1] : vector<16x32xf32> to vector<16xf32>
      %24 = vector.shape_cast %23 : vector<16xf32> to vector<16x1xf32>
      %cst_17 = arith.constant 3.200000e+01 : f32
      %25 = vector.broadcast %cst_17 : f32 to vector<16x1xf32>
      %26 = arith.divf %24, %25 : vector<16x1xf32>
      %27 = vector.broadcast %19 : vector<16x1xf32> to vector<16x32xf32>
      %28 = arith.subf %15, %27 : vector<16x32xf32>
      %cst_18 = arith.constant 9.99999974E-6 : f32
      %29 = vector.broadcast %cst_18 : f32 to vector<16x1xf32>
      %30 = arith.addf %26, %29 : vector<16x1xf32>
      %31 = math.rsqrt %30 : vector<16x1xf32>
      %32 = vector.broadcast %31 : vector<16x1xf32> to vector<16x32xf32>
      %33 = arith.mulf %28, %32 : vector<16x32xf32>
      %c0_19 = arith.constant 0 : index
      %c0_20 = arith.constant 0 : index
      %34 = vector.load %arg5[%c0_19, %c0_20] : memref<1x32xf32, #tpu.memory_space<vmem>>, vector<1x32xf32>
      %35 = vector.broadcast %34 : vector<1x32xf32> to vector<16x32xf32>
      %36 = arith.mulf %33, %35 : vector<16x32xf32>
      %c0_21 = arith.constant 0 : index
      %c0_22 = arith.constant 0 : index
      %37 = vector.load %arg6[%c0_21, %c0_22] : memref<1x32xf32, #tpu.memory_space<vmem>>, vector<1x32xf32>
      %38 = vector.broadcast %37 : vector<1x32xf32> to vector<16x32xf32>
      %39 = arith.addf %36, %38 : vector<16x32xf32>
      %40 = arith.truncf %39 : vector<16x32xf32> to vector<16x32xbf16>
      %c0_23 = arith.constant 0 : index
      %c0_24 = arith.constant 0 : index
      %41 = vector.load %arg9[%c0_23, %c0_24] : memref<16x32xbf16, #tpu.memory_space<vmem>>, vector<16x32xbf16>
      tpu.vector_store %arg9[%c0_23, %c0_24], %40 {strides = array<i32>} : memref<16x32xbf16, #tpu.memory_space<vmem>>, vector<16x32xbf16>,
    } else {
    }
    %c0 = arith.constant 0 : index
    %c0_3 = arith.constant 0 : index
    %6 = vector.load %arg9[%c0, %c0_3] : memref<16x32xbf16, #tpu.memory_space<vmem>>, vector<16x32xbf16>
    %c0_4 = arith.constant 0 : index
    %c0_5 = arith.constant 0 : index
    %7 = vector.load %arg8[%c0_4, %c0_5] : memref<16x32xf32, #tpu.memory_space<vmem>>, vector<16x32xf32>
    %c0_6 = arith.constant 0 : index
    %c0_7 = arith.constant 0 : index
    %8 = vector.load %arg4[%c0_6, %c0_7] : memref<32x32xbf16, #tpu.memory_space<vmem>>, vector<32x32xbf16>
    %cst = arith.constant dense<0.000000e+00> : vector<16x32xf32>
    %9 = tpu.matmul %6, %8, %cst {dimension_numbers = #tpu.dot_dimension_numbers<[1], [0], [0], [1], [0, 0, 1, 1], [], []>} : vector<16x32xbf16>, vector<32x32xbf16>, vector<16x32xf32> -> vector<16x32xf32>
    %10 = arith.addf %7, %9 : vector<16x32xf32>
    %c0_8 = arith.constant 0 : index
    %c0_9 = arith.constant 0 : index
    %11 = vector.load %arg8[%c0_8, %c0_9] : memref<16x32xf32, #tpu.memory_space<vmem>>, vector<16x32xf32>
    tpu.vector_store %arg8[%c0_8, %c0_9], %10 {strides = array<i32>} : memref<16x32xf32, #tpu.memory_space<vmem>>, vector<16x32xf32>,
    %c0_i32_10 = arith.constant 0 : i32
    %12 = arith.cmpi eq, %arg2, %c0_i32_10 : i32
    %13 = arith.extui %12 : i1 to i32
    %c0_i32_11 = arith.constant 0 : i32
    %14 = arith.cmpi ne, %13, %c0_i32_11 : i32
    scf.if %14 {
      %c0_12 = arith.constant 0 : index
      %c0_13 = arith.constant 0 : index
      %15 = vector.load %arg8[%c0_12, %c0_13] : memref<16x32xf32, #tpu.memory_space<vmem>>, vector<16x32xf32>
      %16 = arith.truncf %15 : vector<16x32xf32> to vector<16x32xbf16>
      %c0_14 = arith.constant 0 : index
      %c0_15 = arith.constant 0 : index
      %17 = vector.load %arg7[%c0_14, %c0_15] : memref<16x32xbf16, #tpu.memory_space<vmem>>, vector<16x32xbf16>
      tpu.vector_store %arg7[%c0_14, %c0_15], %16 {strides = array<i32>} : memref<16x32xbf16, #tpu.memory_space<vmem>>, vector<16x32xbf16>,
    } else {
    }
    return
  }
  func.func @transform_0(%arg0: i32, %arg1: i32, %arg2: i32) -> (i32, i32) {
    %c0_i32 = arith.constant 0 : i32
    return %arg0, %arg2 : i32, i32
  }
  func.func @transform_1(%arg0: i32, %arg1: i32, %arg2: i32) -> (i32, i32) {
    %c0_i32 = arith.constant 0 : i32
    return %arg2, %arg1 : i32, i32
  }
  func.func @transform_2(%arg0: i32, %arg1: i32, %arg2: i32) -> (i32, i32) {
    %c0_i32 = arith.constant 0 : i32
    %c0_i32_0 = arith.constant 0 : i32
    %c0_i32_1 = arith.constant 0 : i32
    return %c0_i32, %c0_i32_0 : i32, i32
  }
  func.func @transform_3(%arg0: i32, %arg1: i32, %arg2: i32) -> (i32, i32) {
    %c0_i32 = arith.constant 0 : i32
    %c0_i32_0 = arith.constant 0 : i32
    %c0_i32_1 = arith.constant 0 : i32
    return %c0_i32, %c0_i32_0 : i32, i32
  }
  func.func @transform_4(%arg0: i32, %arg1: i32, %arg2: i32) -> (i32, i32) {
    %c0_i32 = arith.constant 0 : i32
    return %arg0, %arg1 : i32, i32
  }
}

module attributes {stable_mosaic.version = 11 : i64} {
  func.func @_fused_linear_kernel(%arg0: i32, %arg1: i32, %arg2: i32, %arg3: memref<16x32xbf16, #tpu.memory_space<vmem>>, %arg4: memref<32x32xbf16, #tpu.memory_space<vmem>>, %arg5: memref<1x32xf32, #tpu.memory_space<vmem>>, %arg6: memref<16x32xf32, #tpu.memory_space<vmem>>, %arg7: memref<16x32xf32, #tpu.memory_space<vmem>>, %arg8: memref<16x32xf32, #tpu.memory_space<vmem>>) attributes {dimension_semantics = [#tpu.dimension_semantics<parallel>, #tpu.dimension_semantics<parallel>, #tpu.dimension_semantics<arbitrary>], iteration_bounds = array<i64: 1, 1, 1>, scalar_prefetch = 0 : i64, scratch_operands = 1 : i64, tpu.core_type = #tpu.core_type<tc>, window_params = [{transform_indices = @transform_0, window_bounds = array<i64: 16, 32>}, {transform_indices = @transform_1, window_bounds = array<i64: 32, 32>}, {transform_indices = @transform_2, window_bounds = array<i64: 1, 32>}, {transform_indices = @transform_3, window_bounds = array<i64: 16, 32>}, {transform_indices = @transform_4, window_bounds = array<i64: 16, 32>}]} {
    %c0_i32 = arith.constant 0 : i32
    %0 = arith.cmpi eq, %arg2, %c0_i32 : i32
    %1 = arith.extui %0 : i1 to i32
    %c0_i32_0 = arith.constant 0 : i32
    %2 = arith.cmpi ne, %1, %c0_i32_0 : i32
    scf.if %2 {
      %cst_10 = arith.constant 0.000000e+00 : f32
      %12 = vector.broadcast %cst_10 : f32 to vector<16x32xf32>
      %c0_11 = arith.constant 0 : index
      %c0_12 = arith.constant 0 : index
      %13 = vector.load %arg8[%c0_11, %c0_12] : memref<16x32xf32, #tpu.memory_space<vmem>>, vector<16x32xf32>
      tpu.vector_store %arg8[%c0_11, %c0_12], %12 {strides = array<i32>} : memref<16x32xf32, #tpu.memory_space<vmem>>, vector<16x32xf32>,
    } else {
    }
    %c0 = arith.constant 0 : index
    %c0_1 = arith.constant 0 : index
    %3 = vector.load %arg3[%c0, %c0_1] : memref<16x32xbf16, #tpu.memory_space<vmem>>, vector<16x32xbf16>
    %c0_2 = arith.constant 0 : index
    %c0_3 = arith.constant 0 : index
    %4 = vector.load %arg8[%c0_2, %c0_3] : memref<16x32xf32, #tpu.memory_space<vmem>>, vector<16x32xf32>
    %c0_4 = arith.constant 0 : index
    %c0_5 = arith.constant 0 : index
    %5 = vector.load %arg4[%c0_4, %c0_5] : memref<32x32xbf16, #tpu.memory_space<vmem>>, vector<32x32xbf16>
    %cst = arith.constant dense<0.000000e+00> : vector<16x32xf32>
    %6 = tpu.matmul %3, %5, %cst {dimension_numbers = #tpu.dot_dimension_numbers<[1], [0], [0], [1], [0, 0, 1, 1], [], []>} : vector<16x32xbf16>, vector<32x32xbf16>, vector<16x32xf32> -> vector<16x32xf32>
    %7 = arith.addf %4, %6 : vector<16x32xf32>
    %c0_6 = arith.constant 0 : index
    %c0_7 = arith.constant 0 : index
    %8 = vector.load %arg8[%c0_6, %c0_7] : memref<16x32xf32, #tpu.memory_space<vmem>>, vector<16x32xf32>
    tpu.vector_store %arg8[%c0_6, %c0_7], %7 {strides = array<i32>} : memref<16x32xf32, #tpu.memory_space<vmem>>, vector<16x32xf32>,
    %c0_i32_8 = arith.constant 0 : i32
    %9 = arith.cmpi eq, %arg2, %c0_i32_8 : i32
    %10 = arith.extui %9 : i1 to i32
    %c0_i32_9 = arith.constant 0 : i32
    %11 = arith.cmpi ne, %10, %c0_i32_9 : i32
    scf.if %11 {
      %c0_10 = arith.constant 0 : index
      %c0_11 = arith.constant 0 : index
      %12 = vector.load %arg8[%c0_10, %c0_11] : memref<16x32xf32, #tpu.memory_space<vmem>>, vector<16x32xf32>
      %c0_12 = arith.constant 0 : index
      %c0_13 = arith.constant 0 : index
      %13 = vector.load %arg5[%c0_12, %c0_13] : memref<1x32xf32, #tpu.memory_space<vmem>>, vector<1x32xf32>
      %14 = vector.broadcast %13 : vector<1x32xf32> to vector<16x32xf32>
      %15 = arith.addf %12, %14 : vector<16x32xf32>
      %c0_14 = arith.constant 0 : index
      %c0_15 = arith.constant 0 : index
      %16 = vector.load %arg6[%c0_14, %c0_15] : memref<16x32xf32, #tpu.memory_space<vmem>>, vector<16x32xf32>
      %17 = arith.addf %15, %16 : vector<16x32xf32>
      %c0_16 = arith.constant 0 : index
      %c0_17 = arith.constant 0 : index
      %18 = vector.load %arg7[%c0_16, %c0_17] : memref<16x32xf32, #tpu.memory_space<vmem>>, vector<16x32xf32>
      tpu.vector_store %arg7[%c0_16, %c0_17], %17 {strides = array<i32>} : memref<16x32xf32, #tpu.memory_space<vmem>>, vector<16x32xf32>,
    } else {
    }
    return
  }
  func.func @transform_0(%arg0: i32, %arg1: i32, %arg2: i32) -> (i32, i32) {
    %c0_i32 = arith.constant 0 : i32
    return %arg0, %arg2 : i32, i32
  }
  func.func @transform_1(%arg0: i32, %arg1: i32, %arg2: i32) -> (i32, i32) {
    %c0_i32 = arith.constant 0 : i32
    return %arg2, %arg1 : i32, i32
  }
  func.func @transform_2(%arg0: i32, %arg1: i32, %arg2: i32) -> (i32, i32) {
    %c0_i32 = arith.constant 0 : i32
    %c0_i32_0 = arith.constant 0 : i32
    return %c0_i32, %arg1 : i32, i32
  }
  func.func @transform_3(%arg0: i32, %arg1: i32, %arg2: i32) -> (i32, i32) {
    %c0_i32 = arith.constant 0 : i32
    return %arg0, %arg1 : i32, i32
  }
  func.func @transform_4(%arg0: i32, %arg1: i32, %arg2: i32) -> (i32, i32) {
    %c0_i32 = arith.constant 0 : i32
    return %arg0, %arg1 : i32, i32
  }
}

module attributes {stable_mosaic.version = 11 : i64} {
  func.func @_flash_attention_kernel(%arg0: i32, %arg1: i32, %arg2: i32, %arg3: memref<8x32xbf16, #tpu.memory_space<vmem>>, %arg4: memref<8x32xbf16, #tpu.memory_space<vmem>>, %arg5: memref<8x32xbf16, #tpu.memory_space<vmem>>, %arg6: memref<8x32xbf16, #tpu.memory_space<vmem>>, %arg7: memref<4x8x1xf32, #tpu.memory_space<vmem>>, %arg8: memref<4x8x1xf32, #tpu.memory_space<vmem>>, %arg9: memref<4x8x8xf32, #tpu.memory_space<vmem>>) attributes {dimension_semantics = [#tpu.dimension_semantics<parallel>, #tpu.dimension_semantics<parallel>, #tpu.dimension_semantics<arbitrary>], iteration_bounds = array<i64: 2, 1, 1>, scalar_prefetch = 0 : i64, scratch_operands = 3 : i64, tpu.core_type = #tpu.core_type<tc>, window_params = [{transform_indices = @transform_0, window_bounds = array<i64: 8, 32>}, {transform_indices = @transform_1, window_bounds = array<i64: 8, 32>}, {transform_indices = @transform_2, window_bounds = array<i64: 8, 32>}, {transform_indices = @transform_3, window_bounds = array<i64: 8, 32>}]} {
    %c0_i32 = arith.constant 0 : i32
    %0 = arith.cmpi eq, %arg2, %c0_i32 : i32
    %1 = arith.extui %0 : i1 to i32
    %c0_i32_0 = arith.constant 0 : i32
    %2 = arith.cmpi ne, %1, %c0_i32_0 : i32
    scf.if %2 {
      %cst_111 = arith.constant -1.000000e+30 : f32
      %164 = vector.broadcast %cst_111 : f32 to vector<4x8x1xf32>
      %c0_112 = arith.constant 0 : index
      %c0_113 = arith.constant 0 : index
      %c0_114 = arith.constant 0 : index
      %165 = vector.load %arg7[%c0_112, %c0_113, %c0_114] : memref<4x8x1xf32, #tpu.memory_space<vmem>>, vector<4x8x1xf32>
      tpu.vector_store %arg7[%c0_112, %c0_113, %c0_114], %164 {strides = array<i32>} : memref<4x8x1xf32, #tpu.memory_space<vmem>>, vector<4x8x1xf32>,
      %cst_115 = arith.constant 0.000000e+00 : f32
      %166 = vector.broadcast %cst_115 : f32 to vector<4x8x1xf32>
      %c0_116 = arith.constant 0 : index
      %c0_117 = arith.constant 0 : index
      %c0_118 = arith.constant 0 : index
      %167 = vector.load %arg8[%c0_116, %c0_117, %c0_118] : memref<4x8x1xf32, #tpu.memory_space<vmem>>, vector<4x8x1xf32>
      tpu.vector_store %arg8[%c0_116, %c0_117, %c0_118], %166 {strides = array<i32>} : memref<4x8x1xf32, #tpu.memory_space<vmem>>, vector<4x8x1xf32>,
      %cst_119 = arith.constant 0.000000e+00 : f32
      %168 = vector.broadcast %cst_119 : f32 to vector<4x8x8xf32>
      %c0_120 = arith.constant 0 : index
      %c0_121 = arith.constant 0 : index
      %c0_122 = arith.constant 0 : index
      %169 = vector.load %arg9[%c0_120, %c0_121, %c0_122] : memref<4x8x8xf32, #tpu.memory_space<vmem>>, vector<4x8x8xf32>
      tpu.vector_store %arg9[%c0_120, %c0_121, %c0_122], %168 {strides = array<i32>} : memref<4x8x8xf32, #tpu.memory_space<vmem>>, vector<4x8x8xf32>,
    } else {
    }
    %3 = tpu.iota {dimensions = array<i32: 1>} : vector<8x8xi32>
    %c8_i32 = arith.constant 8 : i32
    %4 = arith.muli %arg2, %c8_i32 : i32
    %5 = vector.broadcast %4 : i32 to vector<8x8xi32>
    %6 = arith.addi %3, %5 : vector<8x8xi32>
    %7 = tpu.iota {dimensions = array<i32: 0>} : vector<8x8xi32>
    %8 = arith.cmpi sle, %6, %7 : vector<8x8xi32>
    %c0 = arith.constant 0 : index
    %c0_1 = arith.constant 0 : index
    %9 = vector.load %arg3[%c0, %c0_1] : memref<8x32xbf16, #tpu.memory_space<vmem>>, vector<8x8xbf16>
    %c0_2 = arith.constant 0 : index
    %c0_3 = arith.constant 0 : index
    %10 = vector.load %arg4[%c0_2, %c0_3] : memref<8x32xbf16, #tpu.memory_space<vmem>>, vector<8x8xbf16>
    %c0_4 = arith.constant 0 : index
    %c0_5 = arith.constant 0 : index
    %11 = vector.load %arg5[%c0_4, %c0_5] : memref<8x32xbf16, #tpu.memory_space<vmem>>, vector<8x8xbf16>
    %cst = arith.constant dense<0.000000e+00> : vector<8x8xf32>
    %12 = tpu.matmul %9, %10, %cst {dimension_numbers = #tpu.dot_dimension_numbers<[1], [1], [0], [0], [0, 0, 1, 0], [], []>} : vector<8x8xbf16>, vector<8x8xbf16>, vector<8x8xf32> -> vector<8x8xf32>
    %cst_6 = arith.constant -1.000000e+30 : f32
    %13 = vector.broadcast %cst_6 : f32 to vector<8x8xf32>
    %14 = arith.select %8, %12, %13 : vector<8x8xi1>, vector<8x8xf32>
    %c0_7 = arith.constant 0 : index
    %c0_8 = arith.constant 0 : index
    %c0_9 = arith.constant 0 : index
    %15 = vector.load %arg7[%c0_7, %c0_8, %c0_9] : memref<4x8x1xf32, #tpu.memory_space<vmem>>, vector<1x8x1xf32>
    %16 = vector.shape_cast %15 : vector<1x8x1xf32> to vector<8x1xf32>
    %cst_10 = arith.constant dense<0xFF800000> : vector<8xf32>
    %17 = vector.multi_reduction <maximumf>, %14, %cst_10 [1] : vector<8x8xf32> to vector<8xf32>
    %18 = vector.shape_cast %17 : vector<8xf32> to vector<8x1xf32>
    %19 = arith.maximumf %16, %18 : vector<8x1xf32>
    %20 = arith.subf %16, %19 : vector<8x1xf32>
    %21 = math.exp %20 : vector<8x1xf32>
    %22 = vector.broadcast %19 : vector<8x1xf32> to vector<8x8xf32>
    %23 = arith.subf %14, %22 : vector<8x8xf32>
    %24 = math.exp %23 : vector<8x8xf32>
    %c0_11 = arith.constant 0 : index
    %c0_12 = arith.constant 0 : index
    %c0_13 = arith.constant 0 : index
    %25 = vector.load %arg8[%c0_11, %c0_12, %c0_13] : memref<4x8x1xf32, #tpu.memory_space<vmem>>, vector<1x8x1xf32>
    %26 = vector.shape_cast %25 : vector<1x8x1xf32> to vector<8x1xf32>
    %27 = arith.mulf %21, %26 : vector<8x1xf32>
    %cst_14 = arith.constant dense<0.000000e+00> : vector<8xf32>
    %28 = vector.multi_reduction <add>, %24, %cst_14 [1] : vector<8x8xf32> to vector<8xf32>
    %29 = vector.shape_cast %28 : vector<8xf32> to vector<8x1xf32>
    %30 = arith.addf %27, %29 : vector<8x1xf32>
    %c0_15 = arith.constant 0 : index
    %c0_16 = arith.constant 0 : index
    %c0_17 = arith.constant 0 : index
    %31 = vector.load %arg8[%c0_15, %c0_16, %c0_17] : memref<4x8x1xf32, #tpu.memory_space<vmem>>, vector<1x8x1xf32>
    %32 = vector.shape_cast %31 : vector<1x8x1xf32> to vector<8x1xf32>
    %33 = vector.shape_cast %30 : vector<8x1xf32> to vector<1x8x1xf32>
    tpu.vector_store %arg8[%c0_15, %c0_16, %c0_17], %33 {strides = array<i32>} : memref<4x8x1xf32, #tpu.memory_space<vmem>>, vector<1x8x1xf32>,
    %c0_18 = arith.constant 0 : index
    %c0_19 = arith.constant 0 : index
    %c0_20 = arith.constant 0 : index
    %34 = vector.load %arg9[%c0_18, %c0_19, %c0_20] : memref<4x8x8xf32, #tpu.memory_space<vmem>>, vector<1x8x8xf32>
    %35 = vector.shape_cast %34 : vector<1x8x8xf32> to vector<8x8xf32>
    %36 = vector.broadcast %21 : vector<8x1xf32> to vector<8x8xf32>
    %37 = arith.mulf %36, %35 : vector<8x8xf32>
    %38 = arith.truncf %24 : vector<8x8xf32> to vector<8x8xbf16>
    %cst_21 = arith.constant dense<0.000000e+00> : vector<8x8xf32>
    %39 = tpu.matmul %38, %11, %cst_21 {dimension_numbers = #tpu.dot_dimension_numbers<[1], [0], [0], [1], [0, 0, 1, 1], [], []>} : vector<8x8xbf16>, vector<8x8xbf16>, vector<8x8xf32> -> vector<8x8xf32>
    %40 = arith.addf %37, %39 : vector<8x8xf32>
    %c0_22 = arith.constant 0 : index
    %c0_23 = arith.constant 0 : index
    %c0_24 = arith.constant 0 : index
    %41 = vector.load %arg9[%c0_22, %c0_23, %c0_24] : memref<4x8x8xf32, #tpu.memory_space<vmem>>, vector<1x8x8xf32>
    %42 = vector.shape_cast %41 : vector<1x8x8xf32> to vector<8x8xf32>
    %43 = vector.shape_cast %40 : vector<8x8xf32> to vector<1x8x8xf32>
    tpu.vector_store %arg9[%c0_22, %c0_23, %c0_24], %43 {strides = array<i32>} : memref<4x8x8xf32, #tpu.memory_space<vmem>>, vector<1x8x8xf32>,
    %c0_25 = arith.constant 0 : index
    %c0_26 = arith.constant 0 : index
    %c0_27 = arith.constant 0 : index
    %44 = vector.load %arg7[%c0_25, %c0_26, %c0_27] : memref<4x8x1xf32, #tpu.memory_space<vmem>>, vector<1x8x1xf32>
    %45 = vector.shape_cast %44 : vector<1x8x1xf32> to vector<8x1xf32>
    %46 = vector.shape_cast %19 : vector<8x1xf32> to vector<1x8x1xf32>
    tpu.vector_store %arg7[%c0_25, %c0_26, %c0_27], %46 {strides = array<i32>} : memref<4x8x1xf32, #tpu.memory_space<vmem>>, vector<1x8x1xf32>,
    %c0_28 = arith.constant 0 : index
    %c8 = arith.constant 8 : index
    %47 = vector.load %arg3[%c0_28, %c8] : memref<8x32xbf16, #tpu.memory_space<vmem>>, vector<8x8xbf16>
    %c0_29 = arith.constant 0 : index
    %c8_30 = arith.constant 8 : index
    %48 = vector.load %arg4[%c0_29, %c8_30] : memref<8x32xbf16, #tpu.memory_space<vmem>>, vector<8x8xbf16>
    %c0_31 = arith.constant 0 : index
    %c8_32 = arith.constant 8 : index
    %49 = vector.load %arg5[%c0_31, %c8_32] : memref<8x32xbf16, #tpu.memory_space<vmem>>, vector<8x8xbf16>
    %cst_33 = arith.constant dense<0.000000e+00> : vector<8x8xf32>
    %50 = tpu.matmul %47, %48, %cst_33 {dimension_numbers = #tpu.dot_dimension_numbers<[1], [1], [0], [0], [0, 0, 1, 0], [], []>} : vector<8x8xbf16>, vector<8x8xbf16>, vector<8x8xf32> -> vector<8x8xf32>
    %cst_34 = arith.constant -1.000000e+30 : f32
    %51 = vector.broadcast %cst_34 : f32 to vector<8x8xf32>
    %52 = arith.select %8, %50, %51 : vector<8x8xi1>, vector<8x8xf32>
    %c1 = arith.constant 1 : index
    %c0_35 = arith.constant 0 : index
    %c0_36 = arith.constant 0 : index
    %53 = vector.load %arg7[%c1, %c0_35, %c0_36] : memref<4x8x1xf32, #tpu.memory_space<vmem>>, vector<1x8x1xf32>
    %54 = vector.shape_cast %53 : vector<1x8x1xf32> to vector<8x1xf32>
    %cst_37 = arith.constant dense<0xFF800000> : vector<8xf32>
    %55 = vector.multi_reduction <maximumf>, %52, %cst_37 [1] : vector<8x8xf32> to vector<8xf32>
    %56 = vector.shape_cast %55 : vector<8xf32> to vector<8x1xf32>
    %57 = arith.maximumf %54, %56 : vector<8x1xf32>
    %58 = arith.subf %54, %57 : vector<8x1xf32>
    %59 = math.exp %58 : vector<8x1xf32>
    %60 = vector.broadcast %57 : vector<8x1xf32> to vector<8x8xf32>
    %61 = arith.subf %52, %60 : vector<8x8xf32>
    %62 = math.exp %61 : vector<8x8xf32>
    %c1_38 = arith.constant 1 : index
    %c0_39 = arith.constant 0 : index
    %c0_40 = arith.constant 0 : index
    %63 = vector.load %arg8[%c1_38, %c0_39, %c0_40] : memref<4x8x1xf32, #tpu.memory_space<vmem>>, vector<1x8x1xf32>
    %64 = vector.shape_cast %63 : vector<1x8x1xf32> to vector<8x1xf32>
    %65 = arith.mulf %59, %64 : vector<8x1xf32>
    %cst_41 = arith.constant dense<0.000000e+00> : vector<8xf32>
    %66 = vector.multi_reduction <add>, %62, %cst_41 [1] : vector<8x8xf32> to vector<8xf32>
    %67 = vector.shape_cast %66 : vector<8xf32> to vector<8x1xf32>
    %68 = arith.addf %65, %67 : vector<8x1xf32>
    %c1_42 = arith.constant 1 : index
    %c0_43 = arith.constant 0 : index
    %c0_44 = arith.constant 0 : index
    %69 = vector.load %arg8[%c1_42, %c0_43, %c0_44] : memref<4x8x1xf32, #tpu.memory_space<vmem>>, vector<1x8x1xf32>
    %70 = vector.shape_cast %69 : vector<1x8x1xf32> to vector<8x1xf32>
    %71 = vector.shape_cast %68 : vector<8x1xf32> to vector<1x8x1xf32>
    tpu.vector_store %arg8[%c1_42, %c0_43, %c0_44], %71 {strides = array<i32>} : memref<4x8x1xf32, #tpu.memory_space<vmem>>, vector<1x8x1xf32>,
    %c1_45 = arith.constant 1 : index
    %c0_46 = arith.constant 0 : index
    %c0_47 = arith.constant 0 : index
    %72 = vector.load %arg9[%c1_45, %c0_46, %c0_47] : memref<4x8x8xf32, #tpu.memory_space<vmem>>, vector<1x8x8xf32>
    %73 = vector.shape_cast %72 : vector<1x8x8xf32> to vector<8x8xf32>
    %74 = vector.broadcast %59 : vector<8x1xf32> to vector<8x8xf32>
    %75 = arith.mulf %74, %73 : vector<8x8xf32>
    %76 = arith.truncf %62 : vector<8x8xf32> to vector<8x8xbf16>
    %cst_48 = arith.constant dense<0.000000e+00> : vector<8x8xf32>
    %77 = tpu.matmul %76, %49, %cst_48 {dimension_numbers = #tpu.dot_dimension_numbers<[1], [0], [0], [1], [0, 0, 1, 1], [], []>} : vector<8x8xbf16>, vector<8x8xbf16>, vector<8x8xf32> -> vector<8x8xf32>
    %78 = arith.addf %75, %77 : vector<8x8xf32>
    %c1_49 = arith.constant 1 : index
    %c0_50 = arith.constant 0 : index
    %c0_51 = arith.constant 0 : index
    %79 = vector.load %arg9[%c1_49, %c0_50, %c0_51] : memref<4x8x8xf32, #tpu.memory_space<vmem>>, vector<1x8x8xf32>
    %80 = vector.shape_cast %79 : vector<1x8x8xf32> to vector<8x8xf32>
    %81 = vector.shape_cast %78 : vector<8x8xf32> to vector<1x8x8xf32>
    tpu.vector_store %arg9[%c1_49, %c0_50, %c0_51], %81 {strides = array<i32>} : memref<4x8x8xf32, #tpu.memory_space<vmem>>, vector<1x8x8xf32>,
    %c1_52 = arith.constant 1 : index
    %c0_53 = arith.constant 0 : index
    %c0_54 = arith.constant 0 : index
    %82 = vector.load %arg7[%c1_52, %c0_53, %c0_54] : memref<4x8x1xf32, #tpu.memory_space<vmem>>, vector<1x8x1xf32>
    %83 = vector.shape_cast %82 : vector<1x8x1xf32> to vector<8x1xf32>
    %84 = vector.shape_cast %57 : vector<8x1xf32> to vector<1x8x1xf32>
    tpu.vector_store %arg7[%c1_52, %c0_53, %c0_54], %84 {strides = array<i32>} : memref<4x8x1xf32, #tpu.memory_space<vmem>>, vector<1x8x1xf32>,
    %c0_55 = arith.constant 0 : index
    %c16 = arith.constant 16 : index
    %85 = vector.load %arg3[%c0_55, %c16] : memref<8x32xbf16, #tpu.memory_space<vmem>>, vector<8x8xbf16>
    %c0_56 = arith.constant 0 : index
    %c16_57 = arith.constant 16 : index
    %86 = vector.load %arg4[%c0_56, %c16_57] : memref<8x32xbf16, #tpu.memory_space<vmem>>, vector<8x8xbf16>
    %c0_58 = arith.constant 0 : index
    %c16_59 = arith.constant 16 : index
    %87 = vector.load %arg5[%c0_58, %c16_59] : memref<8x32xbf16, #tpu.memory_space<vmem>>, vector<8x8xbf16>
    %cst_60 = arith.constant dense<0.000000e+00> : vector<8x8xf32>
    %88 = tpu.matmul %85, %86, %cst_60 {dimension_numbers = #tpu.dot_dimension_numbers<[1], [1], [0], [0], [0, 0, 1, 0], [], []>} : vector<8x8xbf16>, vector<8x8xbf16>, vector<8x8xf32> -> vector<8x8xf32>
    %cst_61 = arith.constant -1.000000e+30 : f32
    %89 = vector.broadcast %cst_61 : f32 to vector<8x8xf32>
    %90 = arith.select %8, %88, %89 : vector<8x8xi1>, vector<8x8xf32>
    %c2 = arith.constant 2 : index
    %c0_62 = arith.constant 0 : index
    %c0_63 = arith.constant 0 : index
    %91 = vector.load %arg7[%c2, %c0_62, %c0_63] : memref<4x8x1xf32, #tpu.memory_space<vmem>>, vector<1x8x1xf32>
    %92 = vector.shape_cast %91 : vector<1x8x1xf32> to vector<8x1xf32>
    %cst_64 = arith.constant dense<0xFF800000> : vector<8xf32>
    %93 = vector.multi_reduction <maximumf>, %90, %cst_64 [1] : vector<8x8xf32> to vector<8xf32>
    %94 = vector.shape_cast %93 : vector<8xf32> to vector<8x1xf32>
    %95 = arith.maximumf %92, %94 : vector<8x1xf32>
    %96 = arith.subf %92, %95 : vector<8x1xf32>
    %97 = math.exp %96 : vector<8x1xf32>
    %98 = vector.broadcast %95 : vector<8x1xf32> to vector<8x8xf32>
    %99 = arith.subf %90, %98 : vector<8x8xf32>
    %100 = math.exp %99 : vector<8x8xf32>
    %c2_65 = arith.constant 2 : index
    %c0_66 = arith.constant 0 : index
    %c0_67 = arith.constant 0 : index
    %101 = vector.load %arg8[%c2_65, %c0_66, %c0_67] : memref<4x8x1xf32, #tpu.memory_space<vmem>>, vector<1x8x1xf32>
    %102 = vector.shape_cast %101 : vector<1x8x1xf32> to vector<8x1xf32>
    %103 = arith.mulf %97, %102 : vector<8x1xf32>
    %cst_68 = arith.constant dense<0.000000e+00> : vector<8xf32>
    %104 = vector.multi_reduction <add>, %100, %cst_68 [1] : vector<8x8xf32> to vector<8xf32>
    %105 = vector.shape_cast %104 : vector<8xf32> to vector<8x1xf32>
    %106 = arith.addf %103, %105 : vector<8x1xf32>
    %c2_69 = arith.constant 2 : index
    %c0_70 = arith.constant 0 : index
    %c0_71 = arith.constant 0 : index
    %107 = vector.load %arg8[%c2_69, %c0_70, %c0_71] : memref<4x8x1xf32, #tpu.memory_space<vmem>>, vector<1x8x1xf32>
    %108 = vector.shape_cast %107 : vector<1x8x1xf32> to vector<8x1xf32>
    %109 = vector.shape_cast %106 : vector<8x1xf32> to vector<1x8x1xf32>
    tpu.vector_store %arg8[%c2_69, %c0_70, %c0_71], %109 {strides = array<i32>} : memref<4x8x1xf32, #tpu.memory_space<vmem>>, vector<1x8x1xf32>,
    %c2_72 = arith.constant 2 : index
    %c0_73 = arith.constant 0 : index
    %c0_74 = arith.constant 0 : index
    %110 = vector.load %arg9[%c2_72, %c0_73, %c0_74] : memref<4x8x8xf32, #tpu.memory_space<vmem>>, vector<1x8x8xf32>
    %111 = vector.shape_cast %110 : vector<1x8x8xf32> to vector<8x8xf32>
    %112 = vector.broadcast %97 : vector<8x1xf32> to vector<8x8xf32>
    %113 = arith.mulf %112, %111 : vector<8x8xf32>
    %114 = arith.truncf %100 : vector<8x8xf32> to vector<8x8xbf16>
    %cst_75 = arith.constant dense<0.000000e+00> : vector<8x8xf32>
    %115 = tpu.matmul %114, %87, %cst_75 {dimension_numbers = #tpu.dot_dimension_numbers<[1], [0], [0], [1], [0, 0, 1, 1], [], []>} : vector<8x8xbf16>, vector<8x8xbf16>, vector<8x8xf32> -> vector<8x8xf32>
    %116 = arith.addf %113, %115 : vector<8x8xf32>
    %c2_76 = arith.constant 2 : index
    %c0_77 = arith.constant 0 : index
    %c0_78 = arith.constant 0 : index
    %117 = vector.load %arg9[%c2_76, %c0_77, %c0_78] : memref<4x8x8xf32, #tpu.memory_space<vmem>>, vector<1x8x8xf32>
    %118 = vector.shape_cast %117 : vector<1x8x8xf32> to vector<8x8xf32>
    %119 = vector.shape_cast %116 : vector<8x8xf32> to vector<1x8x8xf32>
    tpu.vector_store %arg9[%c2_76, %c0_77, %c0_78], %119 {strides = array<i32>} : memref<4x8x8xf32, #tpu.memory_space<vmem>>, vector<1x8x8xf32>,
    %c2_79 = arith.constant 2 : index
    %c0_80 = arith.constant 0 : index
    %c0_81 = arith.constant 0 : index
    %120 = vector.load %arg7[%c2_79, %c0_80, %c0_81] : memref<4x8x1xf32, #tpu.memory_space<vmem>>, vector<1x8x1xf32>
    %121 = vector.shape_cast %120 : vector<1x8x1xf32> to vector<8x1xf32>
    %122 = vector.shape_cast %95 : vector<8x1xf32> to vector<1x8x1xf32>
    tpu.vector_store %arg7[%c2_79, %c0_80, %c0_81], %122 {strides = array<i32>} : memref<4x8x1xf32, #tpu.memory_space<vmem>>, vector<1x8x1xf32>,
    %c0_82 = arith.constant 0 : index
    %c24 = arith.constant 24 : index
    %123 = vector.load %arg3[%c0_82, %c24] : memref<8x32xbf16, #tpu.memory_space<vmem>>, vector<8x8xbf16>
    %c0_83 = arith.constant 0 : index
    %c24_84 = arith.constant 24 : index
    %124 = vector.load %arg4[%c0_83, %c24_84] : memref<8x32xbf16, #tpu.memory_space<vmem>>, vector<8x8xbf16>
    %c0_85 = arith.constant 0 : index
    %c24_86 = arith.constant 24 : index
    %125 = vector.load %arg5[%c0_85, %c24_86] : memref<8x32xbf16, #tpu.memory_space<vmem>>, vector<8x8xbf16>
    %cst_87 = arith.constant dense<0.000000e+00> : vector<8x8xf32>
    %126 = tpu.matmul %123, %124, %cst_87 {dimension_numbers = #tpu.dot_dimension_numbers<[1], [1], [0], [0], [0, 0, 1, 0], [], []>} : vector<8x8xbf16>, vector<8x8xbf16>, vector<8x8xf32> -> vector<8x8xf32>
    %cst_88 = arith.constant -1.000000e+30 : f32
    %127 = vector.broadcast %cst_88 : f32 to vector<8x8xf32>
    %128 = arith.select %8, %126, %127 : vector<8x8xi1>, vector<8x8xf32>
    %c3 = arith.constant 3 : index
    %c0_89 = arith.constant 0 : index
    %c0_90 = arith.constant 0 : index
    %129 = vector.load %arg7[%c3, %c0_89, %c0_90] : memref<4x8x1xf32, #tpu.memory_space<vmem>>, vector<1x8x1xf32>
    %130 = vector.shape_cast %129 : vector<1x8x1xf32> to vector<8x1xf32>
    %cst_91 = arith.constant dense<0xFF800000> : vector<8xf32>
    %131 = vector.multi_reduction <maximumf>, %128, %cst_91 [1] : vector<8x8xf32> to vector<8xf32>
    %132 = vector.shape_cast %131 : vector<8xf32> to vector<8x1xf32>
    %133 = arith.maximumf %130, %132 : vector<8x1xf32>
    %134 = arith.subf %130, %133 : vector<8x1xf32>
    %135 = math.exp %134 : vector<8x1xf32>
    %136 = vector.broadcast %133 : vector<8x1xf32> to vector<8x8xf32>
    %137 = arith.subf %128, %136 : vector<8x8xf32>
    %138 = math.exp %137 : vector<8x8xf32>
    %c3_92 = arith.constant 3 : index
    %c0_93 = arith.constant 0 : index
    %c0_94 = arith.constant 0 : index
    %139 = vector.load %arg8[%c3_92, %c0_93, %c0_94] : memref<4x8x1xf32, #tpu.memory_space<vmem>>, vector<1x8x1xf32>
    %140 = vector.shape_cast %139 : vector<1x8x1xf32> to vector<8x1xf32>
    %141 = arith.mulf %135, %140 : vector<8x1xf32>
    %cst_95 = arith.constant dense<0.000000e+00> : vector<8xf32>
    %142 = vector.multi_reduction <add>, %138, %cst_95 [1] : vector<8x8xf32> to vector<8xf32>
    %143 = vector.shape_cast %142 : vector<8xf32> to vector<8x1xf32>
    %144 = arith.addf %141, %143 : vector<8x1xf32>
    %c3_96 = arith.constant 3 : index
    %c0_97 = arith.constant 0 : index
    %c0_98 = arith.constant 0 : index
    %145 = vector.load %arg8[%c3_96, %c0_97, %c0_98] : memref<4x8x1xf32, #tpu.memory_space<vmem>>, vector<1x8x1xf32>
    %146 = vector.shape_cast %145 : vector<1x8x1xf32> to vector<8x1xf32>
    %147 = vector.shape_cast %144 : vector<8x1xf32> to vector<1x8x1xf32>
    tpu.vector_store %arg8[%c3_96, %c0_97, %c0_98], %147 {strides = array<i32>} : memref<4x8x1xf32, #tpu.memory_space<vmem>>, vector<1x8x1xf32>,
    %c3_99 = arith.constant 3 : index
    %c0_100 = arith.constant 0 : index
    %c0_101 = arith.constant 0 : index
    %148 = vector.load %arg9[%c3_99, %c0_100, %c0_101] : memref<4x8x8xf32, #tpu.memory_space<vmem>>, vector<1x8x8xf32>
    %149 = vector.shape_cast %148 : vector<1x8x8xf32> to vector<8x8xf32>
    %150 = vector.broadcast %135 : vector<8x1xf32> to vector<8x8xf32>
    %151 = arith.mulf %150, %149 : vector<8x8xf32>
    %152 = arith.truncf %138 : vector<8x8xf32> to vector<8x8xbf16>
    %cst_102 = arith.constant dense<0.000000e+00> : vector<8x8xf32>
    %153 = tpu.matmul %152, %125, %cst_102 {dimension_numbers = #tpu.dot_dimension_numbers<[1], [0], [0], [1], [0, 0, 1, 1], [], []>} : vector<8x8xbf16>, vector<8x8xbf16>, vector<8x8xf32> -> vector<8x8xf32>
    %154 = arith.addf %151, %153 : vector<8x8xf32>
    %c3_103 = arith.constant 3 : index
    %c0_104 = arith.constant 0 : index
    %c0_105 = arith.constant 0 : index
    %155 = vector.load %arg9[%c3_103, %c0_104, %c0_105] : memref<4x8x8xf32, #tpu.memory_space<vmem>>, vector<1x8x8xf32>
    %156 = vector.shape_cast %155 : vector<1x8x8xf32> to vector<8x8xf32>
    %157 = vector.shape_cast %154 : vector<8x8xf32> to vector<1x8x8xf32>
    tpu.vector_store %arg9[%c3_103, %c0_104, %c0_105], %157 {strides = array<i32>} : memref<4x8x8xf32, #tpu.memory_space<vmem>>, vector<1x8x8xf32>,
    %c3_106 = arith.constant 3 : index
    %c0_107 = arith.constant 0 : index
    %c0_108 = arith.constant 0 : index
    %158 = vector.load %arg7[%c3_106, %c0_107, %c0_108] : memref<4x8x1xf32, #tpu.memory_space<vmem>>, vector<1x8x1xf32>
    %159 = vector.shape_cast %158 : vector<1x8x1xf32> to vector<8x1xf32>
    %160 = vector.shape_cast %133 : vector<8x1xf32> to vector<1x8x1xf32>
    tpu.vector_store %arg7[%c3_106, %c0_107, %c0_108], %160 {strides = array<i32>} : memref<4x8x1xf32, #tpu.memory_space<vmem>>, vector<1x8x1xf32>,
    %c0_i32_109 = arith.constant 0 : i32
    %161 = arith.cmpi eq, %arg2, %c0_i32_109 : i32
    %162 = arith.extui %161 : i1 to i32
    %c0_i32_110 = arith.constant 0 : i32
    %163 = arith.cmpi ne, %162, %c0_i32_110 : i32
    scf.if %163 {
      %c0_111 = arith.constant 0 : index
      %c0_112 = arith.constant 0 : index
      %c0_113 = arith.constant 0 : index
      %164 = vector.load %arg8[%c0_111, %c0_112, %c0_113] : memref<4x8x1xf32, #tpu.memory_space<vmem>>, vector<1x8x1xf32>
      %165 = vector.shape_cast %164 : vector<1x8x1xf32> to vector<8x1xf32>
      %166 = tpu.reciprocal %165 {approx = true} : vector<8x1xf32> -> vector<8x1xf32>
      %c0_114 = arith.constant 0 : index
      %c0_115 = arith.constant 0 : index
      %c0_116 = arith.constant 0 : index
      %167 = vector.load %arg9[%c0_114, %c0_115, %c0_116] : memref<4x8x8xf32, #tpu.memory_space<vmem>>, vector<1x8x8xf32>
      %168 = vector.shape_cast %167 : vector<1x8x8xf32> to vector<8x8xf32>
      %169 = vector.broadcast %166 : vector<8x1xf32> to vector<8x8xf32>
      %170 = arith.mulf %168, %169 : vector<8x8xf32>
      %171 = arith.truncf %170 : vector<8x8xf32> to vector<8x8xbf16>
      %c0_117 = arith.constant 0 : index
      %c0_118 = arith.constant 0 : index
      %172 = vector.load %arg6[%c0_117, %c0_118] : memref<8x32xbf16, #tpu.memory_space<vmem>>, vector<8x8xbf16>
      tpu.vector_store %arg6[%c0_117, %c0_118], %171 {strides = array<i32>} : memref<8x32xbf16, #tpu.memory_space<vmem>>, vector<8x8xbf16>,
      %c1_119 = arith.constant 1 : index
      %c0_120 = arith.constant 0 : index
      %c0_121 = arith.constant 0 : index
      %173 = vector.load %arg8[%c1_119, %c0_120, %c0_121] : memref<4x8x1xf32, #tpu.memory_space<vmem>>, vector<1x8x1xf32>
      %174 = vector.shape_cast %173 : vector<1x8x1xf32> to vector<8x1xf32>
      %175 = tpu.reciprocal %174 {approx = true} : vector<8x1xf32> -> vector<8x1xf32>
      %c1_122 = arith.constant 1 : index
      %c0_123 = arith.constant 0 : index
      %c0_124 = arith.constant 0 : index
      %176 = vector.load %arg9[%c1_122, %c0_123, %c0_124] : memref<4x8x8xf32, #tpu.memory_space<vmem>>, vector<1x8x8xf32>
      %177 = vector.shape_cast %176 : vector<1x8x8xf32> to vector<8x8xf32>
      %178 = vector.broadcast %175 : vector<8x1xf32> to vector<8x8xf32>
      %179 = arith.mulf %177, %178 : vector<8x8xf32>
      %180 = arith.truncf %179 : vector<8x8xf32> to vector<8x8xbf16>
      %c0_125 = arith.constant 0 : index
      %c8_126 = arith.constant 8 : index
      %181 = vector.load %arg6[%c0_125, %c8_126] : memref<8x32xbf16, #tpu.memory_space<vmem>>, vector<8x8xbf16>
      tpu.vector_store %arg6[%c0_125, %c8_126], %180 {strides = array<i32>} : memref<8x32xbf16, #tpu.memory_space<vmem>>, vector<8x8xbf16>,
      %c2_127 = arith.constant 2 : index
      %c0_128 = arith.constant 0 : index
      %c0_129 = arith.constant 0 : index
      %182 = vector.load %arg8[%c2_127, %c0_128, %c0_129] : memref<4x8x1xf32, #tpu.memory_space<vmem>>, vector<1x8x1xf32>
      %183 = vector.shape_cast %182 : vector<1x8x1xf32> to vector<8x1xf32>
      %184 = tpu.reciprocal %183 {approx = true} : vector<8x1xf32> -> vector<8x1xf32>
      %c2_130 = arith.constant 2 : index
      %c0_131 = arith.constant 0 : index
      %c0_132 = arith.constant 0 : index
      %185 = vector.load %arg9[%c2_130, %c0_131, %c0_132] : memref<4x8x8xf32, #tpu.memory_space<vmem>>, vector<1x8x8xf32>
      %186 = vector.shape_cast %185 : vector<1x8x8xf32> to vector<8x8xf32>
      %187 = vector.broadcast %184 : vector<8x1xf32> to vector<8x8xf32>
      %188 = arith.mulf %186, %187 : vector<8x8xf32>
      %189 = arith.truncf %188 : vector<8x8xf32> to vector<8x8xbf16>
      %c0_133 = arith.constant 0 : index
      %c16_134 = arith.constant 16 : index
      %190 = vector.load %arg6[%c0_133, %c16_134] : memref<8x32xbf16, #tpu.memory_space<vmem>>, vector<8x8xbf16>
      tpu.vector_store %arg6[%c0_133, %c16_134], %189 {strides = array<i32>} : memref<8x32xbf16, #tpu.memory_space<vmem>>, vector<8x8xbf16>,
      %c3_135 = arith.constant 3 : index
      %c0_136 = arith.constant 0 : index
      %c0_137 = arith.constant 0 : index
      %191 = vector.load %arg8[%c3_135, %c0_136, %c0_137] : memref<4x8x1xf32, #tpu.memory_space<vmem>>, vector<1x8x1xf32>
      %192 = vector.shape_cast %191 : vector<1x8x1xf32> to vector<8x1xf32>
      %193 = tpu.reciprocal %192 {approx = true} : vector<8x1xf32> -> vector<8x1xf32>
      %c3_138 = arith.constant 3 : index
      %c0_139 = arith.constant 0 : index
      %c0_140 = arith.constant 0 : index
      %194 = vector.load %arg9[%c3_138, %c0_139, %c0_140] : memref<4x8x8xf32, #tpu.memory_space<vmem>>, vector<1x8x8xf32>
      %195 = vector.shape_cast %194 : vector<1x8x8xf32> to vector<8x8xf32>
      %196 = vector.broadcast %193 : vector<8x1xf32> to vector<8x8xf32>
      %197 = arith.mulf %195, %196 : vector<8x8xf32>
      %198 = arith.truncf %197 : vector<8x8xf32> to vector<8x8xbf16>
      %c0_141 = arith.constant 0 : index
      %c24_142 = arith.constant 24 : index
      %199 = vector.load %arg6[%c0_141, %c24_142] : memref<8x32xbf16, #tpu.memory_space<vmem>>, vector<8x8xbf16>
      tpu.vector_store %arg6[%c0_141, %c24_142], %198 {strides = array<i32>} : memref<8x32xbf16, #tpu.memory_space<vmem>>, vector<8x8xbf16>,
    } else {
    }
    return
  }
  func.func @transform_0(%arg0: i32, %arg1: i32, %arg2: i32) -> (i32, i32) {
    %c0_i32 = arith.constant 0 : i32
    %0 = arith.addi %c0_i32, %arg1 : i32
    %c0_i32_0 = arith.constant 0 : i32
    return %arg0, %0 : i32, i32
  }
  func.func @transform_1(%arg0: i32, %arg1: i32, %arg2: i32) -> (i32, i32) {
    %c1_i32 = arith.constant 1 : i32
    %0 = arith.muli %arg0, %c1_i32 : i32
    %1 = arith.addi %0, %arg2 : i32
    %c0_i32 = arith.constant 0 : i32
    %2 = arith.addi %c0_i32, %arg1 : i32
    %c0_i32_0 = arith.constant 0 : i32
    return %1, %2 : i32, i32
  }
  func.func @transform_2(%arg0: i32, %arg1: i32, %arg2: i32) -> (i32, i32) {
    %c1_i32 = arith.constant 1 : i32
    %0 = arith.muli %arg0, %c1_i32 : i32
    %1 = arith.addi %0, %arg2 : i32
    %c0_i32 = arith.constant 0 : i32
    %2 = arith.addi %c0_i32, %arg1 : i32
    %c0_i32_0 = arith.constant 0 : i32
    return %1, %2 : i32, i32
  }
  func.func @transform_3(%arg0: i32, %arg1: i32, %arg2: i32) -> (i32, i32) {
    %c0_i32 = arith.constant 0 : i32
    return %arg0, %arg1 : i32, i32
  }
}

module attributes {stable_mosaic.version = 11 : i64} {
  func.func @_fused_linear_kernel(%arg0: i32, %arg1: i32, %arg2: i32, %arg3: memref<32x32xf32, #tpu.memory_space<vmem>>, %arg4: memref<32x32xbf16, #tpu.memory_space<vmem>>, %arg5: memref<32x32xbf16, #tpu.memory_space<vmem>>, %arg6: memref<32x32xf32, #tpu.memory_space<vmem>>) attributes {dimension_semantics = [#tpu.dimension_semantics<parallel>, #tpu.dimension_semantics<parallel>, #tpu.dimension_semantics<arbitrary>], iteration_bounds = array<i64: 1, 1, 1>, scalar_prefetch = 0 : i64, scratch_operands = 1 : i64, tpu.core_type = #tpu.core_type<tc>, window_params = [{transform_indices = @transform_0, window_bounds = array<i64: 32, 32>}, {transform_indices = @transform_1, window_bounds = array<i64: 32, 32>}, {transform_indices = @transform_2, window_bounds = array<i64: 32, 32>}]} {
    %c0_i32 = arith.constant 0 : i32
    %0 = arith.cmpi eq, %arg2, %c0_i32 : i32
    %1 = arith.extui %0 : i1 to i32
    %c0_i32_0 = arith.constant 0 : i32
    %2 = arith.cmpi ne, %1, %c0_i32_0 : i32
    scf.if %2 {
      %cst_10 = arith.constant 0.000000e+00 : f32
      %13 = vector.broadcast %cst_10 : f32 to vector<32x32xf32>
      %c0_11 = arith.constant 0 : index
      %c0_12 = arith.constant 0 : index
      %14 = vector.load %arg6[%c0_11, %c0_12] : memref<32x32xf32, #tpu.memory_space<vmem>>, vector<32x32xf32>
      tpu.vector_store %arg6[%c0_11, %c0_12], %13 {strides = array<i32>} : memref<32x32xf32, #tpu.memory_space<vmem>>, vector<32x32xf32>,
    } else {
    }
    %c0 = arith.constant 0 : index
    %c0_1 = arith.constant 0 : index
    %3 = vector.load %arg3[%c0, %c0_1] : memref<32x32xf32, #tpu.memory_space<vmem>>, vector<32x32xf32>
    %4 = arith.truncf %3 : vector<32x32xf32> to vector<32x32xbf16>
    %c0_2 = arith.constant 0 : index
    %c0_3 = arith.constant 0 : index
    %5 = vector.load %arg6[%c0_2, %c0_3] : memref<32x32xf32, #tpu.memory_space<vmem>>, vector<32x32xf32>
    %c0_4 = arith.constant 0 : index
    %c0_5 = arith.constant 0 : index
    %6 = vector.load %arg4[%c0_4, %c0_5] : memref<32x32xbf16, #tpu.memory_space<vmem>>, vector<32x32xbf16>
    %cst = arith.constant dense<0.000000e+00> : vector<32x32xf32>
    %7 = tpu.matmul %4, %6, %cst {dimension_numbers = #tpu.dot_dimension_numbers<[1], [0], [0], [1], [0, 0, 1, 1], [], []>} : vector<32x32xbf16>, vector<32x32xbf16>, vector<32x32xf32> -> vector<32x32xf32>
    %8 = arith.addf %5, %7 : vector<32x32xf32>
    %c0_6 = arith.constant 0 : index
    %c0_7 = arith.constant 0 : index
    %9 = vector.load %arg6[%c0_6, %c0_7] : memref<32x32xf32, #tpu.memory_space<vmem>>, vector<32x32xf32>
    tpu.vector_store %arg6[%c0_6, %c0_7], %8 {strides = array<i32>} : memref<32x32xf32, #tpu.memory_space<vmem>>, vector<32x32xf32>,
    %c0_i32_8 = arith.constant 0 : i32
    %10 = arith.cmpi eq, %arg2, %c0_i32_8 : i32
    %11 = arith.extui %10 : i1 to i32
    %c0_i32_9 = arith.constant 0 : i32
    %12 = arith.cmpi ne, %11, %c0_i32_9 : i32
    scf.if %12 {
      %c0_10 = arith.constant 0 : index
      %c0_11 = arith.constant 0 : index
      %13 = vector.load %arg6[%c0_10, %c0_11] : memref<32x32xf32, #tpu.memory_space<vmem>>, vector<32x32xf32>
      %14 = arith.truncf %13 : vector<32x32xf32> to vector<32x32xbf16>
      %c0_12 = arith.constant 0 : index
      %c0_13 = arith.constant 0 : index
      %15 = vector.load %arg5[%c0_12, %c0_13] : memref<32x32xbf16, #tpu.memory_space<vmem>>, vector<32x32xbf16>
      tpu.vector_store %arg5[%c0_12, %c0_13], %14 {strides = array<i32>} : memref<32x32xbf16, #tpu.memory_space<vmem>>, vector<32x32xbf16>,
    } else {
    }
    return
  }
  func.func @transform_0(%arg0: i32, %arg1: i32, %arg2: i32) -> (i32, i32) {
    %c0_i32 = arith.constant 0 : i32
    return %arg0, %arg2 : i32, i32
  }
  func.func @transform_1(%arg0: i32, %arg1: i32, %arg2: i32) -> (i32, i32) {
    %c0_i32 = arith.constant 0 : i32
    return %arg2, %arg1 : i32, i32
  }
  func.func @transform_2(%arg0: i32, %arg1: i32, %arg2: i32) -> (i32, i32) {
    %c0_i32 = arith.constant 0 : i32
    return %arg0, %arg1 : i32, i32
  }
}

module attributes {stable_mosaic.version = 11 : i64} {
  func.func @_fused_linear_kernel(%arg0: i32, %arg1: i32, %arg2: i32, %arg3: memref<32x32xf32, #tpu.memory_space<vmem>>, %arg4: memref<32x32xbf16, #tpu.memory_space<vmem>>, %arg5: memref<1x32xf32, #tpu.memory_space<vmem>>, %arg6: memref<32x32xbf16, #tpu.memory_space<vmem>>, %arg7: memref<32x32xf32, #tpu.memory_space<vmem>>) attributes {dimension_semantics = [#tpu.dimension_semantics<parallel>, #tpu.dimension_semantics<parallel>, #tpu.dimension_semantics<arbitrary>], iteration_bounds = array<i64: 1, 1, 1>, scalar_prefetch = 0 : i64, scratch_operands = 1 : i64, tpu.core_type = #tpu.core_type<tc>, window_params = [{transform_indices = @transform_0, window_bounds = array<i64: 32, 32>}, {transform_indices = @transform_1, window_bounds = array<i64: 32, 32>}, {transform_indices = @transform_2, window_bounds = array<i64: 1, 32>}, {transform_indices = @transform_3, window_bounds = array<i64: 32, 32>}]} {
    %c0_i32 = arith.constant 0 : i32
    %0 = arith.cmpi eq, %arg2, %c0_i32 : i32
    %1 = arith.extui %0 : i1 to i32
    %c0_i32_0 = arith.constant 0 : i32
    %2 = arith.cmpi ne, %1, %c0_i32_0 : i32
    scf.if %2 {
      %cst_10 = arith.constant 0.000000e+00 : f32
      %13 = vector.broadcast %cst_10 : f32 to vector<32x32xf32>
      %c0_11 = arith.constant 0 : index
      %c0_12 = arith.constant 0 : index
      %14 = vector.load %arg7[%c0_11, %c0_12] : memref<32x32xf32, #tpu.memory_space<vmem>>, vector<32x32xf32>
      tpu.vector_store %arg7[%c0_11, %c0_12], %13 {strides = array<i32>} : memref<32x32xf32, #tpu.memory_space<vmem>>, vector<32x32xf32>,
    } else {
    }
    %c0 = arith.constant 0 : index
    %c0_1 = arith.constant 0 : index
    %3 = vector.load %arg3[%c0, %c0_1] : memref<32x32xf32, #tpu.memory_space<vmem>>, vector<32x32xf32>
    %4 = arith.truncf %3 : vector<32x32xf32> to vector<32x32xbf16>
    %c0_2 = arith.constant 0 : index
    %c0_3 = arith.constant 0 : index
    %5 = vector.load %arg7[%c0_2, %c0_3] : memref<32x32xf32, #tpu.memory_space<vmem>>, vector<32x32xf32>
    %c0_4 = arith.constant 0 : index
    %c0_5 = arith.constant 0 : index
    %6 = vector.load %arg4[%c0_4, %c0_5] : memref<32x32xbf16, #tpu.memory_space<vmem>>, vector<32x32xbf16>
    %cst = arith.constant dense<0.000000e+00> : vector<32x32xf32>
    %7 = tpu.matmul %4, %6, %cst {dimension_numbers = #tpu.dot_dimension_numbers<[1], [0], [0], [1], [0, 0, 1, 1], [], []>} : vector<32x32xbf16>, vector<32x32xbf16>, vector<32x32xf32> -> vector<32x32xf32>
    %8 = arith.addf %5, %7 : vector<32x32xf32>
    %c0_6 = arith.constant 0 : index
    %c0_7 = arith.constant 0 : index
    %9 = vector.load %arg7[%c0_6, %c0_7] : memref<32x32xf32, #tpu.memory_space<vmem>>, vector<32x32xf32>
    tpu.vector_store %arg7[%c0_6, %c0_7], %8 {strides = array<i32>} : memref<32x32xf32, #tpu.memory_space<vmem>>, vector<32x32xf32>,
    %c0_i32_8 = arith.constant 0 : i32
    %10 = arith.cmpi eq, %arg2, %c0_i32_8 : i32
    %11 = arith.extui %10 : i1 to i32
    %c0_i32_9 = arith.constant 0 : i32
    %12 = arith.cmpi ne, %11, %c0_i32_9 : i32
    scf.if %12 {
      %c0_10 = arith.constant 0 : index
      %c0_11 = arith.constant 0 : index
      %13 = vector.load %arg7[%c0_10, %c0_11] : memref<32x32xf32, #tpu.memory_space<vmem>>, vector<32x32xf32>
      %c0_12 = arith.constant 0 : index
      %c0_13 = arith.constant 0 : index
      %14 = vector.load %arg5[%c0_12, %c0_13] : memref<1x32xf32, #tpu.memory_space<vmem>>, vector<1x32xf32>
      %15 = vector.broadcast %14 : vector<1x32xf32> to vector<32x32xf32>
      %16 = arith.addf %13, %15 : vector<32x32xf32>
      %17 = arith.truncf %16 : vector<32x32xf32> to vector<32x32xbf16>
      %c0_14 = arith.constant 0 : index
      %c0_15 = arith.constant 0 : index
      %18 = vector.load %arg6[%c0_14, %c0_15] : memref<32x32xbf16, #tpu.memory_space<vmem>>, vector<32x32xbf16>
      tpu.vector_store %arg6[%c0_14, %c0_15], %17 {strides = array<i32>} : memref<32x32xbf16, #tpu.memory_space<vmem>>, vector<32x32xbf16>,
    } else {
    }
    return
  }
  func.func @transform_0(%arg0: i32, %arg1: i32, %arg2: i32) -> (i32, i32) {
    %c0_i32 = arith.constant 0 : i32
    return %arg0, %arg2 : i32, i32
  }
  func.func @transform_1(%arg0: i32, %arg1: i32, %arg2: i32) -> (i32, i32) {
    %c0_i32 = arith.constant 0 : i32
    return %arg2, %arg1 : i32, i32
  }
  func.func @transform_2(%arg0: i32, %arg1: i32, %arg2: i32) -> (i32, i32) {
    %c0_i32 = arith.constant 0 : i32
    %c0_i32_0 = arith.constant 0 : i32
    return %c0_i32, %arg1 : i32, i32
  }
  func.func @transform_3(%arg0: i32, %arg1: i32, %arg2: i32) -> (i32, i32) {
    %c0_i32 = arith.constant 0 : i32
    return %arg0, %arg1 : i32, i32
  }
}

module attributes {stable_mosaic.version = 11 : i64} {
  func.func @_flash_attention_kernel(%arg0: i32, %arg1: i32, %arg2: i32, %arg3: memref<8x32xbf16, #tpu.memory_space<vmem>>, %arg4: memref<16x32xbf16, #tpu.memory_space<vmem>>, %arg5: memref<16x32xbf16, #tpu.memory_space<vmem>>, %arg6: memref<8x32xbf16, #tpu.memory_space<vmem>>, %arg7: memref<4x8x1xf32, #tpu.memory_space<vmem>>, %arg8: memref<4x8x1xf32, #tpu.memory_space<vmem>>, %arg9: memref<4x8x8xf32, #tpu.memory_space<vmem>>) attributes {dimension_semantics = [#tpu.dimension_semantics<parallel>, #tpu.dimension_semantics<parallel>, #tpu.dimension_semantics<arbitrary>], iteration_bounds = array<i64: 2, 1, 1>, scalar_prefetch = 0 : i64, scratch_operands = 3 : i64, tpu.core_type = #tpu.core_type<tc>, window_params = [{transform_indices = @transform_0, window_bounds = array<i64: 8, 32>}, {transform_indices = @transform_1, window_bounds = array<i64: 16, 32>}, {transform_indices = @transform_2, window_bounds = array<i64: 16, 32>}, {transform_indices = @transform_3, window_bounds = array<i64: 8, 32>}]} {
    %c0_i32 = arith.constant 0 : i32
    %0 = arith.cmpi eq, %arg2, %c0_i32 : i32
    %1 = arith.extui %0 : i1 to i32
    %c0_i32_0 = arith.constant 0 : i32
    %2 = arith.cmpi ne, %1, %c0_i32_0 : i32
    scf.if %2 {
      %cst_111 = arith.constant -1.000000e+30 : f32
      %164 = vector.broadcast %cst_111 : f32 to vector<4x8x1xf32>
      %c0_112 = arith.constant 0 : index
      %c0_113 = arith.constant 0 : index
      %c0_114 = arith.constant 0 : index
      %165 = vector.load %arg7[%c0_112, %c0_113, %c0_114] : memref<4x8x1xf32, #tpu.memory_space<vmem>>, vector<4x8x1xf32>
      tpu.vector_store %arg7[%c0_112, %c0_113, %c0_114], %164 {strides = array<i32>} : memref<4x8x1xf32, #tpu.memory_space<vmem>>, vector<4x8x1xf32>,
      %cst_115 = arith.constant 0.000000e+00 : f32
      %166 = vector.broadcast %cst_115 : f32 to vector<4x8x1xf32>
      %c0_116 = arith.constant 0 : index
      %c0_117 = arith.constant 0 : index
      %c0_118 = arith.constant 0 : index
      %167 = vector.load %arg8[%c0_116, %c0_117, %c0_118] : memref<4x8x1xf32, #tpu.memory_space<vmem>>, vector<4x8x1xf32>
      tpu.vector_store %arg8[%c0_116, %c0_117, %c0_118], %166 {strides = array<i32>} : memref<4x8x1xf32, #tpu.memory_space<vmem>>, vector<4x8x1xf32>,
      %cst_119 = arith.constant 0.000000e+00 : f32
      %168 = vector.broadcast %cst_119 : f32 to vector<4x8x8xf32>
      %c0_120 = arith.constant 0 : index
      %c0_121 = arith.constant 0 : index
      %c0_122 = arith.constant 0 : index
      %169 = vector.load %arg9[%c0_120, %c0_121, %c0_122] : memref<4x8x8xf32, #tpu.memory_space<vmem>>, vector<4x8x8xf32>
      tpu.vector_store %arg9[%c0_120, %c0_121, %c0_122], %168 {strides = array<i32>} : memref<4x8x8xf32, #tpu.memory_space<vmem>>, vector<4x8x8xf32>,
    } else {
    }
    %3 = tpu.iota {dimensions = array<i32: 1>} : vector<8x16xi32>
    %c16_i32 = arith.constant 16 : i32
    %4 = arith.muli %arg2, %c16_i32 : i32
    %5 = vector.broadcast %4 : i32 to vector<8x16xi32>
    %6 = arith.addi %3, %5 : vector<8x16xi32>
    %c12_i32 = arith.constant 12 : i32
    %7 = vector.broadcast %c12_i32 : i32 to vector<8x16xi32>
    %8 = arith.cmpi slt, %6, %7 : vector<8x16xi32>
    %c0 = arith.constant 0 : index
    %c0_1 = arith.constant 0 : index
    %9 = vector.load %arg3[%c0, %c0_1] : memref<8x32xbf16, #tpu.memory_space<vmem>>, vector<8x8xbf16>
    %c0_2 = arith.constant 0 : index
    %c0_3 = arith.constant 0 : index
    %10 = vector.load %arg4[%c0_2, %c0_3] : memref<16x32xbf16, #tpu.memory_space<vmem>>, vector<16x8xbf16>
    %c0_4 = arith.constant 0 : index
    %c0_5 = arith.constant 0 : index
    %11 = vector.load %arg5[%c0_4, %c0_5] : memref<16x32xbf16, #tpu.memory_space<vmem>>, vector<16x8xbf16>
    %cst = arith.constant dense<0.000000e+00> : vector<8x16xf32>
    %12 = tpu.matmul %9, %10, %cst {dimension_numbers = #tpu.dot_dimension_numbers<[1], [1], [0], [0], [0, 0, 1, 0], [], []>} : vector<8x8xbf16>, vector<16x8xbf16>, vector<8x16xf32> -> vector<8x16xf32>
    %cst_6 = arith.constant -1.000000e+30 : f32
    %13 = vector.broadcast %cst_6 : f32 to vector<8x16xf32>
    %14 = arith.select %8, %12, %13 : vector<8x16xi1>, vector<8x16xf32>
    %c0_7 = arith.constant 0 : index
    %c0_8 = arith.constant 0 : index
    %c0_9 = arith.constant 0 : index
    %15 = vector.load %arg7[%c0_7, %c0_8, %c0_9] : memref<4x8x1xf32, #tpu.memory_space<vmem>>, vector<1x8x1xf32>
    %16 = vector.shape_cast %15 : vector<1x8x1xf32> to vector<8x1xf32>
    %cst_10 = arith.constant dense<0xFF800000> : vector<8xf32>
    %17 = vector.multi_reduction <maximumf>, %14, %cst_10 [1] : vector<8x16xf32> to vector<8xf32>
    %18 = vector.shape_cast %17 : vector<8xf32> to vector<8x1xf32>
    %19 = arith.maximumf %16, %18 : vector<8x1xf32>
    %20 = arith.subf %16, %19 : vector<8x1xf32>
    %21 = math.exp %20 : vector<8x1xf32>
    %22 = vector.broadcast %19 : vector<8x1xf32> to vector<8x16xf32>
    %23 = arith.subf %14, %22 : vector<8x16xf32>
    %24 = math.exp %23 : vector<8x16xf32>
    %c0_11 = arith.constant 0 : index
    %c0_12 = arith.constant 0 : index
    %c0_13 = arith.constant 0 : index
    %25 = vector.load %arg8[%c0_11, %c0_12, %c0_13] : memref<4x8x1xf32, #tpu.memory_space<vmem>>, vector<1x8x1xf32>
    %26 = vector.shape_cast %25 : vector<1x8x1xf32> to vector<8x1xf32>
    %27 = arith.mulf %21, %26 : vector<8x1xf32>
    %cst_14 = arith.constant dense<0.000000e+00> : vector<8xf32>
    %28 = vector.multi_reduction <add>, %24, %cst_14 [1] : vector<8x16xf32> to vector<8xf32>
    %29 = vector.shape_cast %28 : vector<8xf32> to vector<8x1xf32>
    %30 = arith.addf %27, %29 : vector<8x1xf32>
    %c0_15 = arith.constant 0 : index
    %c0_16 = arith.constant 0 : index
    %c0_17 = arith.constant 0 : index
    %31 = vector.load %arg8[%c0_15, %c0_16, %c0_17] : memref<4x8x1xf32, #tpu.memory_space<vmem>>, vector<1x8x1xf32>
    %32 = vector.shape_cast %31 : vector<1x8x1xf32> to vector<8x1xf32>
    %33 = vector.shape_cast %30 : vector<8x1xf32> to vector<1x8x1xf32>
    tpu.vector_store %arg8[%c0_15, %c0_16, %c0_17], %33 {strides = array<i32>} : memref<4x8x1xf32, #tpu.memory_space<vmem>>, vector<1x8x1xf32>,
    %c0_18 = arith.constant 0 : index
    %c0_19 = arith.constant 0 : index
    %c0_20 = arith.constant 0 : index
    %34 = vector.load %arg9[%c0_18, %c0_19, %c0_20] : memref<4x8x8xf32, #tpu.memory_space<vmem>>, vector<1x8x8xf32>
    %35 = vector.shape_cast %34 : vector<1x8x8xf32> to vector<8x8xf32>
    %36 = vector.broadcast %21 : vector<8x1xf32> to vector<8x8xf32>
    %37 = arith.mulf %36, %35 : vector<8x8xf32>
    %38 = arith.truncf %24 : vector<8x16xf32> to vector<8x16xbf16>
    %cst_21 = arith.constant dense<0.000000e+00> : vector<8x8xf32>
    %39 = tpu.matmul %38, %11, %cst_21 {dimension_numbers = #tpu.dot_dimension_numbers<[1], [0], [0], [1], [0, 0, 1, 1], [], []>} : vector<8x16xbf16>, vector<16x8xbf16>, vector<8x8xf32> -> vector<8x8xf32>
    %40 = arith.addf %37, %39 : vector<8x8xf32>
    %c0_22 = arith.constant 0 : index
    %c0_23 = arith.constant 0 : index
    %c0_24 = arith.constant 0 : index
    %41 = vector.load %arg9[%c0_22, %c0_23, %c0_24] : memref<4x8x8xf32, #tpu.memory_space<vmem>>, vector<1x8x8xf32>
    %42 = vector.shape_cast %41 : vector<1x8x8xf32> to vector<8x8xf32>
    %43 = vector.shape_cast %40 : vector<8x8xf32> to vector<1x8x8xf32>
    tpu.vector_store %arg9[%c0_22, %c0_23, %c0_24], %43 {strides = array<i32>} : memref<4x8x8xf32, #tpu.memory_space<vmem>>, vector<1x8x8xf32>,
    %c0_25 = arith.constant 0 : index
    %c0_26 = arith.constant 0 : index
    %c0_27 = arith.constant 0 : index
    %44 = vector.load %arg7[%c0_25, %c0_26, %c0_27] : memref<4x8x1xf32, #tpu.memory_space<vmem>>, vector<1x8x1xf32>
    %45 = vector.shape_cast %44 : vector<1x8x1xf32> to vector<8x1xf32>
    %46 = vector.shape_cast %19 : vector<8x1xf32> to vector<1x8x1xf32>
    tpu.vector_store %arg7[%c0_25, %c0_26, %c0_27], %46 {strides = array<i32>} : memref<4x8x1xf32, #tpu.memory_space<vmem>>, vector<1x8x1xf32>,
    %c0_28 = arith.constant 0 : index
    %c8 = arith.constant 8 : index
    %47 = vector.load %arg3[%c0_28, %c8] : memref<8x32xbf16, #tpu.memory_space<vmem>>, vector<8x8xbf16>
    %c0_29 = arith.constant 0 : index
    %c8_30 = arith.constant 8 : index
    %48 = vector.load %arg4[%c0_29, %c8_30] : memref<16x32xbf16, #tpu.memory_space<vmem>>, vector<16x8xbf16>
    %c0_31 = arith.constant 0 : index
    %c8_32 = arith.constant 8 : index
    %49 = vector.load %arg5[%c0_31, %c8_32] : memref<16x32xbf16, #tpu.memory_space<vmem>>, vector<16x8xbf16>
    %cst_33 = arith.constant dense<0.000000e+00> : vector<8x16xf32>
    %50 = tpu.matmul %47, %48, %cst_33 {dimension_numbers = #tpu.dot_dimension_numbers<[1], [1], [0], [0], [0, 0, 1, 0], [], []>} : vector<8x8xbf16>, vector<16x8xbf16>, vector<8x16xf32> -> vector<8x16xf32>
    %cst_34 = arith.constant -1.000000e+30 : f32
    %51 = vector.broadcast %cst_34 : f32 to vector<8x16xf32>
    %52 = arith.select %8, %50, %51 : vector<8x16xi1>, vector<8x16xf32>
    %c1 = arith.constant 1 : index
    %c0_35 = arith.constant 0 : index
    %c0_36 = arith.constant 0 : index
    %53 = vector.load %arg7[%c1, %c0_35, %c0_36] : memref<4x8x1xf32, #tpu.memory_space<vmem>>, vector<1x8x1xf32>
    %54 = vector.shape_cast %53 : vector<1x8x1xf32> to vector<8x1xf32>
    %cst_37 = arith.constant dense<0xFF800000> : vector<8xf32>
    %55 = vector.multi_reduction <maximumf>, %52, %cst_37 [1] : vector<8x16xf32> to vector<8xf32>
    %56 = vector.shape_cast %55 : vector<8xf32> to vector<8x1xf32>
    %57 = arith.maximumf %54, %56 : vector<8x1xf32>
    %58 = arith.subf %54, %57 : vector<8x1xf32>
    %59 = math.exp %58 : vector<8x1xf32>
    %60 = vector.broadcast %57 : vector<8x1xf32> to vector<8x16xf32>
    %61 = arith.subf %52, %60 : vector<8x16xf32>
    %62 = math.exp %61 : vector<8x16xf32>
    %c1_38 = arith.constant 1 : index
    %c0_39 = arith.constant 0 : index
    %c0_40 = arith.constant 0 : index
    %63 = vector.load %arg8[%c1_38, %c0_39, %c0_40] : memref<4x8x1xf32, #tpu.memory_space<vmem>>, vector<1x8x1xf32>
    %64 = vector.shape_cast %63 : vector<1x8x1xf32> to vector<8x1xf32>
    %65 = arith.mulf %59, %64 : vector<8x1xf32>
    %cst_41 = arith.constant dense<0.000000e+00> : vector<8xf32>
    %66 = vector.multi_reduction <add>, %62, %cst_41 [1] : vector<8x16xf32> to vector<8xf32>
    %67 = vector.shape_cast %66 : vector<8xf32> to vector<8x1xf32>
    %68 = arith.addf %65, %67 : vector<8x1xf32>
    %c1_42 = arith.constant 1 : index
    %c0_43 = arith.constant 0 : index
    %c0_44 = arith.constant 0 : index
    %69 = vector.load %arg8[%c1_42, %c0_43, %c0_44] : memref<4x8x1xf32, #tpu.memory_space<vmem>>, vector<1x8x1xf32>
    %70 = vector.shape_cast %69 : vector<1x8x1xf32> to vector<8x1xf32>
    %71 = vector.shape_cast %68 : vector<8x1xf32> to vector<1x8x1xf32>
    tpu.vector_store %arg8[%c1_42, %c0_43, %c0_44], %71 {strides = array<i32>} : memref<4x8x1xf32, #tpu.memory_space<vmem>>, vector<1x8x1xf32>,
    %c1_45 = arith.constant 1 : index
    %c0_46 = arith.constant 0 : index
    %c0_47 = arith.constant 0 : index
    %72 = vector.load %arg9[%c1_45, %c0_46, %c0_47] : memref<4x8x8xf32, #tpu.memory_space<vmem>>, vector<1x8x8xf32>
    %73 = vector.shape_cast %72 : vector<1x8x8xf32> to vector<8x8xf32>
    %74 = vector.broadcast %59 : vector<8x1xf32> to vector<8x8xf32>
    %75 = arith.mulf %74, %73 : vector<8x8xf32>
    %76 = arith.truncf %62 : vector<8x16xf32> to vector<8x16xbf16>
    %cst_48 = arith.constant dense<0.000000e+00> : vector<8x8xf32>
    %77 = tpu.matmul %76, %49, %cst_48 {dimension_numbers = #tpu.dot_dimension_numbers<[1], [0], [0], [1], [0, 0, 1, 1], [], []>} : vector<8x16xbf16>, vector<16x8xbf16>, vector<8x8xf32> -> vector<8x8xf32>
    %78 = arith.addf %75, %77 : vector<8x8xf32>
    %c1_49 = arith.constant 1 : index
    %c0_50 = arith.constant 0 : index
    %c0_51 = arith.constant 0 : index
    %79 = vector.load %arg9[%c1_49, %c0_50, %c0_51] : memref<4x8x8xf32, #tpu.memory_space<vmem>>, vector<1x8x8xf32>
    %80 = vector.shape_cast %79 : vector<1x8x8xf32> to vector<8x8xf32>
    %81 = vector.shape_cast %78 : vector<8x8xf32> to vector<1x8x8xf32>
    tpu.vector_store %arg9[%c1_49, %c0_50, %c0_51], %81 {strides = array<i32>} : memref<4x8x8xf32, #tpu.memory_space<vmem>>, vector<1x8x8xf32>,
    %c1_52 = arith.constant 1 : index
    %c0_53 = arith.constant 0 : index
    %c0_54 = arith.constant 0 : index
    %82 = vector.load %arg7[%c1_52, %c0_53, %c0_54] : memref<4x8x1xf32, #tpu.memory_space<vmem>>, vector<1x8x1xf32>
    %83 = vector.shape_cast %82 : vector<1x8x1xf32> to vector<8x1xf32>
    %84 = vector.shape_cast %57 : vector<8x1xf32> to vector<1x8x1xf32>
    tpu.vector_store %arg7[%c1_52, %c0_53, %c0_54], %84 {strides = array<i32>} : memref<4x8x1xf32, #tpu.memory_space<vmem>>, vector<1x8x1xf32>,
    %c0_55 = arith.constant 0 : index
    %c16 = arith.constant 16 : index
    %85 = vector.load %arg3[%c0_55, %c16] : memref<8x32xbf16, #tpu.memory_space<vmem>>, vector<8x8xbf16>
    %c0_56 = arith.constant 0 : index
    %c16_57 = arith.constant 16 : index
    %86 = vector.load %arg4[%c0_56, %c16_57] : memref<16x32xbf16, #tpu.memory_space<vmem>>, vector<16x8xbf16>
    %c0_58 = arith.constant 0 : index
    %c16_59 = arith.constant 16 : index
    %87 = vector.load %arg5[%c0_58, %c16_59] : memref<16x32xbf16, #tpu.memory_space<vmem>>, vector<16x8xbf16>
    %cst_60 = arith.constant dense<0.000000e+00> : vector<8x16xf32>
    %88 = tpu.matmul %85, %86, %cst_60 {dimension_numbers = #tpu.dot_dimension_numbers<[1], [1], [0], [0], [0, 0, 1, 0], [], []>} : vector<8x8xbf16>, vector<16x8xbf16>, vector<8x16xf32> -> vector<8x16xf32>
    %cst_61 = arith.constant -1.000000e+30 : f32
    %89 = vector.broadcast %cst_61 : f32 to vector<8x16xf32>
    %90 = arith.select %8, %88, %89 : vector<8x16xi1>, vector<8x16xf32>
    %c2 = arith.constant 2 : index
    %c0_62 = arith.constant 0 : index
    %c0_63 = arith.constant 0 : index
    %91 = vector.load %arg7[%c2, %c0_62, %c0_63] : memref<4x8x1xf32, #tpu.memory_space<vmem>>, vector<1x8x1xf32>
    %92 = vector.shape_cast %91 : vector<1x8x1xf32> to vector<8x1xf32>
    %cst_64 = arith.constant dense<0xFF800000> : vector<8xf32>
    %93 = vector.multi_reduction <maximumf>, %90, %cst_64 [1] : vector<8x16xf32> to vector<8xf32>
    %94 = vector.shape_cast %93 : vector<8xf32> to vector<8x1xf32>
    %95 = arith.maximumf %92, %94 : vector<8x1xf32>
    %96 = arith.subf %92, %95 : vector<8x1xf32>
    %97 = math.exp %96 : vector<8x1xf32>
    %98 = vector.broadcast %95 : vector<8x1xf32> to vector<8x16xf32>
    %99 = arith.subf %90, %98 : vector<8x16xf32>
    %100 = math.exp %99 : vector<8x16xf32>
    %c2_65 = arith.constant 2 : index
    %c0_66 = arith.constant 0 : index
    %c0_67 = arith.constant 0 : index
    %101 = vector.load %arg8[%c2_65, %c0_66, %c0_67] : memref<4x8x1xf32, #tpu.memory_space<vmem>>, vector<1x8x1xf32>
    %102 = vector.shape_cast %101 : vector<1x8x1xf32> to vector<8x1xf32>
    %103 = arith.mulf %97, %102 : vector<8x1xf32>
    %cst_68 = arith.constant dense<0.000000e+00> : vector<8xf32>
    %104 = vector.multi_reduction <add>, %100, %cst_68 [1] : vector<8x16xf32> to vector<8xf32>
    %105 = vector.shape_cast %104 : vector<8xf32> to vector<8x1xf32>
    %106 = arith.addf %103, %105 : vector<8x1xf32>
    %c2_69 = arith.constant 2 : index
    %c0_70 = arith.constant 0 : index
    %c0_71 = arith.constant 0 : index
    %107 = vector.load %arg8[%c2_69, %c0_70, %c0_71] : memref<4x8x1xf32, #tpu.memory_space<vmem>>, vector<1x8x1xf32>
    %108 = vector.shape_cast %107 : vector<1x8x1xf32> to vector<8x1xf32>
    %109 = vector.shape_cast %106 : vector<8x1xf32> to vector<1x8x1xf32>
    tpu.vector_store %arg8[%c2_69, %c0_70, %c0_71], %109 {strides = array<i32>} : memref<4x8x1xf32, #tpu.memory_space<vmem>>, vector<1x8x1xf32>,
    %c2_72 = arith.constant 2 : index
    %c0_73 = arith.constant 0 : index
    %c0_74 = arith.constant 0 : index
    %110 = vector.load %arg9[%c2_72, %c0_73, %c0_74] : memref<4x8x8xf32, #tpu.memory_space<vmem>>, vector<1x8x8xf32>
    %111 = vector.shape_cast %110 : vector<1x8x8xf32> to vector<8x8xf32>
    %112 = vector.broadcast %97 : vector<8x1xf32> to vector<8x8xf32>
    %113 = arith.mulf %112, %111 : vector<8x8xf32>
    %114 = arith.truncf %100 : vector<8x16xf32> to vector<8x16xbf16>
    %cst_75 = arith.constant dense<0.000000e+00> : vector<8x8xf32>
    %115 = tpu.matmul %114, %87, %cst_75 {dimension_numbers = #tpu.dot_dimension_numbers<[1], [0], [0], [1], [0, 0, 1, 1], [], []>} : vector<8x16xbf16>, vector<16x8xbf16>, vector<8x8xf32> -> vector<8x8xf32>
    %116 = arith.addf %113, %115 : vector<8x8xf32>
    %c2_76 = arith.constant 2 : index
    %c0_77 = arith.constant 0 : index
    %c0_78 = arith.constant 0 : index
    %117 = vector.load %arg9[%c2_76, %c0_77, %c0_78] : memref<4x8x8xf32, #tpu.memory_space<vmem>>, vector<1x8x8xf32>
    %118 = vector.shape_cast %117 : vector<1x8x8xf32> to vector<8x8xf32>
    %119 = vector.shape_cast %116 : vector<8x8xf32> to vector<1x8x8xf32>
    tpu.vector_store %arg9[%c2_76, %c0_77, %c0_78], %119 {strides = array<i32>} : memref<4x8x8xf32, #tpu.memory_space<vmem>>, vector<1x8x8xf32>,
    %c2_79 = arith.constant 2 : index
    %c0_80 = arith.constant 0 : index
    %c0_81 = arith.constant 0 : index
    %120 = vector.load %arg7[%c2_79, %c0_80, %c0_81] : memref<4x8x1xf32, #tpu.memory_space<vmem>>, vector<1x8x1xf32>
    %121 = vector.shape_cast %120 : vector<1x8x1xf32> to vector<8x1xf32>
    %122 = vector.shape_cast %95 : vector<8x1xf32> to vector<1x8x1xf32>
    tpu.vector_store %arg7[%c2_79, %c0_80, %c0_81], %122 {strides = array<i32>} : memref<4x8x1xf32, #tpu.memory_space<vmem>>, vector<1x8x1xf32>,
    %c0_82 = arith.constant 0 : index
    %c24 = arith.constant 24 : index
    %123 = vector.load %arg3[%c0_82, %c24] : memref<8x32xbf16, #tpu.memory_space<vmem>>, vector<8x8xbf16>
    %c0_83 = arith.constant 0 : index
    %c24_84 = arith.constant 24 : index
    %124 = vector.load %arg4[%c0_83, %c24_84] : memref<16x32xbf16, #tpu.memory_space<vmem>>, vector<16x8xbf16>
    %c0_85 = arith.constant 0 : index
    %c24_86 = arith.constant 24 : index
    %125 = vector.load %arg5[%c0_85, %c24_86] : memref<16x32xbf16, #tpu.memory_space<vmem>>, vector<16x8xbf16>
    %cst_87 = arith.constant dense<0.000000e+00> : vector<8x16xf32>
    %126 = tpu.matmul %123, %124, %cst_87 {dimension_numbers = #tpu.dot_dimension_numbers<[1], [1], [0], [0], [0, 0, 1, 0], [], []>} : vector<8x8xbf16>, vector<16x8xbf16>, vector<8x16xf32> -> vector<8x16xf32>
    %cst_88 = arith.constant -1.000000e+30 : f32
    %127 = vector.broadcast %cst_88 : f32 to vector<8x16xf32>
    %128 = arith.select %8, %126, %127 : vector<8x16xi1>, vector<8x16xf32>
    %c3 = arith.constant 3 : index
    %c0_89 = arith.constant 0 : index
    %c0_90 = arith.constant 0 : index
    %129 = vector.load %arg7[%c3, %c0_89, %c0_90] : memref<4x8x1xf32, #tpu.memory_space<vmem>>, vector<1x8x1xf32>
    %130 = vector.shape_cast %129 : vector<1x8x1xf32> to vector<8x1xf32>
    %cst_91 = arith.constant dense<0xFF800000> : vector<8xf32>
    %131 = vector.multi_reduction <maximumf>, %128, %cst_91 [1] : vector<8x16xf32> to vector<8xf32>
    %132 = vector.shape_cast %131 : vector<8xf32> to vector<8x1xf32>
    %133 = arith.maximumf %130, %132 : vector<8x1xf32>
    %134 = arith.subf %130, %133 : vector<8x1xf32>
    %135 = math.exp %134 : vector<8x1xf32>
    %136 = vector.broadcast %133 : vector<8x1xf32> to vector<8x16xf32>
    %137 = arith.subf %128, %136 : vector<8x16xf32>
    %138 = math.exp %137 : vector<8x16xf32>
    %c3_92 = arith.constant 3 : index
    %c0_93 = arith.constant 0 : index
    %c0_94 = arith.constant 0 : index
    %139 = vector.load %arg8[%c3_92, %c0_93, %c0_94] : memref<4x8x1xf32, #tpu.memory_space<vmem>>, vector<1x8x1xf32>
    %140 = vector.shape_cast %139 : vector<1x8x1xf32> to vector<8x1xf32>
    %141 = arith.mulf %135, %140 : vector<8x1xf32>
    %cst_95 = arith.constant dense<0.000000e+00> : vector<8xf32>
    %142 = vector.multi_reduction <add>, %138, %cst_95 [1] : vector<8x16xf32> to vector<8xf32>
    %143 = vector.shape_cast %142 : vector<8xf32> to vector<8x1xf32>
    %144 = arith.addf %141, %143 : vector<8x1xf32>
    %c3_96 = arith.constant 3 : index
    %c0_97 = arith.constant 0 : index
    %c0_98 = arith.constant 0 : index
    %145 = vector.load %arg8[%c3_96, %c0_97, %c0_98] : memref<4x8x1xf32, #tpu.memory_space<vmem>>, vector<1x8x1xf32>
    %146 = vector.shape_cast %145 : vector<1x8x1xf32> to vector<8x1xf32>
    %147 = vector.shape_cast %144 : vector<8x1xf32> to vector<1x8x1xf32>
    tpu.vector_store %arg8[%c3_96, %c0_97, %c0_98], %147 {strides = array<i32>} : memref<4x8x1xf32, #tpu.memory_space<vmem>>, vector<1x8x1xf32>,
    %c3_99 = arith.constant 3 : index
    %c0_100 = arith.constant 0 : index
    %c0_101 = arith.constant 0 : index
    %148 = vector.load %arg9[%c3_99, %c0_100, %c0_101] : memref<4x8x8xf32, #tpu.memory_space<vmem>>, vector<1x8x8xf32>
    %149 = vector.shape_cast %148 : vector<1x8x8xf32> to vector<8x8xf32>
    %150 = vector.broadcast %135 : vector<8x1xf32> to vector<8x8xf32>
    %151 = arith.mulf %150, %149 : vector<8x8xf32>
    %152 = arith.truncf %138 : vector<8x16xf32> to vector<8x16xbf16>
    %cst_102 = arith.constant dense<0.000000e+00> : vector<8x8xf32>
    %153 = tpu.matmul %152, %125, %cst_102 {dimension_numbers = #tpu.dot_dimension_numbers<[1], [0], [0], [1], [0, 0, 1, 1], [], []>} : vector<8x16xbf16>, vector<16x8xbf16>, vector<8x8xf32> -> vector<8x8xf32>
    %154 = arith.addf %151, %153 : vector<8x8xf32>
    %c3_103 = arith.constant 3 : index
    %c0_104 = arith.constant 0 : index
    %c0_105 = arith.constant 0 : index
    %155 = vector.load %arg9[%c3_103, %c0_104, %c0_105] : memref<4x8x8xf32, #tpu.memory_space<vmem>>, vector<1x8x8xf32>
    %156 = vector.shape_cast %155 : vector<1x8x8xf32> to vector<8x8xf32>
    %157 = vector.shape_cast %154 : vector<8x8xf32> to vector<1x8x8xf32>
    tpu.vector_store %arg9[%c3_103, %c0_104, %c0_105], %157 {strides = array<i32>} : memref<4x8x8xf32, #tpu.memory_space<vmem>>, vector<1x8x8xf32>,
    %c3_106 = arith.constant 3 : index
    %c0_107 = arith.constant 0 : index
    %c0_108 = arith.constant 0 : index
    %158 = vector.load %arg7[%c3_106, %c0_107, %c0_108] : memref<4x8x1xf32, #tpu.memory_space<vmem>>, vector<1x8x1xf32>
    %159 = vector.shape_cast %158 : vector<1x8x1xf32> to vector<8x1xf32>
    %160 = vector.shape_cast %133 : vector<8x1xf32> to vector<1x8x1xf32>
    tpu.vector_store %arg7[%c3_106, %c0_107, %c0_108], %160 {strides = array<i32>} : memref<4x8x1xf32, #tpu.memory_space<vmem>>, vector<1x8x1xf32>,
    %c0_i32_109 = arith.constant 0 : i32
    %161 = arith.cmpi eq, %arg2, %c0_i32_109 : i32
    %162 = arith.extui %161 : i1 to i32
    %c0_i32_110 = arith.constant 0 : i32
    %163 = arith.cmpi ne, %162, %c0_i32_110 : i32
    scf.if %163 {
      %c0_111 = arith.constant 0 : index
      %c0_112 = arith.constant 0 : index
      %c0_113 = arith.constant 0 : index
      %164 = vector.load %arg8[%c0_111, %c0_112, %c0_113] : memref<4x8x1xf32, #tpu.memory_space<vmem>>, vector<1x8x1xf32>
      %165 = vector.shape_cast %164 : vector<1x8x1xf32> to vector<8x1xf32>
      %166 = tpu.reciprocal %165 {approx = true} : vector<8x1xf32> -> vector<8x1xf32>
      %c0_114 = arith.constant 0 : index
      %c0_115 = arith.constant 0 : index
      %c0_116 = arith.constant 0 : index
      %167 = vector.load %arg9[%c0_114, %c0_115, %c0_116] : memref<4x8x8xf32, #tpu.memory_space<vmem>>, vector<1x8x8xf32>
      %168 = vector.shape_cast %167 : vector<1x8x8xf32> to vector<8x8xf32>
      %169 = vector.broadcast %166 : vector<8x1xf32> to vector<8x8xf32>
      %170 = arith.mulf %168, %169 : vector<8x8xf32>
      %171 = arith.truncf %170 : vector<8x8xf32> to vector<8x8xbf16>
      %c0_117 = arith.constant 0 : index
      %c0_118 = arith.constant 0 : index
      %172 = vector.load %arg6[%c0_117, %c0_118] : memref<8x32xbf16, #tpu.memory_space<vmem>>, vector<8x8xbf16>
      tpu.vector_store %arg6[%c0_117, %c0_118], %171 {strides = array<i32>} : memref<8x32xbf16, #tpu.memory_space<vmem>>, vector<8x8xbf16>,
      %c1_119 = arith.constant 1 : index
      %c0_120 = arith.constant 0 : index
      %c0_121 = arith.constant 0 : index
      %173 = vector.load %arg8[%c1_119, %c0_120, %c0_121] : memref<4x8x1xf32, #tpu.memory_space<vmem>>, vector<1x8x1xf32>
      %174 = vector.shape_cast %173 : vector<1x8x1xf32> to vector<8x1xf32>
      %175 = tpu.reciprocal %174 {approx = true} : vector<8x1xf32> -> vector<8x1xf32>
      %c1_122 = arith.constant 1 : index
      %c0_123 = arith.constant 0 : index
      %c0_124 = arith.constant 0 : index
      %176 = vector.load %arg9[%c1_122, %c0_123, %c0_124] : memref<4x8x8xf32, #tpu.memory_space<vmem>>, vector<1x8x8xf32>
      %177 = vector.shape_cast %176 : vector<1x8x8xf32> to vector<8x8xf32>
      %178 = vector.broadcast %175 : vector<8x1xf32> to vector<8x8xf32>
      %179 = arith.mulf %177, %178 : vector<8x8xf32>
      %180 = arith.truncf %179 : vector<8x8xf32> to vector<8x8xbf16>
      %c0_125 = arith.constant 0 : index
      %c8_126 = arith.constant 8 : index
      %181 = vector.load %arg6[%c0_125, %c8_126] : memref<8x32xbf16, #tpu.memory_space<vmem>>, vector<8x8xbf16>
      tpu.vector_store %arg6[%c0_125, %c8_126], %180 {strides = array<i32>} : memref<8x32xbf16, #tpu.memory_space<vmem>>, vector<8x8xbf16>,
      %c2_127 = arith.constant 2 : index
      %c0_128 = arith.constant 0 : index
      %c0_129 = arith.constant 0 : index
      %182 = vector.load %arg8[%c2_127, %c0_128, %c0_129] : memref<4x8x1xf32, #tpu.memory_space<vmem>>, vector<1x8x1xf32>
      %183 = vector.shape_cast %182 : vector<1x8x1xf32> to vector<8x1xf32>
      %184 = tpu.reciprocal %183 {approx = true} : vector<8x1xf32> -> vector<8x1xf32>
      %c2_130 = arith.constant 2 : index
      %c0_131 = arith.constant 0 : index
      %c0_132 = arith.constant 0 : index
      %185 = vector.load %arg9[%c2_130, %c0_131, %c0_132] : memref<4x8x8xf32, #tpu.memory_space<vmem>>, vector<1x8x8xf32>
      %186 = vector.shape_cast %185 : vector<1x8x8xf32> to vector<8x8xf32>
      %187 = vector.broadcast %184 : vector<8x1xf32> to vector<8x8xf32>
      %188 = arith.mulf %186, %187 : vector<8x8xf32>
      %189 = arith.truncf %188 : vector<8x8xf32> to vector<8x8xbf16>
      %c0_133 = arith.constant 0 : index
      %c16_134 = arith.constant 16 : index
      %190 = vector.load %arg6[%c0_133, %c16_134] : memref<8x32xbf16, #tpu.memory_space<vmem>>, vector<8x8xbf16>
      tpu.vector_store %arg6[%c0_133, %c16_134], %189 {strides = array<i32>} : memref<8x32xbf16, #tpu.memory_space<vmem>>, vector<8x8xbf16>,
      %c3_135 = arith.constant 3 : index
      %c0_136 = arith.constant 0 : index
      %c0_137 = arith.constant 0 : index
      %191 = vector.load %arg8[%c3_135, %c0_136, %c0_137] : memref<4x8x1xf32, #tpu.memory_space<vmem>>, vector<1x8x1xf32>
      %192 = vector.shape_cast %191 : vector<1x8x1xf32> to vector<8x1xf32>
      %193 = tpu.reciprocal %192 {approx = true} : vector<8x1xf32> -> vector<8x1xf32>
      %c3_138 = arith.constant 3 : index
      %c0_139 = arith.constant 0 : index
      %c0_140 = arith.constant 0 : index
      %194 = vector.load %arg9[%c3_138, %c0_139, %c0_140] : memref<4x8x8xf32, #tpu.memory_space<vmem>>, vector<1x8x8xf32>
      %195 = vector.shape_cast %194 : vector<1x8x8xf32> to vector<8x8xf32>
      %196 = vector.broadcast %193 : vector<8x1xf32> to vector<8x8xf32>
      %197 = arith.mulf %195, %196 : vector<8x8xf32>
      %198 = arith.truncf %197 : vector<8x8xf32> to vector<8x8xbf16>
      %c0_141 = arith.constant 0 : index
      %c24_142 = arith.constant 24 : index
      %199 = vector.load %arg6[%c0_141, %c24_142] : memref<8x32xbf16, #tpu.memory_space<vmem>>, vector<8x8xbf16>
      tpu.vector_store %arg6[%c0_141, %c24_142], %198 {strides = array<i32>} : memref<8x32xbf16, #tpu.memory_space<vmem>>, vector<8x8xbf16>,
    } else {
    }
    return
  }
  func.func @transform_0(%arg0: i32, %arg1: i32, %arg2: i32) -> (i32, i32) {
    %c0_i32 = arith.constant 0 : i32
    %0 = arith.addi %c0_i32, %arg1 : i32
    %c0_i32_0 = arith.constant 0 : i32
    return %arg0, %0 : i32, i32
  }
  func.func @transform_1(%arg0: i32, %arg1: i32, %arg2: i32) -> (i32, i32) {
    %c1_i32 = arith.constant 1 : i32
    %0 = arith.muli %arg0, %c1_i32 : i32
    %1 = arith.addi %0, %arg2 : i32
    %c0_i32 = arith.constant 0 : i32
    %2 = arith.addi %c0_i32, %arg1 : i32
    %c0_i32_0 = arith.constant 0 : i32
    return %1, %2 : i32, i32
  }
  func.func @transform_2(%arg0: i32, %arg1: i32, %arg2: i32) -> (i32, i32) {
    %c1_i32 = arith.constant 1 : i32
    %0 = arith.muli %arg0, %c1_i32 : i32
    %1 = arith.addi %0, %arg2 : i32
    %c0_i32 = arith.constant 0 : i32
    %2 = arith.addi %c0_i32, %arg1 : i32
    %c0_i32_0 = arith.constant 0 : i32
    return %1, %2 : i32, i32
  }
  func.func @transform_3(%arg0: i32, %arg1: i32, %arg2: i32) -> (i32, i32) {
    %c0_i32 = arith.constant 0 : i32
    return %arg0, %arg1 : i32, i32
  }
}

module attributes {stable_mosaic.version = 11 : i64} {
  func.func @_fused_linear_kernel(%arg0: i32, %arg1: i32, %arg2: i32, %arg3: memref<16x32xf32, #tpu.memory_space<vmem>>, %arg4: memref<32x128xbf16, #tpu.memory_space<vmem>>, %arg5: memref<1x32xf32, #tpu.memory_space<vmem>>, %arg6: memref<1x32xf32, #tpu.memory_space<vmem>>, %arg7: memref<1x128xf32, #tpu.memory_space<vmem>>, %arg8: memref<16x128xbf16, #tpu.memory_space<vmem>>, %arg9: memref<16x128xf32, #tpu.memory_space<vmem>>, %arg10: memref<16x32xbf16, #tpu.memory_space<vmem>>) attributes {dimension_semantics = [#tpu.dimension_semantics<parallel>, #tpu.dimension_semantics<arbitrary>, #tpu.dimension_semantics<arbitrary>], iteration_bounds = array<i64: 1, 1, 1>, scalar_prefetch = 0 : i64, scratch_operands = 2 : i64, tpu.core_type = #tpu.core_type<tc>, window_params = [{transform_indices = @transform_0, window_bounds = array<i64: 16, 32>}, {transform_indices = @transform_1, window_bounds = array<i64: 32, 128>}, {pipeline_mode = #tpu.pipeline_mode<synchronous>, transform_indices = @transform_2, window_bounds = array<i64: 1, 32>}, {pipeline_mode = #tpu.pipeline_mode<synchronous>, transform_indices = @transform_3, window_bounds = array<i64: 1, 32>}, {transform_indices = @transform_4, window_bounds = array<i64: 1, 128>}, {transform_indices = @transform_5, window_bounds = array<i64: 16, 128>}]} {
    %c0_i32 = arith.constant 0 : i32
    %0 = arith.cmpi eq, %arg2, %c0_i32 : i32
    %1 = arith.extui %0 : i1 to i32
    %c0_i32_0 = arith.constant 0 : i32
    %2 = arith.cmpi ne, %1, %c0_i32_0 : i32
    scf.if %2 {
      %cst_12 = arith.constant 0.000000e+00 : f32
      %15 = vector.broadcast %cst_12 : f32 to vector<16x128xf32>
      %c0_13 = arith.constant 0 : index
      %c0_14 = arith.constant 0 : index
      %16 = vector.load %arg9[%c0_13, %c0_14] : memref<16x128xf32, #tpu.memory_space<vmem>>, vector<16x128xf32>
      tpu.vector_store %arg9[%c0_13, %c0_14], %15 {strides = array<i32>} : memref<16x128xf32, #tpu.memory_space<vmem>>, vector<16x128xf32>,
    } else {
    }
    %c0_i32_1 = arith.constant 0 : i32
    %3 = arith.cmpi eq, %arg1, %c0_i32_1 : i32
    %4 = arith.extui %3 : i1 to i32
    %c0_i32_2 = arith.constant 0 : i32
    %5 = arith.cmpi ne, %4, %c0_i32_2 : i32
    scf.if %5 {
      %c0_12 = arith.constant 0 : index
      %c0_13 = arith.constant 0 : index
      %15 = vector.load %arg3[%c0_12, %c0_13] : memref<16x32xf32, #tpu.memory_space<vmem>>, vector<16x32xf32>
      %cst_14 = arith.constant dense<0.000000e+00> : vector<16xf32>
      %16 = vector.multi_reduction <add>, %15, %cst_14 [1] : vector<16x32xf32> to vector<16xf32>
      %17 = vector.shape_cast %16 : vector<16xf32> to vector<16x1xf32>
      %cst_15 = arith.constant 3.200000e+01 : f32
      %18 = vector.broadcast %cst_15 : f32 to vector<16x1xf32>
      %19 = arith.divf %17, %18 : vector<16x1xf32>
      %20 = vector.broadcast %19 : vector<16x1xf32> to vector<16x32xf32>
      %21 = arith.subf %15, %20 : vector<16x32xf32>
      %22 = arith.mulf %21, %21 : vector<16x32xf32>
      %cst_16 = arith.constant dense<0.000000e+00> : vector<16xf32>
      %23 = vector.multi_reduction <add>, %22, %cst_16 [1] : vector<16x32xf32> to vector<16xf32>
      %24 = vector.shape_cast %23 : vector<16xf32> to vector<16x1xf32>
      %cst_17 = arith.constant 3.200000e+01 : f32
      %25 = vector.broadcast %cst_17 : f32 to vector<16x1xf32>
      %26 = arith.divf %24, %25 : vector<16x1xf32>
      %27 = vector.broadcast %19 : vector<16x1xf32> to vector<16x32xf32>
      %28 = arith.subf %15, %27 : vector<16x32xf32>
      %cst_18 = arith.constant 9.99999974E-6 : f32
      %29 = vector.broadcast %cst_18 : f32 to vector<16x1xf32>
      %30 = arith.addf %26, %29 : vector<16x1xf32>
      %31 = math.rsqrt %30 : vector<16x1xf32>
      %32 = vector.broadcast %31 : vector<16x1xf32> to vector<16x32xf32>
      %33 = arith.mulf %28, %32 : vector<16x32xf32>
      %c0_19 = arith.constant 0 : index
      %c0_20 = arith.constant 0 : index
      %34 = vector.load %arg5[%c0_19, %c0_20] : memref<1x32xf32, #tpu.memory_space<vmem>>, vector<1x32xf32>
      %35 = vector.broadcast %34 : vector<1x32xf32> to vector<16x32xf32>
      %36 = arith.mulf %33, %35 : vector<16x32xf32>
      %c0_21 = arith.constant 0 : index
      %c0_22 = arith.constant 0 : index
      %37 = vector.load %arg6[%c0_21, %c0_22] : memref<1x32xf32, #tpu.memory_space<vmem>>, vector<1x32xf32>
      %38 = vector.broadcast %37 : vector<1x32xf32> to vector<16x32xf32>
      %39 = arith.addf %36, %38 : vector<16x32xf32>
      %40 = arith.truncf %39 : vector<16x32xf32> to vector<16x32xbf16>
      %c0_23 = arith.constant 0 : index
      %c0_24 = arith.constant 0 : index
      %41 = vector.load %arg10[%c0_23, %c0_24] : memref<16x32xbf16, #tpu.memory_space<vmem>>, vector<16x32xbf16>
      tpu.vector_store %arg10[%c0_23, %c0_24], %40 {strides = array<i32>} : memref<16x32xbf16, #tpu.memory_space<vmem>>, vector<16x32xbf16>,
    } else {
    }
    %c0 = arith.constant 0 : index
    %c0_3 = arith.constant 0 : index
    %6 = vector.load %arg10[%c0, %c0_3] : memref<16x32xbf16, #tpu.memory_space<vmem>>, vector<16x32xbf16>
    %c0_4 = arith.constant 0 : index
    %c0_5 = arith.constant 0 : index
    %7 = vector.load %arg9[%c0_4, %c0_5] : memref<16x128xf32, #tpu.memory_space<vmem>>, vector<16x128xf32>
    %c0_6 = arith.constant 0 : index
    %c0_7 = arith.constant 0 : index
    %8 = vector.load %arg4[%c0_6, %c0_7] : memref<32x128xbf16, #tpu.memory_space<vmem>>, vector<32x128xbf16>
    %cst = arith.constant dense<0.000000e+00> : vector<16x128xf32>
    %9 = tpu.matmul %6, %8, %cst {dimension_numbers = #tpu.dot_dimension_numbers<[1], [0], [0], [1], [0, 0, 1, 1], [], []>} : vector<16x32xbf16>, vector<32x128xbf16>, vector<16x128xf32> -> vector<16x128xf32>
    %10 = arith.addf %7, %9 : vector<16x128xf32>
    %c0_8 = arith.constant 0 : index
    %c0_9 = arith.constant 0 : index
    %11 = vector.load %arg9[%c0_8, %c0_9] : memref<16x128xf32, #tpu.memory_space<vmem>>, vector<16x128xf32>
    tpu.vector_store %arg9[%c0_8, %c0_9], %10 {strides = array<i32>} : memref<16x128xf32, #tpu.memory_space<vmem>>, vector<16x128xf32>,
    %c0_i32_10 = arith.constant 0 : i32
    %12 = arith.cmpi eq, %arg2, %c0_i32_10 : i32
    %13 = arith.extui %12 : i1 to i32
    %c0_i32_11 = arith.constant 0 : i32
    %14 = arith.cmpi ne, %13, %c0_i32_11 : i32
    scf.if %14 {
      %c0_12 = arith.constant 0 : index
      %c0_13 = arith.constant 0 : index
      %15 = vector.load %arg9[%c0_12, %c0_13] : memref<16x128xf32, #tpu.memory_space<vmem>>, vector<16x128xf32>
      %c0_14 = arith.constant 0 : index
      %c0_15 = arith.constant 0 : index
      %16 = vector.load %arg7[%c0_14, %c0_15] : memref<1x128xf32, #tpu.memory_space<vmem>>, vector<1x128xf32>
      %17 = vector.broadcast %16 : vector<1x128xf32> to vector<16x128xf32>
      %18 = arith.addf %15, %17 : vector<16x128xf32>
      %cst_16 = arith.constant 5.000000e-01 : f32
      %19 = vector.broadcast %cst_16 : f32 to vector<16x128xf32>
      %20 = arith.mulf %18, %19 : vector<16x128xf32>
      %cst_17 = arith.constant 0.707106769 : f32
      %21 = vector.broadcast %cst_17 : f32 to vector<16x128xf32>
      %22 = arith.mulf %18, %21 : vector<16x128xf32>
      %23 = math.erf %22 : vector<16x128xf32>
      %cst_18 = arith.constant 1.000000e+00 : f32
      %24 = vector.broadcast %cst_18 : f32 to vector<16x128xf32>
      %25 = arith.addf %24, %23 : vector<16x128xf32>
      %26 = arith.mulf %20, %25 : vector<16x128xf32>
      %27 = arith.truncf %26 : vector<16x128xf32> to vector<16x128xbf16>
      %c0_19 = arith.constant 0 : index
      %c0_20 = arith.constant 0 : index
      %28 = vector.load %arg8[%c0_19, %c0_20] : memref<16x128xbf16, #tpu.memory_space<vmem>>, vector<16x128xbf16>
      tpu.vector_store %arg8[%c0_19, %c0_20], %27 {strides = array<i32>} : memref<16x128xbf16, #tpu.memory_space<vmem>>, vector<16x128xbf16>,
    } else {
    }
    return
  }
  func.func @transform_0(%arg0: i32, %arg1: i32, %arg2: i32) -> (i32, i32) {
    %c0_i32 = arith.constant 0 : i32
    return %arg0, %arg2 : i32, i32
  }
  func.func @transform_1(%arg0: i32, %arg1: i32, %arg2: i32) -> (i32, i32) {
    %c0_i32 = arith.constant 0 : i32
    return %arg2, %arg1 : i32, i32
  }
  func.func @transform_2(%arg0: i32, %arg1: i32, %arg2: i32) -> (i32, i32) {
    %c0_i32 = arith.constant 0 : i32
    %c0_i32_0 = arith.constant 0 : i32
    %c0_i32_1 = arith.constant 0 : i32
    return %c0_i32, %c0_i32_0 : i32, i32
  }
  func.func @transform_3(%arg0: i32, %arg1: i32, %arg2: i32) -> (i32, i32) {
    %c0_i32 = arith.constant 0 : i32
    %c0_i32_0 = arith.constant 0 : i32
    %c0_i32_1 = arith.constant 0 : i32
    return %c0_i32, %c0_i32_0 : i32, i32
  }
  func.func @transform_4(%arg0: i32, %arg1: i32, %arg2: i32) -> (i32, i32) {
    %c0_i32 = arith.constant 0 : i32
    %c0_i32_0 = arith.constant 0 : i32
    return %c0_i32, %arg1 : i32, i32
  }
  func.func @transform_5(%arg0: i32, %arg1: i32, %arg2: i32) -> (i32, i32) {
    %c0_i32 = arith.constant 0 : i32
    return %arg0, %arg1 : i32, i32
  }
}

module attributes {stable_mosaic.version = 11 : i64} {
  func.func @_fused_linear_kernel(%arg0: i32, %arg1: i32, %arg2: i32, %arg3: memref<16x128xbf16, #tpu.memory_space<vmem>>, %arg4: memref<128x32xbf16, #tpu.memory_space<vmem>>, %arg5: memref<1x32xf32, #tpu.memory_space<vmem>>, %arg6: memref<16x32xf32, #tpu.memory_space<vmem>>, %arg7: memref<16x32xf32, #tpu.memory_space<vmem>>, %arg8: memref<16x32xf32, #tpu.memory_space<vmem>>) attributes {dimension_semantics = [#tpu.dimension_semantics<parallel>, #tpu.dimension_semantics<parallel>, #tpu.dimension_semantics<arbitrary>], iteration_bounds = array<i64: 1, 1, 1>, scalar_prefetch = 0 : i64, scratch_operands = 1 : i64, tpu.core_type = #tpu.core_type<tc>, window_params = [{transform_indices = @transform_0, window_bounds = array<i64: 16, 128>}, {transform_indices = @transform_1, window_bounds = array<i64: 128, 32>}, {transform_indices = @transform_2, window_bounds = array<i64: 1, 32>}, {transform_indices = @transform_3, window_bounds = array<i64: 16, 32>}, {transform_indices = @transform_4, window_bounds = array<i64: 16, 32>}]} {
    %c0_i32 = arith.constant 0 : i32
    %0 = arith.cmpi eq, %arg2, %c0_i32 : i32
    %1 = arith.extui %0 : i1 to i32
    %c0_i32_0 = arith.constant 0 : i32
    %2 = arith.cmpi ne, %1, %c0_i32_0 : i32
    scf.if %2 {
      %cst_10 = arith.constant 0.000000e+00 : f32
      %12 = vector.broadcast %cst_10 : f32 to vector<16x32xf32>
      %c0_11 = arith.constant 0 : index
      %c0_12 = arith.constant 0 : index
      %13 = vector.load %arg8[%c0_11, %c0_12] : memref<16x32xf32, #tpu.memory_space<vmem>>, vector<16x32xf32>
      tpu.vector_store %arg8[%c0_11, %c0_12], %12 {strides = array<i32>} : memref<16x32xf32, #tpu.memory_space<vmem>>, vector<16x32xf32>,
    } else {
    }
    %c0 = arith.constant 0 : index
    %c0_1 = arith.constant 0 : index
    %3 = vector.load %arg3[%c0, %c0_1] : memref<16x128xbf16, #tpu.memory_space<vmem>>, vector<16x128xbf16>
    %c0_2 = arith.constant 0 : index
    %c0_3 = arith.constant 0 : index
    %4 = vector.load %arg8[%c0_2, %c0_3] : memref<16x32xf32, #tpu.memory_space<vmem>>, vector<16x32xf32>
    %c0_4 = arith.constant 0 : index
    %c0_5 = arith.constant 0 : index
    %5 = vector.load %arg4[%c0_4, %c0_5] : memref<128x32xbf16, #tpu.memory_space<vmem>>, vector<128x32xbf16>
    %cst = arith.constant dense<0.000000e+00> : vector<16x32xf32>
    %6 = tpu.matmul %3, %5, %cst {dimension_numbers = #tpu.dot_dimension_numbers<[1], [0], [0], [1], [0, 0, 1, 1], [], []>} : vector<16x128xbf16>, vector<128x32xbf16>, vector<16x32xf32> -> vector<16x32xf32>
    %7 = arith.addf %4, %6 : vector<16x32xf32>
    %c0_6 = arith.constant 0 : index
    %c0_7 = arith.constant 0 : index
    %8 = vector.load %arg8[%c0_6, %c0_7] : memref<16x32xf32, #tpu.memory_space<vmem>>, vector<16x32xf32>
    tpu.vector_store %arg8[%c0_6, %c0_7], %7 {strides = array<i32>} : memref<16x32xf32, #tpu.memory_space<vmem>>, vector<16x32xf32>,
    %c0_i32_8 = arith.constant 0 : i32
    %9 = arith.cmpi eq, %arg2, %c0_i32_8 : i32
    %10 = arith.extui %9 : i1 to i32
    %c0_i32_9 = arith.constant 0 : i32
    %11 = arith.cmpi ne, %10, %c0_i32_9 : i32
    scf.if %11 {
      %c0_10 = arith.constant 0 : index
      %c0_11 = arith.constant 0 : index
      %12 = vector.load %arg8[%c0_10, %c0_11] : memref<16x32xf32, #tpu.memory_space<vmem>>, vector<16x32xf32>
      %c0_12 = arith.constant 0 : index
      %c0_13 = arith.constant 0 : index
      %13 = vector.load %arg5[%c0_12, %c0_13] : memref<1x32xf32, #tpu.memory_space<vmem>>, vector<1x32xf32>
      %14 = vector.broadcast %13 : vector<1x32xf32> to vector<16x32xf32>
      %15 = arith.addf %12, %14 : vector<16x32xf32>
      %c0_14 = arith.constant 0 : index
      %c0_15 = arith.constant 0 : index
      %16 = vector.load %arg6[%c0_14, %c0_15] : memref<16x32xf32, #tpu.memory_space<vmem>>, vector<16x32xf32>
      %17 = arith.addf %15, %16 : vector<16x32xf32>
      %c0_16 = arith.constant 0 : index
      %c0_17 = arith.constant 0 : index
      %18 = vector.load %arg7[%c0_16, %c0_17] : memref<16x32xf32, #tpu.memory_space<vmem>>, vector<16x32xf32>
      tpu.vector_store %arg7[%c0_16, %c0_17], %17 {strides = array<i32>} : memref<16x32xf32, #tpu.memory_space<vmem>>, vector<16x32xf32>,
    } else {
    }
    return
  }
  func.func @transform_0(%arg0: i32, %arg1: i32, %arg2: i32) -> (i32, i32) {
    %c0_i32 = arith.constant 0 : i32
    return %arg0, %arg2 : i32, i32
  }
  func.func @transform_1(%arg0: i32, %arg1: i32, %arg2: i32) -> (i32, i32) {
    %c0_i32 = arith.constant 0 : i32
    return %arg2, %arg1 : i32, i32
  }
  func.func @transform_2(%arg0: i32, %arg1: i32, %arg2: i32) -> (i32, i32) {
    %c0_i32 = arith.constant 0 : i32
    %c0_i32_0 = arith.constant 0 : i32
    return %c0_i32, %arg1 : i32, i32
  }
  func.func @transform_3(%arg0: i32, %arg1: i32, %arg2: i32) -> (i32, i32) {
    %c0_i32 = arith.constant 0 : i32
    return %arg0, %arg1 : i32, i32
  }
  func.func @transform_4(%arg0: i32, %arg1: i32, %arg2: i32) -> (i32, i32) {
    %c0_i32 = arith.constant 0 : i32
    return %arg0, %arg1 : i32, i32
  }
}

module attributes {stable_mosaic.version = 11 : i64} {
  func.func @_fused_linear_kernel(%arg0: i32, %arg1: i32, %arg2: i32, %arg3: memref<16x32xf32, #tpu.memory_space<vmem>>, %arg4: memref<32x512xbf16, #tpu.memory_space<vmem>>, %arg5: memref<1x32xf32, #tpu.memory_space<vmem>>, %arg6: memref<1x32xf32, #tpu.memory_space<vmem>>, %arg7: memref<16x512xf32, #tpu.memory_space<vmem>>, %arg8: memref<16x512xf32, #tpu.memory_space<vmem>>, %arg9: memref<16x32xbf16, #tpu.memory_space<vmem>>) attributes {dimension_semantics = [#tpu.dimension_semantics<parallel>, #tpu.dimension_semantics<arbitrary>, #tpu.dimension_semantics<arbitrary>], iteration_bounds = array<i64: 1, 1, 1>, scalar_prefetch = 0 : i64, scratch_operands = 2 : i64, tpu.core_type = #tpu.core_type<tc>, window_params = [{transform_indices = @transform_0, window_bounds = array<i64: 16, 32>}, {transform_indices = @transform_1, window_bounds = array<i64: 32, 512>}, {pipeline_mode = #tpu.pipeline_mode<synchronous>, transform_indices = @transform_2, window_bounds = array<i64: 1, 32>}, {pipeline_mode = #tpu.pipeline_mode<synchronous>, transform_indices = @transform_3, window_bounds = array<i64: 1, 32>}, {transform_indices = @transform_4, window_bounds = array<i64: 16, 512>}]} {
    %c0_i32 = arith.constant 0 : i32
    %0 = arith.cmpi eq, %arg2, %c0_i32 : i32
    %1 = arith.extui %0 : i1 to i32
    %c0_i32_0 = arith.constant 0 : i32
    %2 = arith.cmpi ne, %1, %c0_i32_0 : i32
    scf.if %2 {
      %cst_12 = arith.constant 0.000000e+00 : f32
      %15 = vector.broadcast %cst_12 : f32 to vector<16x512xf32>
      %c0_13 = arith.constant 0 : index
      %c0_14 = arith.constant 0 : index
      %16 = vector.load %arg8[%c0_13, %c0_14] : memref<16x512xf32, #tpu.memory_space<vmem>>, vector<16x512xf32>
      tpu.vector_store %arg8[%c0_13, %c0_14], %15 {strides = array<i32>} : memref<16x512xf32, #tpu.memory_space<vmem>>, vector<16x512xf32>,
    } else {
    }
    %c0_i32_1 = arith.constant 0 : i32
    %3 = arith.cmpi eq, %arg1, %c0_i32_1 : i32
    %4 = arith.extui %3 : i1 to i32
    %c0_i32_2 = arith.constant 0 : i32
    %5 = arith.cmpi ne, %4, %c0_i32_2 : i32
    scf.if %5 {
      %c0_12 = arith.constant 0 : index
      %c0_13 = arith.constant 0 : index
      %15 = vector.load %arg3[%c0_12, %c0_13] : memref<16x32xf32, #tpu.memory_space<vmem>>, vector<16x32xf32>
      %cst_14 = arith.constant dense<0.000000e+00> : vector<16xf32>
      %16 = vector.multi_reduction <add>, %15, %cst_14 [1] : vector<16x32xf32> to vector<16xf32>
      %17 = vector.shape_cast %16 : vector<16xf32> to vector<16x1xf32>
      %cst_15 = arith.constant 3.200000e+01 : f32
      %18 = vector.broadcast %cst_15 : f32 to vector<16x1xf32>
      %19 = arith.divf %17, %18 : vector<16x1xf32>
      %20 = vector.broadcast %19 : vector<16x1xf32> to vector<16x32xf32>
      %21 = arith.subf %15, %20 : vector<16x32xf32>
      %22 = arith.mulf %21, %21 : vector<16x32xf32>
      %cst_16 = arith.constant dense<0.000000e+00> : vector<16xf32>
      %23 = vector.multi_reduction <add>, %22, %cst_16 [1] : vector<16x32xf32> to vector<16xf32>
      %24 = vector.shape_cast %23 : vector<16xf32> to vector<16x1xf32>
      %cst_17 = arith.constant 3.200000e+01 : f32
      %25 = vector.broadcast %cst_17 : f32 to vector<16x1xf32>
      %26 = arith.divf %24, %25 : vector<16x1xf32>
      %27 = vector.broadcast %19 : vector<16x1xf32> to vector<16x32xf32>
      %28 = arith.subf %15, %27 : vector<16x32xf32>
      %cst_18 = arith.constant 9.99999974E-6 : f32
      %29 = vector.broadcast %cst_18 : f32 to vector<16x1xf32>
      %30 = arith.addf %26, %29 : vector<16x1xf32>
      %31 = math.rsqrt %30 : vector<16x1xf32>
      %32 = vector.broadcast %31 : vector<16x1xf32> to vector<16x32xf32>
      %33 = arith.mulf %28, %32 : vector<16x32xf32>
      %c0_19 = arith.constant 0 : index
      %c0_20 = arith.constant 0 : index
      %34 = vector.load %arg5[%c0_19, %c0_20] : memref<1x32xf32, #tpu.memory_space<vmem>>, vector<1x32xf32>
      %35 = vector.broadcast %34 : vector<1x32xf32> to vector<16x32xf32>
      %36 = arith.mulf %33, %35 : vector<16x32xf32>
      %c0_21 = arith.constant 0 : index
      %c0_22 = arith.constant 0 : index
      %37 = vector.load %arg6[%c0_21, %c0_22] : memref<1x32xf32, #tpu.memory_space<vmem>>, vector<1x32xf32>
      %38 = vector.broadcast %37 : vector<1x32xf32> to vector<16x32xf32>
      %39 = arith.addf %36, %38 : vector<16x32xf32>
      %40 = arith.truncf %39 : vector<16x32xf32> to vector<16x32xbf16>
      %c0_23 = arith.constant 0 : index
      %c0_24 = arith.constant 0 : index
      %41 = vector.load %arg9[%c0_23, %c0_24] : memref<16x32xbf16, #tpu.memory_space<vmem>>, vector<16x32xbf16>
      tpu.vector_store %arg9[%c0_23, %c0_24], %40 {strides = array<i32>} : memref<16x32xbf16, #tpu.memory_space<vmem>>, vector<16x32xbf16>,
    } else {
    }
    %c0 = arith.constant 0 : index
    %c0_3 = arith.constant 0 : index
    %6 = vector.load %arg9[%c0, %c0_3] : memref<16x32xbf16, #tpu.memory_space<vmem>>, vector<16x32xbf16>
    %c0_4 = arith.constant 0 : index
    %c0_5 = arith.constant 0 : index
    %7 = vector.load %arg8[%c0_4, %c0_5] : memref<16x512xf32, #tpu.memory_space<vmem>>, vector<16x512xf32>
    %c0_6 = arith.constant 0 : index
    %c0_7 = arith.constant 0 : index
    %8 = vector.load %arg4[%c0_6, %c0_7] : memref<32x512xbf16, #tpu.memory_space<vmem>>, vector<32x512xbf16>
    %cst = arith.constant dense<0.000000e+00> : vector<16x512xf32>
    %9 = tpu.matmul %6, %8, %cst {dimension_numbers = #tpu.dot_dimension_numbers<[1], [0], [0], [1], [0, 0, 1, 1], [], []>} : vector<16x32xbf16>, vector<32x512xbf16>, vector<16x512xf32> -> vector<16x512xf32>
    %10 = arith.addf %7, %9 : vector<16x512xf32>
    %c0_8 = arith.constant 0 : index
    %c0_9 = arith.constant 0 : index
    %11 = vector.load %arg8[%c0_8, %c0_9] : memref<16x512xf32, #tpu.memory_space<vmem>>, vector<16x512xf32>
    tpu.vector_store %arg8[%c0_8, %c0_9], %10 {strides = array<i32>} : memref<16x512xf32, #tpu.memory_space<vmem>>, vector<16x512xf32>,
    %c0_i32_10 = arith.constant 0 : i32
    %12 = arith.cmpi eq, %arg2, %c0_i32_10 : i32
    %13 = arith.extui %12 : i1 to i32
    %c0_i32_11 = arith.constant 0 : i32
    %14 = arith.cmpi ne, %13, %c0_i32_11 : i32
    scf.if %14 {
      %c0_12 = arith.constant 0 : index
      %c0_13 = arith.constant 0 : index
      %15 = vector.load %arg8[%c0_12, %c0_13] : memref<16x512xf32, #tpu.memory_space<vmem>>, vector<16x512xf32>
      %c0_14 = arith.constant 0 : index
      %c0_15 = arith.constant 0 : index
      %16 = vector.load %arg7[%c0_14, %c0_15] : memref<16x512xf32, #tpu.memory_space<vmem>>, vector<16x512xf32>
      tpu.vector_store %arg7[%c0_14, %c0_15], %15 {strides = array<i32>} : memref<16x512xf32, #tpu.memory_space<vmem>>, vector<16x512xf32>,
    } else {
    }
    return
  }
  func.func @transform_0(%arg0: i32, %arg1: i32, %arg2: i32) -> (i32, i32) {
    %c0_i32 = arith.constant 0 : i32
    return %arg0, %arg2 : i32, i32
  }
  func.func @transform_1(%arg0: i32, %arg1: i32, %arg2: i32) -> (i32, i32) {
    %c0_i32 = arith.constant 0 : i32
    return %arg2, %arg1 : i32, i32
  }
  func.func @transform_2(%arg0: i32, %arg1: i32, %arg2: i32) -> (i32, i32) {
    %c0_i32 = arith.constant 0 : i32
    %c0_i32_0 = arith.constant 0 : i32
    %c0_i32_1 = arith.constant 0 : i32
    return %c0_i32, %c0_i32_0 : i32, i32
  }
  func.func @transform_3(%arg0: i32, %arg1: i32, %arg2: i32) -> (i32, i32) {
    %c0_i32 = arith.constant 0 : i32
    %c0_i32_0 = arith.constant 0 : i32
    %c0_i32_1 = arith.constant 0 : i32
    return %c0_i32, %c0_i32_0 : i32, i32
  }
  func.func @transform_4(%arg0: i32, %arg1: i32, %arg2: i32) -> (i32, i32) {
    %c0_i32 = arith.constant 0 : i32
    return %arg0, %arg1 : i32, i32
  }
}

</mosaic_0001>

<bundles_post_ra>
// kernel: text_decoder_forward.26
= control target key start
LH: loop header
LB: loop body
LE: loop exit
PB: predicated region body
PF: predicated region fallthrough
CT: control target
= control target key end

     0   :  { %9 = vsyncpa [#allocation5], 0  ;;  %s501_s0 = inlined_call_operand.hbm [shape: f32[16,32], index: 0, kind: input, shape index: {}]   ;;  %s502_s1 = inlined_call_operand.hbm [shape: bf16[32,32], index: 1, kind: input, shape index: {}]   ;;  %s503_s2 = inlined_call_operand.hbm [shape: f32[1,32], index: 2, kind: input, shape index: {}]   ;;  %s504_s3 = inlined_call_operand.hbm [shape: f32[1,32], index: 3, kind: input, shape index: {}]   ;;  %s505_s4 = inlined_call_operand.hbm [shape: bf16[16,32], index: 4, kind: output, shape index: {}]  }
   0x1   :  { %10 = vsyncpa [#allocation8], 0 }
   0x2   :  { %11 = vsyncpa [#allocation11], 0 }
   0x3   :  { %12 = vsyncpa [#allocation6], 0  ;;  %s389_s15 = smov [#allocation7]   ;;  %s271_s19 = scalar_lea.hbm %s502_s1, 256 }
   0x4   :  { %s30_s16 = sshll.u32 %s389_s15, 4  ;;  %p272_p0 = scmp.ne.s32.totalorder %s502_s1, %s271_s19  ;;  %s31_s16 = int_to_ptr.vmem [resolvable:$true] %s30_s16 }
   0x5   :  { %p275_p1 = scmp.lt.u32.totalorder %s271_s19, %s502_s1 }
   0x7   :  { %p277_p2 = pnand %p275_p1, %p272_p0 }
   0x9   :  { %280 = shalt.err (!%p277_p2)
}
   0xa   :  { %s281_s24 = scalar_lea.vmem %s31_s16, 256  ;;  %p286_p4 = scmp.lt.s32.totalorder %s31_s16, %s31_s16 }
   0xb   :  { %p282_p3 = scmp.ne.s32.totalorder %s31_s16, %s281_s24  ;;  %p287_p5 = scmp.lt.s32.totalorder %s281_s24, %s281_s24 }
   0xd   :  { %p288_p6 = por %p287_p5, %p286_p4 }
   0xf   :  { %p289_p7 = pnand %p288_p6, %p282_p3 }
  0x11   :  { %292 = shalt.err (!%p289_p7)
}
  0x12   :  { %s390_s25 = smov 64   ;;  %s391_s26 = smov 4  }
  0x13   :  { %36 = dma.hbm_to_vmem [thread:$0]  %s502_s1, 256, %s31_s16, [#allocation8], %s390_s25, %s390_s25, %s391_s26  }
  0x14   :  { %s392_s29 = smov [#allocation4]   ;;  %s293_s7 = scalar_lea.hbm %s501_s0, 256 }
  0x15   :  { %s18_s30 = sshll.u32 %s392_s29, 4  ;;  %p294_p8 = scmp.ne.s32.totalorder %s501_s0, %s293_s7  ;;  %s19_s30 = int_to_ptr.vmem [resolvable:$true] %s18_s30 }
  0x16   :  { %p297_p9 = scmp.lt.u32.totalorder %s293_s7, %s501_s0 }
  0x18   :  { %p299_p10 = pnand %p297_p9, %p294_p8 }
  0x1a   :  { %302 = shalt.err (!%p299_p10)
}
  0x1b   :  { %s303_s12 = scalar_lea.vmem %s19_s30, 256  ;;  %p308_p12 = scmp.lt.s32.totalorder %s19_s30, %s19_s30 }
  0x1c   :  { %p304_p11 = scmp.ne.s32.totalorder %s19_s30, %s303_s12  ;;  %p309_p13 = scmp.lt.s32.totalorder %s303_s12, %s303_s12 }
  0x1e   :  { %p310_p0 = por %p309_p13, %p308_p12 }
  0x20   :  { %p311_p1 = pnand %p310_p0, %p304_p11 }
  0x22   :  { %314 = shalt.err (!%p311_p1)
}
  0x23   :  { %s393_s1 = smov 128   ;;  %s394_s13 = smov 8  }
  0x24   :  { %24 = dma.hbm_to_vmem [thread:$0]  %s501_s0, 256, %s19_s30, [#allocation5], %s393_s1, %s393_s1, %s394_s13  }
  0x25   :  { %s395_s16 = smov [#allocation9]   ;;  %s396_s18 = smov [#allocation10]  }
  0x26   :  { %s43_s17 = sshll.u32 %s395_s16, 4  ;;  %s53_s19 = sshll.u32 %s396_s18, 4  ;;  %s44_s17 = int_to_ptr.vmem [resolvable:$true] %s43_s17  ;;  %s54_s19 = int_to_ptr.vmem [resolvable:$true] %s53_s19 }
  0x27   :  { %s315_s22 = scalar_lea.hbm %s503_s2, 16 }
  0x28   :  { %p316_p2 = scmp.ne.s32.totalorder %s503_s2, %s315_s22  ;;  %p319_p3 = scmp.lt.u32.totalorder %s315_s22, %s503_s2 }
  0x2a   :  { %p321_p4 = pnand %p319_p3, %p316_p2 }
  0x2c   :  { %324 = shalt.err (!%p321_p4)
}
  0x2d   :  { %s325_s0 = scalar_lea.vmem %s44_s17, 16  ;;  %s329_s29 = scalar_lea.vmem %s44_s17, 32 }
  0x2e   :  { %p326_p5 = scmp.ne.s32.totalorder %s44_s17, %s325_s0  ;;  %p330_p6 = scmp.lt.s32.totalorder %s44_s17, %s44_s17 }
  0x2f   :  { %p331_p7 = scmp.lt.s32.totalorder %s329_s29, %s325_s0 }
  0x31   :  { %p332_p8 = por %p331_p7, %p330_p6 }
  0x33   :  { %p333_p9 = pnand %p332_p8, %p326_p5 }
  0x35   :  { %336 = shalt.err (!%p333_p9)
}
  0x36   :  { %46 = dma.hbm_to_vmem [thread:$0]  %s503_s2, 16, %s44_s17, [#allocation8]  }
  0x37   :  { %s337_s8 = scalar_lea.hbm %s504_s3, 16 }
  0x38   :  { %p338_p10 = scmp.ne.s32.totalorder %s504_s3, %s337_s8  ;;  %p341_p11 = scmp.lt.u32.totalorder %s337_s8, %s504_s3 }
  0x3a   :  { %p343_p12 = pnand %p341_p11, %p338_p10 }
  0x3c   :  { %346 = shalt.err (!%p343_p12)
}
  0x3d   :  { %s347_s1 = scalar_lea.vmem %s54_s19, 16  ;;  %s351_s13 = scalar_lea.vmem %s54_s19, 32 }
  0x3e   :  { %p348_p13 = scmp.ne.s32.totalorder %s54_s19, %s347_s1  ;;  %p352_p0 = scmp.lt.s32.totalorder %s54_s19, %s54_s19 }
  0x3f   :  { %p353_p1 = scmp.lt.s32.totalorder %s351_s13, %s347_s1 }
  0x41   :  { %p354_p2 = por %p353_p1, %p352_p0 }
  0x43   :  { %p355_p3 = pnand %p354_p2, %p348_p13 }
  0x45   :  { %358 = shalt.err (!%p355_p3)
}
  0x46   :  { %56 = dma.hbm_to_vmem [thread:$0]  %s504_s3, 16, %s54_s19, [#allocation11]  }
  0x47   :  { %381 = dma.done.wait [#allocation5], 256  }
  0x48   :  { %382 = vsyncadd [#allocation5], 4294967040 }
  0x49   :  { %383 = dma.done.wait [#allocation8], 272  }
  0x4a   :  { %384 = vsyncadd [#allocation8], 4294967024 }
  0x4b   :  { %385 = dma.done.wait [#allocation11], 16  }
  0x4c   :  { %386 = vsyncadd [#allocation11], 4294967280  ;;  %vm74_vm0 = vcmask 261120   ;;  %v81_v0 = vld [vmem:[#allocation4] sm:$0xff]  ;;  %v82_v1 = vld [vmem:[#allocation4 + $0x8] sm:$0xff]  ;;  %v397_v15 = vmov 0.0  }
  0x4d   :  { %v84_v2 = vsel %vm74_vm0, %v81_v0, 0.0  ;;  %v87_v3 = vsel %vm74_vm0, %v82_v1, 0.0  ;;  %v265_v14 = vld [vmem:[#allocation7] sm:$0xff]   ;;  %75 = vst.msk [vmem:[#allocation2] sm:$0xff] %vm74_vm0, %v397_v15  ;;  %76 = vst.msk [vmem:[#allocation2 + $0x8] sm:$0xff] %vm74_vm0, %v397_v15  ;;  %246 = vmatprep.subr.bf16.mxu0 %v397_v15  ;;  %v266_v16 = vld [vmem:[#allocation7 + $0x8] sm:$0xff]  }
  0x4e   :  { %85 = vadd.xlane.f32.xlu0 %v84_v2  ;;  %247 = vmatpush3.bf16.msra.mxu0 %v265_v14  ;;  %vm398_vm1 = vmmov 0   ;;  %v234_v25 = vld [vmem:[#allocation9] ss:$0 sm:$0xff]  ;;  %v235_v29 = vld [vmem:[#allocation10] ss:$0 sm:$0xff]  ;;  %vm212_vm2 = vcmask 257024  }
  0x4f   :  { %250 = vmatprep.mubr.msk.bf16.mxu0 %vm398_vm1, %v397_v15  ;;  %248 = vmatprep.subr.bf16.mxu0 %v397_v15  ;;  %s399_s3 = smov [#allocation12]  }
  0x50   :  { %s220_s15 = sshll.u32 %s399_s3, 4  ;;  %s221_s15 = int_to_ptr.vmem [resolvable:$true] %s220_s15 }
  0x51   :  { %s359_s16 = scalar_lea.vmem %s221_s15, 128  ;;  %p364_p5 = scmp.lt.s32.totalorder %s221_s15, %s221_s15 }
  0x52   :  { %88 = vadd.xlane.f32.xlu0 %v87_v3  ;;  %249 = vmatpush3.bf16.msra.mxu0 %v266_v16  ;;  %p360_p4 = scmp.ne.s32.totalorder %s221_s15, %s359_s16  ;;  %p365_p6 = scmp.lt.s32.totalorder %s359_s16, %s359_s16 }
  0x54   :  { %v132_v35 = vld [vmem:[#allocation2] sm:$0xff]  ;;  %v133_v37 = vld [vmem:[#allocation2 + $0x8] sm:$0xff]  ;;  %p366_p7 = por %p365_p6, %p364_p5 }
  0x56   :  { %p367_p8 = pnand %p366_p7, %p360_p4 }
  0xdb   :  { %v86_v4 = vpop.xlane.xlu0 %85 }
  0xdc   :  { %v91_v5 = vmul.f32 0.03125, %v86_v4 }
  0xde   :  { %v93_v6 = vsub.f32 %v81_v0, %v91_v5 }
  0xdf   :  { %v89_v7 = vpop.xlane.xlu0 %88 }
  0xe0   :  { %v92_v8 = vmul.f32 0.03125, %v89_v7  ;;  %v95_v9 = vmul.f32 %v93_v6, %v93_v6 }
  0xe2   :  { %v94_v10 = vsub.f32 %v82_v1, %v92_v8  ;;  %v97_v11 = vsel %vm74_vm0, %v95_v9, 0.0 }
  0xe3   :  { %98 = vadd.xlane.f32.xlu1 %v97_v11 }
  0xe4   :  { %v96_v12 = vmul.f32 %v94_v10, %v94_v10 }
  0xe6   :  { %v100_v13 = vsel %vm74_vm0, %v96_v12, 0.0 }
  0xe7   :  { %101 = vadd.xlane.f32.xlu1 %v100_v13 }
 0x170   :  { %v99_v17 = vpop.xlane.xlu1 %98 }
 0x171   :  { %v103_v18 = vmul.f32 0.03125, %v99_v17 }
 0x173   :  { %v105_v19 = vadd.f32 1e-05, %v103_v18 }
 0x174   :  { %v102_v20 = vpop.xlane.xlu1 %101 }
 0x175   :  { %267 = vrsqrt.f32 %v105_v19  ;;  %v104_v21 = vmul.f32 0.03125, %v102_v20 }
 0x177   :  { %v106_v22 = vadd.f32 1e-05, %v104_v21 }
 0x179   :  { %269 = vrsqrt.f32 %v106_v22 }
 0x17f   :  { %v268_v23 = vpop.eup %267 }
 0x180   :  { %v109_v24 = vmul.f32 %v268_v23, %v93_v6 }
 0x182   :  { %v118_v27 = vmul.f32 %v234_v25, %v109_v24 }
 0x183   :  { %v270_v26 = vpop.eup %269 }
 0x184   :  { %v110_v28 = vmul.f32 %v270_v26, %v94_v10  ;;  %v127_v31 = vadd.f32 %v235_v29, %v118_v27 }
 0x186   :  { %v119_v30 = vmul.f32 %v234_v25, %v110_v28 }
 0x188   :  { %v128_v32 = vadd.f32 %v235_v29, %v119_v30 }
 0x18a   :  { %v129_v33 = vpack.c.bf16 %v128_v32, %v127_v31 }
 0x18c   :  { %130 = vst.msk [vmem:[#allocation3] sm:$0xff] %vm74_vm0, %v129_v33 }
 0x193   :  { %v131_v34 = vld [vmem:[#allocation3] sm:$0xff] }
 0x194   :  { %251 = vmatmul.mubr.msk.bf16.vlgmr.msra.gmra.mrb[0].mxu0 %vm74_vm0, %v131_v34 }
 0x267   :  { %v188_v36 = vpop.f32.mrb[0].mxu0 }
 0x268   :  { %v195_v38 = vadd.f32 %v188_v36, %v132_v35  ;;  %v252_v39 = vpop.f32.mrb[1].mxu0 }
 0x269   :  { %v191_v40 = vpop.f32.mrb[2].mxu0 }
 0x26a   :  { %197 = vst.msk [vmem:[#allocation2] sm:$0xff] %vm74_vm0, %v195_v38  ;;  %v196_v41 = vadd.f32 %v191_v40, %v133_v37  ;;  %v253_v42 = vpop.f32.mrb[3].mxu0 }
 0x26c   :  { %198 = vst.msk [vmem:[#allocation2 + $0x8] sm:$0xff] %vm74_vm0, %v196_v41 }
 0x271   :  { %v202_v43 = vld [vmem:[#allocation2] sm:$0xff] }
 0x272   :  { %v241_v44 = vpack.c.bf16 %v202_v43, %v202_v43 }
 0x273   :  { %v203_v45 = vld [vmem:[#allocation2 + $0x8] sm:$0xff] }
 0x274   :  { %v242_v46 = vpack.c.bf16 %v203_v45, %v203_v45  ;;  %213 = vst.msk [vmem:[#allocation12] sm:$0xf] %vm212_vm2, %v241_v44 }
 0x276   :  { %214 = vst.msk [vmem:[#allocation12 + $0x4] sm:$0xf] %vm212_vm2, %v242_v46 }
 0x277   :  { %370 = shalt.err (!%p367_p8)
}
 0x278   :  { %s371_s19 = scalar_lea.hbm %s505_s4, 128 }
 0x279   :  { %p372_p9 = scmp.ne.s32.totalorder %s505_s4, %s371_s19  ;;  %p375_p10 = scmp.lt.u32.totalorder %s371_s19, %s505_s4 }
 0x27b   :  { %p377_p11 = pnand %p375_p10, %p372_p9 }
 0x27d   :  { %380 = shalt.err (!%p377_p11)
}
 0x27e   :  { %226 = dma.vmem_to_hbm [thread:$0]  %s221_s15, 128, %s505_s4, [#allocation6], %s390_s25, %s390_s25, %s391_s26  }
 0x27f   :  { %387 = dma.done.wait [#allocation6], 128  }
 0x280   :  { %388 = vsyncadd [#allocation6], 4294967168 }
 0x281   :  { %230 = vsyncpa [#allocation5], 1 }
 0x282   :  { %231 = vsyncpa [#allocation8], 1 }
 0x283   :  { %232 = vsyncpa [#allocation11], 1 }
 0x284   :  { %233 = vsyncpa [#allocation6], 1 }

// kernel: text_decoder_forward.29
= control target key start
LH: loop header
LB: loop body
LE: loop exit
PB: predicated region body
PF: predicated region fallthrough
CT: control target
= control target key end

     0   :  { %9 = vsyncpa [#allocation4], 0  ;;  %s463_s0 = inlined_call_operand.hbm [shape: bf16[16,32], index: 0, kind: input, shape index: {}]   ;;  %s464_s1 = inlined_call_operand.hbm [shape: bf16[32,32], index: 1, kind: input, shape index: {}]   ;;  %s465_s2 = inlined_call_operand.hbm [shape: f32[1,32], index: 2, kind: input, shape index: {}]   ;;  %s466_s3 = inlined_call_operand.hbm [shape: f32[16,32], index: 3, kind: input, shape index: {}]   ;;  %s467_s4 = inlined_call_operand.hbm [shape: f32[16,32], index: 4, kind: output, shape index: {}]  }
   0x1   :  { %10 = vsyncpa [#allocation7], 0 }
   0x2   :  { %11 = vsyncpa [#allocation10], 0 }
   0x3   :  { %12 = vsyncpa [#allocation5], 0  ;;  %s340_s15 = smov [#allocation6]   ;;  %s341_s17 = smov [#allocation3]  }
   0x4   :  { %s30_s16 = sshll.u32 %s340_s15, 4  ;;  %s18_s18 = sshll.u32 %s341_s17, 4  ;;  %s31_s16 = int_to_ptr.vmem [resolvable:$true] %s30_s16  ;;  %s376_s18 = int_to_ptr.vmem [resolvable:$true] %s18_s18 }
   0x5   :  { %s222_s21 = scalar_lea.hbm %s464_s1, 256 }
   0x6   :  { %p223_p0 = scmp.ne.s32.totalorder %s464_s1, %s222_s21  ;;  %p226_p1 = scmp.lt.u32.totalorder %s222_s21, %s464_s1 }
   0x8   :  { %p228_p2 = pnand %p226_p1, %p223_p0 }
   0xa   :  { %231 = shalt.err (!%p228_p2)
}
   0xb   :  { %s232_s26 = scalar_lea.vmem %s31_s16, 256  ;;  %p237_p4 = scmp.lt.s32.totalorder %s31_s16, %s31_s16 }
   0xc   :  { %p233_p3 = scmp.ne.s32.totalorder %s31_s16, %s232_s26  ;;  %p238_p5 = scmp.lt.s32.totalorder %s232_s26, %s232_s26 }
   0xe   :  { %p239_p6 = por %p238_p5, %p237_p4 }
  0x10   :  { %p240_p7 = pnand %p239_p6, %p233_p3 }
  0x12   :  { %243 = shalt.err (!%p240_p7)
}
  0x13   :  { %s342_s27 = smov 64   ;;  %s343_s28 = smov 4  }
  0x14   :  { %36 = dma.hbm_to_vmem [thread:$0]  %s464_s1, 256, %s31_s16, [#allocation7], %s342_s27, %s342_s27, %s343_s28  }
  0x15   :  { %s244_s7 = scalar_lea.hbm %s463_s0, 128 }
  0x16   :  { %p245_p8 = scmp.ne.s32.totalorder %s463_s0, %s244_s7  ;;  %p248_p9 = scmp.lt.u32.totalorder %s244_s7, %s463_s0 }
  0x18   :  { %p250_p10 = pnand %p248_p9, %p245_p8 }
  0x1a   :  { %253 = shalt.err (!%p250_p10)
}
  0x1b   :  { %s254_s12 = scalar_lea.vmem %s376_s18, 128  ;;  %p259_p12 = scmp.lt.s32.totalorder %s376_s18, %s376_s18 }
  0x1c   :  { %p255_p11 = scmp.ne.s32.totalorder %s376_s18, %s254_s12  ;;  %p260_p13 = scmp.lt.s32.totalorder %s254_s12, %s254_s12 }
  0x1e   :  { %p261_p0 = por %p260_p13, %p259_p12 }
  0x20   :  { %p262_p1 = pnand %p261_p0, %p255_p11 }
  0x22   :  { %265 = shalt.err (!%p262_p1)
}
  0x23   :  { %24 = dma.hbm_to_vmem [thread:$0]  %s463_s0, 128, %s376_s18, [#allocation4], %s342_s27, %s342_s27, %s343_s28  }
  0x24   :  { %s344_s14 = smov [#allocation8]   ;;  %s345_s16 = smov [#allocation9]  }
  0x25   :  { %s43_s15 = sshll.u32 %s344_s14, 4  ;;  %s52_s17 = sshll.u32 %s345_s16, 4  ;;  %s44_s15 = int_to_ptr.vmem [resolvable:$true] %s43_s15  ;;  %s407_s17 = int_to_ptr.vmem [resolvable:$true] %s52_s17 }
  0x26   :  { %s266_s21 = scalar_lea.hbm %s465_s2, 16 }
  0x27   :  { %p267_p2 = scmp.ne.s32.totalorder %s465_s2, %s266_s21  ;;  %p270_p3 = scmp.lt.u32.totalorder %s266_s21, %s465_s2 }
  0x29   :  { %p272_p4 = pnand %p270_p3, %p267_p2 }
  0x2b   :  { %275 = shalt.err (!%p272_p4)
}
  0x2c   :  { %s276_s0 = scalar_lea.vmem %s44_s15, 16  ;;  %s280_s18 = scalar_lea.vmem %s44_s15, 32 }
  0x2d   :  { %p277_p5 = scmp.ne.s32.totalorder %s44_s15, %s276_s0  ;;  %p281_p6 = scmp.lt.s32.totalorder %s44_s15, %s44_s15 }
  0x2e   :  { %p282_p7 = scmp.lt.s32.totalorder %s280_s18, %s276_s0 }
  0x30   :  { %p283_p8 = por %p282_p7, %p281_p6 }
  0x32   :  { %p284_p9 = pnand %p283_p8, %p277_p5 }
  0x34   :  { %287 = shalt.err (!%p284_p9)
}
  0x35   :  { %46 = dma.hbm_to_vmem [thread:$0]  %s465_s2, 16, %s44_s15, [#allocation7]  }
  0x36   :  { %s288_s30 = scalar_lea.hbm %s466_s3, 256 }
  0x37   :  { %p289_p10 = scmp.ne.s32.totalorder %s466_s3, %s288_s30  ;;  %p292_p11 = scmp.lt.u32.totalorder %s288_s30, %s466_s3 }
  0x39   :  { %p294_p12 = pnand %p292_p11, %p289_p10 }
  0x3b   :  { %297 = shalt.err (!%p294_p12)
}
  0x3c   :  { %s298_s9 = scalar_lea.vmem %s407_s17, 256  ;;  %p303_p0 = scmp.lt.s32.totalorder %s407_s17, %s407_s17 }
  0x3d   :  { %p299_p13 = scmp.ne.s32.totalorder %s407_s17, %s298_s9  ;;  %p304_p1 = scmp.lt.s32.totalorder %s298_s9, %s298_s9 }
  0x3f   :  { %p305_p2 = por %p304_p1, %p303_p0 }
  0x41   :  { %p306_p3 = pnand %p305_p2, %p299_p13 }
  0x43   :  { %309 = shalt.err (!%p306_p3)
}
  0x44   :  { %s346_s2 = smov 128   ;;  %s347_s10 = smov 8  }
  0x45   :  { %58 = dma.hbm_to_vmem [thread:$0]  %s466_s3, 256, %s407_s17, [#allocation10], %s346_s2, %s346_s2, %s347_s10  }
  0x46   :  { %332 = dma.done.wait [#allocation4], 128  }
  0x47   :  { %333 = vsyncadd [#allocation4], 4294967168 }
  0x48   :  { %334 = dma.done.wait [#allocation7], 272  }
  0x49   :  { %335 = vsyncadd [#allocation7], 4294967024 }
  0x4a   :  { %336 = dma.done.wait [#allocation10], 256  }
  0x4b   :  { %337 = vsyncadd [#allocation10], 4294967040  ;;  %vm76_vm0 = vcmask 261120   ;;  %v348_v0 = vmov 0.0   ;;  %vm349_vm1 = vmmov 0   ;;  %v219_v1 = vld [vmem:[#allocation6] sm:$0xff]  }
  0x4c   :  { %200 = vmatprep.subr.bf16.mxu0 %v348_v0  ;;  %204 = vmatprep.mubr.msk.bf16.mxu0 %vm349_vm1, %v348_v0  ;;  %77 = vst.msk [vmem:[#allocation2] sm:$0xff] %vm76_vm0, %v348_v0  ;;  %78 = vst.msk [vmem:[#allocation2 + $0x8] sm:$0xff] %vm76_vm0, %v348_v0  ;;  %v220_v2 = vld [vmem:[#allocation6 + $0x8] sm:$0xff]   ;;  %v221_v3 = vld [vmem:[#allocation3] sm:$0xff]   ;;  %s350_s3 = smov [#allocation11]  }
  0x4d   :  { %201 = vmatpush3.bf16.msra.mxu0 %v219_v1  ;;  %v196_v12 = vld [vmem:[#allocation8] ss:$0 sm:$0xff]  ;;  %v167_v14 = vld [vmem:[#allocation9] sm:$0xff]  ;;  %v168_v17 = vld [vmem:[#allocation9 + $0x8] sm:$0xff]  ;;  %s178_s1 = sshll.u32 %s350_s3, 4  ;;  %s179_s1 = int_to_ptr.vmem [resolvable:$true] %s178_s1 }
  0x4e   :  { %202 = vmatprep.subr.bf16.mxu0 %v348_v0  ;;  %s310_s13 = scalar_lea.vmem %s179_s1, 256  ;;  %p315_p5 = scmp.lt.s32.totalorder %s179_s1, %s179_s1 }
  0x4f   :  { %p311_p4 = scmp.ne.s32.totalorder %s179_s1, %s310_s13  ;;  %p316_p6 = scmp.lt.s32.totalorder %s310_s13, %s310_s13 }
  0x51   :  { %203 = vmatpush3.bf16.msra.mxu0 %v220_v2  ;;  %p317_p7 = por %p316_p6, %p315_p5 }
  0x53   :  { %v81_v4 = vld [vmem:[#allocation2] sm:$0xff]  ;;  %v82_v6 = vld [vmem:[#allocation2 + $0x8] sm:$0xff]  ;;  %p318_p8 = pnand %p317_p7, %p311_p4 }
  0x54   :  { %205 = vmatmul.mubr.msk.bf16.vlgmr.msra.gmra.mrb[0].mxu0 %vm76_vm0, %v221_v3 }
 0x127   :  { %v142_v5 = vpop.f32.mrb[0].mxu0 }
 0x128   :  { %v149_v7 = vadd.f32 %v142_v5, %v81_v4  ;;  %v206_v8 = vpop.f32.mrb[1].mxu0 }
 0x129   :  { %v145_v9 = vpop.f32.mrb[2].mxu0 }
 0x12a   :  { %151 = vst.msk [vmem:[#allocation2] sm:$0xff] %vm76_vm0, %v149_v7  ;;  %v150_v10 = vadd.f32 %v145_v9, %v82_v6  ;;  %v207_v11 = vpop.f32.mrb[3].mxu0 }
 0x12c   :  { %152 = vst.msk [vmem:[#allocation2 + $0x8] sm:$0xff] %vm76_vm0, %v150_v10 }
 0x131   :  { %v156_v13 = vld [vmem:[#allocation2] sm:$0xff] }
 0x132   :  { %v165_v15 = vadd.f32 %v196_v12, %v156_v13 }
 0x133   :  { %v157_v16 = vld [vmem:[#allocation2 + $0x8] sm:$0xff] }
 0x134   :  { %v166_v18 = vadd.f32 %v196_v12, %v157_v16  ;;  %v169_v19 = vadd.f32 %v167_v14, %v165_v15 }
 0x136   :  { %v170_v20 = vadd.f32 %v168_v17, %v166_v18  ;;  %171 = vst.msk [vmem:[#allocation11] sm:$0xff] %vm76_vm0, %v169_v19 }
 0x138   :  { %172 = vst.msk [vmem:[#allocation11 + $0x8] sm:$0xff] %vm76_vm0, %v170_v20 }
 0x139   :  { %321 = shalt.err (!%p318_p8)
}
 0x13a   :  { %s322_s16 = scalar_lea.hbm %s467_s4, 256 }
 0x13b   :  { %p323_p9 = scmp.ne.s32.totalorder %s467_s4, %s322_s16  ;;  %p326_p10 = scmp.lt.u32.totalorder %s322_s16, %s467_s4 }
 0x13d   :  { %p328_p11 = pnand %p326_p10, %p323_p9 }
 0x13f   :  { %331 = shalt.err (!%p328_p11)
}
 0x140   :  { %184 = dma.vmem_to_hbm [thread:$0]  %s179_s1, 256, %s467_s4, [#allocation5], %s346_s2, %s346_s2, %s347_s10  }
 0x141   :  { %338 = dma.done.wait [#allocation5], 256  }
 0x142   :  { %339 = vsyncadd [#allocation5], 4294967040 }
 0x143   :  { %188 = vsyncpa [#allocation4], 1 }
 0x144   :  { %189 = vsyncpa [#allocation7], 1 }
 0x145   :  { %190 = vsyncpa [#allocation10], 1 }
 0x146   :  { %191 = vsyncpa [#allocation5], 1 }

// kernel: text_decoder_forward.25
= control target key start
LH: loop header
LB: loop body
LE: loop exit
PB: predicated region body
PF: predicated region fallthrough
CT: control target
= control target key end

     0   :  { %10 = vsyncpa [#allocation5], 0  ;;  %s566_s0 = inlined_call_operand.hbm [shape: f32[16,32], index: 0, kind: input, shape index: {}]   ;;  %s567_s1 = inlined_call_operand.hbm [shape: bf16[32,32], index: 1, kind: input, shape index: {}]   ;;  %s568_s2 = inlined_call_operand.hbm [shape: f32[1,32], index: 2, kind: input, shape index: {}]   ;;  %s569_s3 = inlined_call_operand.hbm [shape: f32[1,32], index: 3, kind: input, shape index: {}]   ;;  %s570_s4 = inlined_call_operand.hbm [shape: f32[1,32], index: 4, kind: input, shape index: {}]   ;;  %s571_s5 = inlined_call_operand.hbm [shape: bf16[16,32], index: 5, kind: output, shape index: {}]  }
   0x1   :  { %11 = vsyncpa [#allocation8], 0 }
   0x2   :  { %12 = vsyncpa [#allocation11], 0 }
   0x3   :  { %13 = vsyncpa [#allocation6], 0  ;;  %s436_s18 = smov [#allocation7]   ;;  %s296_s22 = scalar_lea.hbm %s567_s1, 256 }
   0x4   :  { %s31_s19 = sshll.u32 %s436_s18, 4  ;;  %p297_p0 = scmp.ne.s32.totalorder %s567_s1, %s296_s22  ;;  %s32_s19 = int_to_ptr.vmem [resolvable:$true] %s31_s19 }
   0x5   :  { %p300_p1 = scmp.lt.u32.totalorder %s296_s22, %s567_s1 }
   0x7   :  { %p302_p2 = pnand %p300_p1, %p297_p0 }
   0x9   :  { %305 = shalt.err (!%p302_p2)
}
   0xa   :  { %s306_s27 = scalar_lea.vmem %s32_s19, 256  ;;  %p311_p4 = scmp.lt.s32.totalorder %s32_s19, %s32_s19 }
   0xb   :  { %p307_p3 = scmp.ne.s32.totalorder %s32_s19, %s306_s27  ;;  %p312_p5 = scmp.lt.s32.totalorder %s306_s27, %s306_s27 }
   0xd   :  { %p313_p6 = por %p312_p5, %p311_p4 }
   0xf   :  { %p314_p7 = pnand %p313_p6, %p307_p3 }
  0x11   :  { %317 = shalt.err (!%p314_p7)
}
  0x12   :  { %s437_s28 = smov 64   ;;  %s438_s29 = smov 4  }
  0x13   :  { %37 = dma.hbm_to_vmem [thread:$0]  %s567_s1, 256, %s32_s19, [#allocation8], %s437_s28, %s437_s28, %s438_s29  }
  0x14   :  { %s439_s7 = smov [#allocation10]   ;;  %s440_s9 = smov [#allocation4]  }
  0x15   :  { %s54_s8 = sshll.u32 %s439_s7, 4  ;;  %s19_s10 = sshll.u32 %s440_s9, 4  ;;  %s55_s8 = int_to_ptr.vmem [resolvable:$true] %s54_s8  ;;  %s20_s10 = int_to_ptr.vmem [resolvable:$true] %s19_s10 }
  0x16   :  { %s318_s13 = scalar_lea.hbm %s569_s3, 16 }
  0x17   :  { %p319_p8 = scmp.ne.s32.totalorder %s569_s3, %s318_s13  ;;  %p322_p9 = scmp.lt.u32.totalorder %s318_s13, %s569_s3 }
  0x19   :  { %p324_p10 = pnand %p322_p9, %p319_p8 }
  0x1b   :  { %327 = shalt.err (!%p324_p10)
}
  0x1c   :  { %s328_s1 = scalar_lea.vmem %s55_s8, 16  ;;  %s332_s18 = scalar_lea.vmem %s55_s8, 32 }
  0x1d   :  { %p329_p11 = scmp.ne.s32.totalorder %s55_s8, %s328_s1  ;;  %p333_p12 = scmp.lt.s32.totalorder %s55_s8, %s55_s8 }
  0x1e   :  { %p334_p13 = scmp.lt.s32.totalorder %s332_s18, %s328_s1 }
  0x20   :  { %p335_p0 = por %p334_p13, %p333_p12 }
  0x22   :  { %p336_p1 = pnand %p335_p0, %p329_p11 }
  0x24   :  { %339 = shalt.err (!%p336_p1)
}
  0x25   :  { %57 = dma.hbm_to_vmem [thread:$0]  %s569_s3, 16, %s55_s8, [#allocation11]  }
  0x26   :  { %s340_s23 = scalar_lea.hbm %s566_s0, 256 }
  0x27   :  { %p341_p2 = scmp.ne.s32.totalorder %s566_s0, %s340_s23  ;;  %p344_p3 = scmp.lt.u32.totalorder %s340_s23, %s566_s0 }
  0x29   :  { %p346_p4 = pnand %p344_p3, %p341_p2 }
  0x2b   :  { %349 = shalt.err (!%p346_p4)
}
  0x2c   :  { %s350_s30 = scalar_lea.vmem %s20_s10, 256  ;;  %p355_p6 = scmp.lt.s32.totalorder %s20_s10, %s20_s10 }
  0x2d   :  { %p351_p5 = scmp.ne.s32.totalorder %s20_s10, %s350_s30  ;;  %p356_p7 = scmp.lt.s32.totalorder %s350_s30, %s350_s30 }
  0x2f   :  { %p357_p8 = por %p356_p7, %p355_p6 }
  0x31   :  { %p358_p9 = pnand %p357_p8, %p351_p5 }
  0x33   :  { %361 = shalt.err (!%p358_p9)
}
  0x34   :  { %s441_s3 = smov 128   ;;  %s442_s6 = smov 8  }
  0x35   :  { %25 = dma.hbm_to_vmem [thread:$0]  %s566_s0, 256, %s20_s10, [#allocation5], %s441_s3, %s441_s3, %s442_s6  }
  0x36   :  { %s443_s9 = smov [#allocation9]   ;;  %s444_s12 = smov [#allocation12]  }
  0x37   :  { %s44_s11 = sshll.u32 %s443_s9, 4  ;;  %s64_s13 = sshll.u32 %s444_s12, 4  ;;  %s45_s11 = int_to_ptr.vmem [resolvable:$true] %s44_s11  ;;  %s65_s13 = int_to_ptr.vmem [resolvable:$true] %s64_s13 }
  0x38   :  { %s362_s16 = scalar_lea.hbm %s568_s2, 16 }
  0x39   :  { %p363_p10 = scmp.ne.s32.totalorder %s568_s2, %s362_s16  ;;  %p366_p11 = scmp.lt.u32.totalorder %s362_s16, %s568_s2 }
  0x3b   :  { %p368_p12 = pnand %p366_p11, %p363_p10 }
  0x3d   :  { %371 = shalt.err (!%p368_p12)
}
  0x3e   :  { %s372_s0 = scalar_lea.vmem %s45_s11, 16  ;;  %s376_s10 = scalar_lea.vmem %s45_s11, 32 }
  0x3f   :  { %p373_p13 = scmp.ne.s32.totalorder %s45_s11, %s372_s0  ;;  %p377_p0 = scmp.lt.s32.totalorder %s45_s11, %s45_s11 }
  0x40   :  { %p378_p1 = scmp.lt.s32.totalorder %s376_s10, %s372_s0 }
  0x42   :  { %p379_p2 = por %p378_p1, %p377_p0 }
  0x44   :  { %p380_p3 = pnand %p379_p2, %p373_p13 }
  0x46   :  { %383 = shalt.err (!%p380_p3)
}
  0x47   :  { %47 = dma.hbm_to_vmem [thread:$0]  %s568_s2, 16, %s45_s11, [#allocation8]  }
  0x48   :  { %s384_s24 = scalar_lea.hbm %s570_s4, 16 }
  0x49   :  { %p385_p4 = scmp.ne.s32.totalorder %s570_s4, %s384_s24  ;;  %p388_p5 = scmp.lt.u32.totalorder %s384_s24, %s570_s4 }
  0x4b   :  { %p390_p6 = pnand %p388_p5, %p385_p4 }
  0x4d   :  { %393 = shalt.err (!%p390_p6)
}
  0x4e   :  { %s394_s3 = scalar_lea.vmem %s65_s13, 16  ;;  %s398_s6 = scalar_lea.vmem %s65_s13, 32 }
  0x4f   :  { %p395_p7 = scmp.ne.s32.totalorder %s65_s13, %s394_s3  ;;  %p399_p8 = scmp.lt.s32.totalorder %s65_s13, %s65_s13 }
  0x50   :  { %p400_p9 = scmp.lt.s32.totalorder %s398_s6, %s394_s3 }
  0x52   :  { %p401_p10 = por %p400_p9, %p399_p8 }
  0x54   :  { %p402_p11 = pnand %p401_p10, %p395_p7 }
  0x56   :  { %405 = shalt.err (!%p402_p11)
}
  0x57   :  { %67 = dma.hbm_to_vmem [thread:$0]  %s570_s4, 16, %s65_s13, [#allocation11]  }
  0x58   :  { %428 = dma.done.wait [#allocation5], 256  }
  0x59   :  { %429 = vsyncadd [#allocation5], 4294967040 }
  0x5a   :  { %430 = dma.done.wait [#allocation8], 272  }
  0x5b   :  { %431 = vsyncadd [#allocation8], 4294967024 }
  0x5c   :  { %432 = dma.done.wait [#allocation11], 32  }
  0x5d   :  { %433 = vsyncadd [#allocation11], 4294967264  ;;  %vm88_vm0 = vcmask 261120   ;;  %v95_v0 = vld [vmem:[#allocation4] sm:$0xff]  ;;  %v96_v1 = vld [vmem:[#allocation4 + $0x8] sm:$0xff]  ;;  %v445_v15 = vmov 0.0  }
  0x5e   :  { %v98_v2 = vsel %vm88_vm0, %v95_v0, 0.0  ;;  %v101_v3 = vsel %vm88_vm0, %v96_v1, 0.0  ;;  %v290_v14 = vld [vmem:[#allocation7] sm:$0xff]   ;;  %89 = vst.msk [vmem:[#allocation2] sm:$0xff] %vm88_vm0, %v445_v15  ;;  %90 = vst.msk [vmem:[#allocation2 + $0x8] sm:$0xff] %vm88_vm0, %v445_v15  ;;  %270 = vmatprep.subr.bf16.mxu0 %v445_v15  ;;  %v291_v16 = vld [vmem:[#allocation7 + $0x8] sm:$0xff]  }
  0x5f   :  { %99 = vadd.xlane.f32.xlu0 %v98_v2  ;;  %271 = vmatpush3.bf16.msra.mxu0 %v290_v14  ;;  %vm446_vm1 = vmmov 0   ;;  %v257_v25 = vld [vmem:[#allocation9] ss:$0 sm:$0xff]  ;;  %v258_v29 = vld [vmem:[#allocation10] ss:$0 sm:$0xff]  ;;  %vm235_vm2 = vcmask 257024  }
  0x60   :  { %274 = vmatprep.mubr.msk.bf16.mxu0 %vm446_vm1, %v445_v15  ;;  %272 = vmatprep.subr.bf16.mxu0 %v445_v15  ;;  %v262_v43 = vld [vmem:[#allocation12] ss:$0 sm:$0xff]  ;;  %s447_s4 = smov [#allocation13]  }
  0x61   :  { %s243_s8 = sshll.u32 %s447_s4, 4  ;;  %s244_s8 = int_to_ptr.vmem [resolvable:$true] %s243_s8 }
  0x62   :  { %s406_s9 = scalar_lea.vmem %s244_s8, 128  ;;  %p411_p13 = scmp.lt.s32.totalorder %s244_s8, %s244_s8 }
  0x63   :  { %102 = vadd.xlane.f32.xlu0 %v101_v3  ;;  %273 = vmatpush3.bf16.msra.mxu0 %v291_v16  ;;  %p407_p12 = scmp.ne.s32.totalorder %s244_s8, %s406_s9  ;;  %p412_p0 = scmp.lt.s32.totalorder %s406_s9, %s406_s9 }
  0x65   :  { %v146_v35 = vld [vmem:[#allocation2] sm:$0xff]  ;;  %v147_v37 = vld [vmem:[#allocation2 + $0x8] sm:$0xff]  ;;  %p413_p1 = por %p412_p0, %p411_p13 }
  0x67   :  { %p414_p2 = pnand %p413_p1, %p407_p12 }
  0xec   :  { %v100_v4 = vpop.xlane.xlu0 %99 }
  0xed   :  { %v105_v5 = vmul.f32 0.03125, %v100_v4 }
  0xef   :  { %v107_v6 = vsub.f32 %v95_v0, %v105_v5 }
  0xf0   :  { %v103_v7 = vpop.xlane.xlu0 %102 }
  0xf1   :  { %v106_v8 = vmul.f32 0.03125, %v103_v7  ;;  %v109_v9 = vmul.f32 %v107_v6, %v107_v6 }
  0xf3   :  { %v108_v10 = vsub.f32 %v96_v1, %v106_v8  ;;  %v111_v11 = vsel %vm88_vm0, %v109_v9, 0.0 }
  0xf4   :  { %112 = vadd.xlane.f32.xlu1 %v111_v11 }
  0xf5   :  { %v110_v12 = vmul.f32 %v108_v10, %v108_v10 }
  0xf7   :  { %v114_v13 = vsel %vm88_vm0, %v110_v12, 0.0 }
  0xf8   :  { %115 = vadd.xlane.f32.xlu1 %v114_v13 }
 0x181   :  { %v113_v17 = vpop.xlane.xlu1 %112 }
 0x182   :  { %v117_v18 = vmul.f32 0.03125, %v113_v17 }
 0x184   :  { %v119_v19 = vadd.f32 1e-05, %v117_v18 }
 0x185   :  { %v116_v20 = vpop.xlane.xlu1 %115 }
 0x186   :  { %292 = vrsqrt.f32 %v119_v19  ;;  %v118_v21 = vmul.f32 0.03125, %v116_v20 }
 0x188   :  { %v120_v22 = vadd.f32 1e-05, %v118_v21 }
 0x18a   :  { %294 = vrsqrt.f32 %v120_v22 }
 0x190   :  { %v293_v23 = vpop.eup %292 }
 0x191   :  { %v123_v24 = vmul.f32 %v293_v23, %v107_v6 }
 0x193   :  { %v132_v27 = vmul.f32 %v257_v25, %v123_v24 }
 0x194   :  { %v295_v26 = vpop.eup %294 }
 0x195   :  { %v124_v28 = vmul.f32 %v295_v26, %v108_v10  ;;  %v141_v31 = vadd.f32 %v258_v29, %v132_v27 }
 0x197   :  { %v133_v30 = vmul.f32 %v257_v25, %v124_v28 }
 0x199   :  { %v142_v32 = vadd.f32 %v258_v29, %v133_v30 }
 0x19b   :  { %v143_v33 = vpack.c.bf16 %v142_v32, %v141_v31 }
 0x19d   :  { %144 = vst.msk [vmem:[#allocation3] sm:$0xff] %vm88_vm0, %v143_v33 }
 0x1a4   :  { %v145_v34 = vld [vmem:[#allocation3] sm:$0xff] }
 0x1a5   :  { %275 = vmatmul.mubr.msk.bf16.vlgmr.msra.gmra.mrb[0].mxu0 %vm88_vm0, %v145_v34 }
 0x278   :  { %v202_v36 = vpop.f32.mrb[0].mxu0 }
 0x279   :  { %v209_v38 = vadd.f32 %v202_v36, %v146_v35  ;;  %v276_v39 = vpop.f32.mrb[1].mxu0 }
 0x27a   :  { %v205_v40 = vpop.f32.mrb[2].mxu0 }
 0x27b   :  { %211 = vst.msk [vmem:[#allocation2] sm:$0xff] %vm88_vm0, %v209_v38  ;;  %v210_v41 = vadd.f32 %v205_v40, %v147_v37  ;;  %v277_v42 = vpop.f32.mrb[3].mxu0 }
 0x27d   :  { %212 = vst.msk [vmem:[#allocation2 + $0x8] sm:$0xff] %vm88_vm0, %v210_v41 }
 0x282   :  { %v216_v44 = vld [vmem:[#allocation2] sm:$0xff] }
 0x283   :  { %v225_v45 = vadd.f32 %v262_v43, %v216_v44 }
 0x284   :  { %v217_v46 = vld [vmem:[#allocation2 + $0x8] sm:$0xff] }
 0x285   :  { %v226_v47 = vadd.f32 %v262_v43, %v217_v46  ;;  %v265_v48 = vpack.c.bf16 %v225_v45, %v225_v45 }
 0x287   :  { %v266_v49 = vpack.c.bf16 %v226_v47, %v226_v47  ;;  %236 = vst.msk [vmem:[#allocation13] sm:$0xf] %vm235_vm2, %v265_v48 }
 0x289   :  { %237 = vst.msk [vmem:[#allocation13 + $0x4] sm:$0xf] %vm235_vm2, %v266_v49 }
 0x28a   :  { %417 = shalt.err (!%p414_p2)
}
 0x28b   :  { %s418_s13 = scalar_lea.hbm %s571_s5, 128 }
 0x28c   :  { %p419_p3 = scmp.ne.s32.totalorder %s571_s5, %s418_s13  ;;  %p422_p4 = scmp.lt.u32.totalorder %s418_s13, %s571_s5 }
 0x28e   :  { %p424_p5 = pnand %p422_p4, %p419_p3 }
 0x290   :  { %427 = shalt.err (!%p424_p5)
}
 0x291   :  { %249 = dma.vmem_to_hbm [thread:$0]  %s244_s8, 128, %s571_s5, [#allocation6], %s437_s28, %s437_s28, %s438_s29  }
 0x292   :  { %434 = dma.done.wait [#allocation6], 128  }
 0x293   :  { %435 = vsyncadd [#allocation6], 4294967168 }
 0x294   :  { %253 = vsyncpa [#allocation5], 1 }
 0x295   :  { %254 = vsyncpa [#allocation8], 1 }
 0x296   :  { %255 = vsyncpa [#allocation11], 1 }
 0x297   :  { %256 = vsyncpa [#allocation6], 1 }

// kernel: text_decoder_forward.28
= control target key start
LH: loop header
LB: loop body
LE: loop exit
PB: predicated region body
PF: predicated region fallthrough
CT: control target
= control target key end

     0   :  { %s1977_s0 = inlined_call_operand.hbm [shape: bf16[16,32], index: 0, kind: input, shape index: {}]   ;;  %s1978_s1 = inlined_call_operand.hbm [shape: bf16[16,32], index: 1, kind: input, shape index: {}]   ;;  %s1979_s2 = inlined_call_operand.hbm [shape: bf16[16,32], index: 2, kind: input, shape index: {}]   ;;  %s1980_s3 = inlined_call_operand.hbm [shape: bf16[16,32], index: 3, kind: output, shape index: {}]  }
   0x1   :  { %1986 = sst [smem:[#allocation18_spill]] %s1978_s1 }
   0x2   :  { %8 = vsyncpa [#allocation6], 0 }
   0x3   :  { %10 = vsyncpa [#allocation6 + $0x1], 0 }
   0x4   :  { %11 = vsyncpa [#allocation9], 0 }
   0x5   :  { %13 = vsyncpa [#allocation9 + $0x1], 0 }
   0x6   :  { %14 = vsyncpa [#allocation7], 0 }
   0x7   :  { %16 = vsyncpa [#allocation7 + $0x1], 0  ;;  %s1548_s12 = smov 0   ;;  %s1550_s13 = smov 0  }
   0x8   :  { %s1552_s14 = smov 0   ;;  %s1554_s15 = smov 0  }
   0x9   :  { %s1556_s16 = smov 0   ;;  %s1558_s17 = smov 0  }
   0xa LB: > { %1987 = sst [smem:[#allocation15_spill]] %s1508_s16  ;;  %s1579_s18 = sadd.s32 4294967295, %s1512_s17   ;;  %s1512_s17 = sphi %s1558_s17, %s22_s17   ;;  %s1508_s16 = sphi %s1556_s16, %s2008_s16   ;;  %s1504_s15 = sphi %s1554_s15, %s2007_s15   ;;  %s1500_s14 = sphi %s1552_s14, %s2011_s14   ;;  %s1496_s13 = sphi %s1550_s13, %s2010_s13   ;;  %s1492_s12 = sphi %s1548_s12, %s2009_s12  }
   0xb   : > { %s1114_s19 = sadd.s32 4294967294, %s1512_s17   ;;  %s41_s20 = sadd.s32 1, %s1508_s16 }
   0xc   : > { %s50_s21 = sadd.s32 1, %s1500_s14  ;;  %p43_p0 = scmp.ge.s32.totalorder %s41_s20, 2 }
   0xd   : > { %p57_p1 = scmp.ne.s32.totalorder %s1500_s14, %s1496_s13  ;;  %p58_p2 = scmp.eq.s32.totalorder %s1512_s17, 0 }
   0xe   : > { %p63_p3 = scmp.ne.s32.totalorder %s1496_s13, %s1492_s12  ;;  %s2013_s20 = smov (%p43_p0, %s41_s20), 0 }
   0xf   : > { %1988 = sst [smem:[#allocation16_spill]] %s2013_s20  ;;  %p1591_p4 = por %p58_p2, %p57_p1 }
  0x10   : > { %p64_p5 = scmp.eq.s32.totalorder %s1579_s18, 0  ;;  %s45_s23 = ssub.s32 %s1508_s16, %s2013_s20 }
  0x11   : > { %p149_p6 = scmp.eq.s32.totalorder %s1579_s18, 1  ;;  %p48_p7 = scmp.eq.s32.totalorder %s45_s23, 0 }
  0x12   : > { %p1599_p8 = por %p64_p5, %p63_p3  ;;  %p155_p10 = scmp.eq.s32.totalorder %s1114_s19, 1 }
  0x13   : > { %p1603_p9 = por %p149_p6, %p57_p1  ;;  %p1241_p13 = scmp.lt.s32.totalorder %s1512_s17, 2 }
  0x14   : > { %s1990_s24 = scalar_select %p1599_p8, 1, 0 }
  0x15   : > { %s1991_s25 = scalar_select %p1603_p9, 1, 0 }
  0x16   : > { %s1608_s26 = scalar_select %p48_p7, %s1500_s14, %s50_s21  }
  0x17   : > { %p1610_p11 = por %p155_p10, %p63_p3  ;;  %s175_s28 = sand.u32 1, %s1500_s14  }
  0x18   : > { %1992 = sst [smem:[#allocation17_spill]] %s1608_s26  ;;  %s1619_s29 = sshll.u32 %s175_s28, 2 }
  0x19   : > { %s1993_s27 = scalar_select %p1610_p11, 1, 0 }
  0x1a   : > { %s1622_s30 = sshll.u32 %s1508_s16, 6  ;;  %p1626_p0 = pnand %p1241_p13, %p1591_p4 }
  0x1b   : > { %s194_s5 = sand.u32 1, %s1512_s17   ;;  %s1995_s1 = sld [smem:[#allocation18_spill]] }
  0x1c   : > { %s1994_s4 = scalar_select %p1626_p0, 1, 0 }
  0x1d   : > { %s198_s9 = scalar_lea.vmem [#allocation8], %s1619_s29  ;;  %s1642_s11 = scalar_lea.sflag [#allocation9], %s194_s5 }
  0x1e   : > { %s207_s10 = sshll.u32 %s198_s9, 4  ;;  %p1648_p4 = pneg %p1626_p0  ;;  %s1639_s10 = int_to_ptr.vmem [resolvable:$true] %s207_s10 }
  0x21   : > { %s1635_s8 = scalar_lea.hbm %s1995_s1, %s1622_s30  ;;  %s1341_s6 = scalar_lea.hbm %s1995_s1, 128 }
  0x22   : > { %s1336_s19 = scalar_lea.hbm %s1635_s8, 64  ;;  %p1342_p7 = scmp.lt.u32.totalorder %s1635_s8, %s1995_s1 }
  0x23   : > { %p1337_p3 = scmp.ne.s32.totalorder %s1635_s8, %s1336_s19  ;;  %p1343_p10 = scmp.lt.u32.totalorder %s1341_s6, %s1336_s19 }
  0x24   : > { %p1345_p12 = scmp.lt.u32.totalorder %s1336_s19, %s1635_s8 }
  0x25   : > { %p1339_p5 = pnand %p1648_p4, %p1337_p3  ;;  %p1344_p13 = por %p1343_p10, %p1342_p7 }
  0x27   : > { %p1340_p6 = pneg %p1339_p5  ;;  %p1346_p1 = por %p1345_p12, %p1344_p13 }
  0x29   : > { %p1347_p2 = pnand %p1346_p1, %p1340_p6 }
  0x2b   : > { %1350 = shalt.err (!%p1347_p2)
}
  0x2c   : > { %s1351_s5 = scalar_lea.vmem %s1639_s10, 64  ;;  %s1514_s22 = smov [#allocation8]  }
  0x2d   : > { %p1352_p3 = scmp.ne.s32.totalorder %s1639_s10, %s1351_s5  ;;  %s1356_s23 = sshll.u32 %s1514_s22, 4  ;;  %s1357_s23 = int_to_ptr.vmem [resolvable:$false] %s1356_s23 }
  0x2e   : > { %s1358_s7 = scalar_lea.vmem %s1357_s23, 128  ;;  %p1359_p9 = scmp.lt.s32.totalorder %s1639_s10, %s1357_s23 }
  0x2f   : > { %p1354_p5 = pnand %p1352_p3, %p1648_p4  ;;  %p1360_p8 = scmp.lt.s32.totalorder %s1358_s7, %s1351_s5 }
  0x31   : > { %p1355_p11 = pneg %p1354_p5  ;;  %p1361_p7 = por %p1360_p8, %p1359_p9 }
  0x33   : > { %p1362_p10 = pnand %p1361_p7, %p1355_p11 }
  0x35   : > { %1365 = shalt.err (!%p1362_p10)
}
  0x36   : > { %1233 = dma.hbm_to_vmem [thread:$0]  (!%p1626_p0), %s1635_s8, 64, %s1639_s10, %s1642_s11  }
  0x37   : > { %p1997_p12 = scmp.lt.s32.totalorder %s1512_s17, 3  ;;  %p1998_p1 = scmp.ge.s32.totalorder %s1512_s17, 1 }
  0x38   : > { %s1684_s5 = scalar_lea.hbm %s1977_s0, %s1622_s30  ;;  %s179_s22 = scalar_lea.vmem [#allocation5], %s1619_s29 }
  0x39   : > { %p1676_p2 = pnand %p1998_p1, %p1997_p12  ;;  %s187_s23 = sshll.u32 %s179_s22, 4  ;;  %s1687_s23 = int_to_ptr.vmem [resolvable:$true] %s187_s23 }
  0x3a   : > { %s1693_s7 = scalar_lea.hbm %s1979_s2, %s1622_s30  ;;  %s176_s1 = scalar_lea.sflag [#allocation6], %s175_s28 }
  0x3b   : > { %s1999_s19 = scalar_select %p1676_p2, 1, 0 }
  0x3c   : > { %s1366_s20 = scalar_lea.hbm %s1684_s5, 64  ;;  %s1371_s16 = scalar_lea.hbm %s1977_s0, 128 }
  0x3d   : > { %p1367_p8 = scmp.ne.s32.totalorder %s1684_s5, %s1366_s20  ;;  %p1372_p6 = scmp.lt.u32.totalorder %s1684_s5, %s1977_s0 }
  0x3e   : > { %p1373_p13 = scmp.lt.u32.totalorder %s1371_s16, %s1366_s20  ;;  %p1375_p5 = scmp.lt.u32.totalorder %s1366_s20, %s1684_s5 }
  0x3f   : > { %p1369_p9 = pnand %p1367_p8, %p1648_p4 }
  0x40   : > { %p1374_p3 = por %p1373_p13, %p1372_p6 }
  0x41   : > { %p1370_p11 = pneg %p1369_p9 }
  0x42   : > { %p1376_p7 = por %p1375_p5, %p1374_p3 }
  0x44   : > { %p1377_p10 = pnand %p1376_p7, %p1370_p11 }
  0x46   : > { %1380 = shalt.err (!%p1377_p10)
}
  0x47   : > { %s1381_s28 = scalar_lea.vmem %s1687_s23, 64  ;;  %s1515_s30 = smov [#allocation5]  }
  0x48   : > { %p1382_p12 = scmp.ne.s32.totalorder %s1687_s23, %s1381_s28  ;;  %s1386_s8 = sshll.u32 %s1515_s30, 4  ;;  %s1387_s8 = int_to_ptr.vmem [resolvable:$false] %s1386_s8 }
  0x49   : > { %s1388_s26 = scalar_lea.vmem %s1387_s8, 128  ;;  %p1389_p9 = scmp.lt.s32.totalorder %s1687_s23, %s1387_s8 }
  0x4a   : > { %p1384_p1 = pnand %p1382_p12, %p1648_p4  ;;  %p1390_p2 = scmp.lt.s32.totalorder %s1388_s26, %s1381_s28 }
  0x4c   : > { %p1385_p8 = pneg %p1384_p1  ;;  %p1391_p6 = por %p1390_p2, %p1389_p9 }
  0x4e   : > { %p1392_p13 = pnand %p1391_p6, %p1385_p8 }
  0x50   : > { %1395 = shalt.err (!%p1392_p13)
}
  0x51   : > { %1230 = dma.hbm_to_vmem [thread:$0]  (!%p1626_p0), %s1684_s5, 64, %s1687_s23, %s176_s1  }
  0x52   : > { %s218_s16 = scalar_lea.vmem [#allocation10], %s1619_s29  ;;  %s1396_s10 = scalar_lea.hbm %s1693_s7, 64 }
  0x53   : > { %s227_s20 = sshll.u32 %s218_s16, 4  ;;  %p1397_p11 = scmp.ne.s32.totalorder %s1693_s7, %s1396_s10  ;;  %s228_s20 = int_to_ptr.vmem [resolvable:$true] %s227_s20 }
  0x54   : > { %s1401_s22 = scalar_lea.hbm %s1979_s2, 128  ;;  %p1402_p5 = scmp.lt.u32.totalorder %s1693_s7, %s1979_s2 }
  0x55   : > { %p1399_p2 = pnand %p1397_p11, %p1648_p4  ;;  %p1403_p7 = scmp.lt.u32.totalorder %s1401_s22, %s1396_s10 }
  0x56   : > { %p1405_p12 = scmp.lt.u32.totalorder %s1396_s10, %s1693_s7 }
  0x57   : > { %p1400_p3 = pneg %p1399_p2  ;;  %p1404_p10 = por %p1403_p7, %p1402_p5 }
  0x59   : > { %p1406_p1 = por %p1405_p12, %p1404_p10 }
  0x5b   : > { %p1407_p8 = pnand %p1406_p1, %p1400_p3 }
  0x5d   : > { %1410 = shalt.err (!%p1407_p8)
}
  0x5e   : > { %s1411_s1 = scalar_lea.vmem %s228_s20, 64  ;;  %s1516_s29 = smov [#allocation10]  }
  0x5f   : > { %p1412_p9 = scmp.ne.s32.totalorder %s228_s20, %s1411_s1  ;;  %s1416_s5 = sshll.u32 %s1516_s29, 4  ;;  %s1417_s5 = int_to_ptr.vmem [resolvable:$false] %s1416_s5 }
  0x60   : > { %s1418_s23 = scalar_lea.vmem %s1417_s5, 128  ;;  %p1419_p11 = scmp.lt.s32.totalorder %s228_s20, %s1417_s5 }
  0x61   : > { %p1414_p6 = pnand %p1412_p9, %p1648_p4  ;;  %p1420_p2 = scmp.lt.s32.totalorder %s1418_s23, %s1411_s1 }
  0x63   : > { %p1415_p13 = pneg %p1414_p6  ;;  %p1421_p0 = por %p1420_p2, %p1419_p11 }
  0x65   : > { %p1422_p5 = pnand %p1421_p0, %p1415_p13 }
  0x67   : > { %1425 = shalt.err (!%p1422_p5)
}
  0x68   : > { %p2000_p7 = scmp.ne.s32.totalorder %s1994_s4, 0  ;;  %p2001_p3 = scmp.ne.s32.totalorder %s1999_s19, 0 }
  0x69   : > { %s1740_s21 = sand.u32 (!%p2001_p3), 1, %s1496_s13   ;;  %p2002_p0 = scmp.ne.s32.totalorder (!%p2001_p3), %s1990_s24, 0 }
  0x6a   : > { %1236 = dma.hbm_to_vmem [thread:$0]  (!%p2000_p7), %s1693_s7, 64, %s228_s20, %s1642_s11  }
  0x6b   : > { %236 = sbr.rel (%p2001_p3) target bundleno = 1581 (0x62d), region = 32  ;;  %s1743_s8 = sshll.u32 (!%p2001_p3), %s1740_s21, 2 }
  0x6c   : > { %s239_s26 = scalar_lea.sflag (!%p2001_p3), [#allocation6], %s1740_s21  ;;  %s1747_s16 = scalar_lea.vmem (!%p2001_p3), [#allocation5], %s1743_s8 }
  0x72   : > { %1479 = dma.done.wait (%p2002_p0), %s239_s26, 64  }
  0x73   : > { %1481 = vsyncadd (%p2002_p0), %s239_s26, 4294967232  ;;  %s247_s4 = sand.u32 1, %s1579_s18   ;;  %s1755_s19 = scalar_lea.vmem [#allocation8], %s1743_s8 }
  0x74   : > { %s248_s11 = scalar_lea.sflag [#allocation9], %s247_s4 }
  0x75   : > { %1483 = dma.done.wait (%p2002_p0), %s248_s11, 128  }
  0x76   : > { %1485 = vsyncadd (%p2002_p0), %s248_s11, 4294967168  ;;  %vm309_vm0 = vcmask 64512   ;;  %v1517_v0 = vmov 0.0   ;;  %vm1518_vm1 = vmmov 0   ;;  %v323_v1 = vld [vmem:[%s1755_s19] sm:$0xf]  ;;  %v314_v5 = vlaneseq }
  0x77   : > { %1171 = vmatprep.subr.bf16.mxu0 %v1517_v0  ;;  %310 = vst.msk [vmem:[#allocation4] sm:$0xff] %vm309_vm0, %v1517_v0  ;;  %311 = vst.msk [vmem:[#allocation4 + $0x8] sm:$0xff] %vm309_vm0, %v1517_v0  ;;  %1173 = vmatprep.mubr.msk.bf16.mxu0 %vm1518_vm1, %v1517_v0  ;;  %v330_v2 = vsel %vm309_vm0, %v323_v1, 0  ;;  %v322_v3 = vld [vmem:[%s1747_s16] sm:$0xf]  ;;  %vm300_vm2 = vcmask 7168  }
  0x78   : > { %312 = vst.msk [vmem:[#allocation4 + $0x10] sm:$0xff] %vm309_vm0, %v1517_v0  ;;  %313 = vst.msk [vmem:[#allocation4 + $0x18] sm:$0xff] %vm309_vm0, %v1517_v0  ;;  %1177 = vmatprep.subr.bf16.mxu1 %v1517_v0  ;;  %1179 = vmatprep.mubr.msk.bf16.mxu1 %vm1518_vm1, %v1517_v0  ;;  %v1519_v4 = vmov -1e+30   ;;  %v1794_v6 = vand.u32 127, %v314_v5  ;;  %v1796_v7 = vshrl.u32 %v314_v5, 7 }
  0x79   : > { %1172 = vmatpush3.bf16.xpose.msra.mxu0 %v330_v2  ;;  %301 = vst.msk [vmem:[#allocation2] sm:$0xff] %vm300_vm2, %v1519_v4  ;;  %302 = vst.msk [vmem:[#allocation2 + $0x8] sm:$0xff] %vm300_vm2, %v1519_v4  ;;  %v1520_v14 = vmov 0   ;;  %v1303_v15 = vld [vmem:[%s1755_s19] ss:$0 sps:$4 sm:$0xff]   ;;  %s1521_s18 = smov 120  }
  0x7a   : > { %1189 = vmatprep.subr.bf16.mxu0 %v1517_v0  ;;  %303 = vst.msk [vmem:[#allocation2 + $0x10] sm:$0xff] %vm300_vm2, %v1519_v4  ;;  %304 = vst.msk [vmem:[#allocation2 + $0x18] sm:$0xff] %vm300_vm2, %v1519_v4  ;;  %vm321_vm3 = vcmp.le.s32.totalorder %v1794_v6, %v1796_v7  ;;  %1301 = vset.pattern.permute.xlu0 %v1520_v14  ;;  %v1304_v16 = vld [vmem:[%s1747_s16] ss:$0 sps:$4 sm:$0xff]   ;;  %v1305_v17 = vld [vmem:[%s1755_s19] ss:$0 sps:$4 sm:$0xff]  }
  0x7b   : > { %305 = vst.msk [vmem:[#allocation3] sm:$0xff] %vm300_vm2, %v1517_v0  ;;  %306 = vst.msk [vmem:[#allocation3 + $0x8] sm:$0xff] %vm300_vm2, %v1517_v0  ;;  %1302 = vset.pattern.permute.xlu1 %v1520_v14  ;;  %s1522_s24 = smov 112   ;;  %v1306_v18 = vld [vmem:[%s1747_s16] ss:$0 sps:$4 sm:$0xff]   ;;  %s1523_s7 = smov 104  }
  0x7c   : > { %307 = vst.msk [vmem:[#allocation3 + $0x10] sm:$0xff] %vm300_vm2, %v1517_v0  ;;  %308 = vst.msk [vmem:[#allocation3 + $0x18] sm:$0xff] %vm300_vm2, %v1517_v0  ;;  %466 = vrot.lane.b32.xlu1 %v1303_v15, %s1521_s18  ;;  %v1307_v19 = vld [vmem:[%s1755_s19] ss:$0 sps:$4 sm:$0xff]   ;;  %v1308_v20 = vld [vmem:[%s1747_s16] ss:$0 sps:$4 sm:$0xff]  }
  0x7d   : > { %vm408_vm4 = vcmask 1043456   ;;  %s1827_s20 = scalar_lea.vmem [#allocation10], %s1743_s8  ;;  %vm912_vm5 = vcmask 60416   ;;  %s1914_s10 = scalar_lea.vmem [#allocation11], %s1743_s8  ;;  %vm930_vm6 = vcmask 126016   ;;  %vm948_vm7 = vcmask 191616  }
  0x7e   : > { %v324_v25 = vld [vmem:[%s1827_s20] sm:$0xf]  ;;  %s1524_s6 = smov 8   ;;  %s1525_s9 = smov 16   ;;  %vm966_vm8 = vcmask 257216  }
  0x7f   : > { %v410_v26 = vsel %vm408_vm4, %v324_v25, 0  ;;  %v1311_v14 = vld [vmem:[%s1827_s20] ss:$0 sps:$4 sm:$0xff]   ;;  %s1526_s22 = smov 24   ;;  %s1149_s28 = sshll.u32 %s1504_s15, 6 }
  0x80   : > { %1174 = vmatmul.mubr.msk.bf16.vlgmr.msra.gmra.mrb[0].mxu0 %vm309_vm0, %v322_v3  ;;  %461 = vrot.lane.b32.xlu1 %v1304_v16, %s1521_s18  ;;  %v1816_v21 = vld [vmem:[#allocation2] sm:$0xff]  ;;  %v1865_v63 = vld [vmem:[#allocation2 + $0x8] sm:$0xff]  ;;  %s983_s30 = sshll.u32 %s1914_s10, 4  ;;  %s1927_s5 = scalar_lea.hbm %s1980_s3, %s1149_s28  ;;  %s1929_s30 = int_to_ptr.vmem [resolvable:$true] %s983_s30 }
  0x81   : > { %1191 = vmatprep.mubr.msk.bf16.mxu0 %vm1518_vm1, %v1517_v0  ;;  %1178 = vmatpush3.bf16.msra.mxu1 %v410_v26  ;;  %v1875_v4 = vld [vmem:[#allocation2 + $0x10] sm:$0xff]  ;;  %s969_s23 = scalar_lea.sflag [#allocation7], %s1740_s21  ;;  %s1426_s8 = scalar_lea.vmem %s1929_s30, 64 }
  0x82   : > { %1183 = vmatprep.subr.bf16.mxu1 %v1517_v0  ;;  %p1427_p4 = scmp.ne.s32.totalorder %s1929_s30, %s1426_s8  ;;  %p2003_p10 = scmp.ne.s32.totalorder %s1991_s25, 0 }
  0x83   : > { %s1527_s15 = smov [#allocation11]  }
  0x84   : > { %614 = vrot.lane.b32.xlu1 %v1305_v17, %s1522_s24  ;;  %p1428_p12 = pnand %p1427_p4, %p2003_p10  ;;  %s1430_s26 = sshll.u32 %s1527_s15, 4  ;;  %s1431_s26 = int_to_ptr.vmem [resolvable:$false] %s1430_s26 }
  0x85   : > { %s1432_s16 = scalar_lea.vmem %s1431_s26, 128  ;;  %p1433_p8 = scmp.lt.s32.totalorder %s1929_s30, %s1431_s26 }
  0x86   : > { %p1429_p1 = pneg %p1428_p12  ;;  %p1434_p9 = scmp.lt.s32.totalorder %s1432_s16, %s1426_s8 }
  0x88   : > { %609 = vrot.lane.b32.xlu1 %v1306_v18, %s1522_s24  ;;  %p1435_p6 = por %p1434_p9, %p1433_p8 }
  0x8a   : > { %p1436_p13 = pnand %p1435_p6, %p1429_p1 }
  0x8c   : > { %762 = vrot.lane.b32.xlu1 %v1307_v19, %s1523_s7 }
  0x90   : > { %757 = vrot.lane.b32.xlu1 %v1308_v20, %s1523_s7 }
  0xee   : > { %v467_v30 = vpop.permute.xlu1 %466 }
  0xef   : > { %v472_v33 = vsel %vm309_vm0, %v467_v30, 0 }
  0xf2   : > { %v462_v31 = vpop.permute.xlu1 %461 }
  0xf6   : > { %v615_v35 = vpop.permute.xlu1 %614 }
  0xf7   : > { %v620_v37 = vsel %vm309_vm0, %v615_v35, 0 }
  0xfa   : > { %v610_v36 = vpop.permute.xlu1 %609 }
  0xfe   : > { %v763_v38 = vpop.permute.xlu1 %762 }
  0xff   : > { %v768_v39 = vsel %vm309_vm0, %v763_v38, 0 }
 0x102   : > { %v758_v40 = vpop.permute.xlu1 %757 }
 0x153   : > { %v366_v8 = vpop.f32.mrb[0].mxu0 }
 0x154   : > { %v372_v9 = vsel %vm321_vm3, %v366_v8, -1e+30  ;;  %v1175_v10 = vpop.f32.mrb[1].mxu0  ;;  %v812_v8 = vld [vmem:[#allocation2 + $0x18] sm:$0xff] }
 0x155   : > { %v369_v11 = vpop.f32.mrb[2].mxu0  ;;  %v374_v12 = vsel %vm309_vm0, %v372_v9, -inf }
 0x156   : > { %375 = vmax.xlane.f32.xlu0 %v374_v12  ;;  %v1176_v13 = vpop.f32.mrb[3].mxu0  ;;  %v1309_v12 = vld [vmem:[%s1827_s20] ss:$0 sps:$4 sm:$0xff]  }
 0x157   : > { %v1310_v13 = vld [vmem:[%s1827_s20] ss:$0 sps:$4 sm:$0xff]  }
 0x1e3   : > { %v376_v22 = vpop.xlane.xlu0 %375 }
 0x1e4   : > { %v1819_v23 = vmax.f32 %v1816_v21, %v376_v22 }
 0x1e6   : > { %v378_v24 = vsub.f32 %v1816_v21, %v1819_v23  ;;  %454 = vst.msk [vmem:[#allocation2] sm:$0xff] %vm300_vm2, %v1819_v23  ;;  %383 = vperm.xlu0 %1301, %v1819_v23  }
 0x265   : > { %v384_v27 = vpop.permute.xlu0 %383 }
 0x266   : > { %v386_v28 = vsub.f32 %v372_v9, %v384_v27 }
 0x268   : > { %v387_v29 = vmul.f32 1.442695, %v386_v28 }
 0x26a   : > { %1312 = vpow2.f32 %v387_v29 }
 0x274   : > { %v1832_v32 = vpop.eup %1312 }
 0x275   : > { %v404_v34 = vpack.c.bf16 %v1832_v32, %v1832_v32  ;;  %v391_v15 = vsel %vm309_vm0, %v1832_v32, 0.0 }
 0x277   : > { %1180 = vmatmul.mubr.msk.bf16.vlgmr.msra.gmra.mrb[0].mxu1 %vm309_vm0, %v404_v34 }
 0x278   : > { %1184 = vmatpush3.bf16.xpose.msra.mxu1 %v472_v33  ;;  %1185 = vmatprep.mubr.msk.bf16.mxu1 %vm1518_vm1, %v1517_v0 }
 0x279   : > { %1195 = vmatprep.subr.bf16.mxu1 %v1517_v0 }
 0x27f   : > { %1186 = vmatmul.mubr.msk.bf16.vlgmr.msra.gmra.mrb[4].mxu1 %vm309_vm0, %v462_v31 }
 0x280   : > { %1196 = vmatpush3.bf16.xpose.msra.mxu1 %v620_v37  ;;  %1197 = vmatprep.mubr.msk.bf16.mxu1 %vm1518_vm1, %v1517_v0 }
 0x281   : > { %1207 = vmatprep.subr.bf16.mxu1 %v1517_v0 }
 0x287   : > { %1198 = vmatmul.mubr.msk.bf16.vlgmr.msra.gmra.mrb[8].mxu1 %vm309_vm0, %v610_v36 }
 0x288   : > { %1208 = vmatpush3.bf16.xpose.msra.mxu1 %v768_v39  ;;  %1209 = vmatprep.mubr.msk.bf16.mxu1 %vm1518_vm1, %v1517_v0 }
 0x28f   : > { %1210 = vmatmul.mubr.msk.bf16.vlgmr.msra.gmra.mrb[12].mxu1 %vm309_vm0, %v758_v40 }
 0x34a   : > { %v1851_v41 = vpop.f32.mrb[0].mxu1 }
 0x34b   : > { %v1181_v42 = vpop.f32.mrb[1].mxu1 }
 0x34c   : > { %v449_v43 = vpop.f32.mrb[2].mxu1  ;;  %v379_v42 = vmul.f32 1.442695, %v378_v24 }
 0x34d   : > { %v1182_v44 = vpop.f32.mrb[3].mxu1 }
 0x352   : > { %v508_v45 = vpop.f32.mrb[4].mxu1 }
 0x353   : > { %v514_v46 = vsel %vm321_vm3, %v508_v45, -1e+30  ;;  %v1187_v47 = vpop.f32.mrb[5].mxu1 }
 0x354   : > { %v511_v48 = vpop.f32.mrb[6].mxu1  ;;  %v517_v49 = vsel %vm309_vm0, %v514_v46, -inf }
 0x355   : > { %518 = vmax.xlane.f32.xlu1 %v517_v49  ;;  %v1188_v50 = vpop.f32.mrb[7].mxu1  ;;  %v389_v49 = vld [vmem:[#allocation3] sm:$0xff] }
 0x35a   : > { %v656_v51 = vpop.f32.mrb[8].mxu1 }
 0x35b   : > { %v662_v52 = vsel %vm321_vm3, %v656_v51, -1e+30  ;;  %v1199_v53 = vpop.f32.mrb[9].mxu1 }
 0x35c   : > { %v659_v54 = vpop.f32.mrb[10].mxu1  ;;  %v665_v55 = vsel %vm309_vm0, %v662_v52, -inf }
 0x35d   : > { %666 = vmax.xlane.f32.xlu0 %v665_v55  ;;  %v1200_v56 = vpop.f32.mrb[11].mxu1  ;;  %v533_v54 = vld [vmem:[#allocation3 + $0x8] sm:$0xff] }
 0x362   : > { %v804_v57 = vpop.f32.mrb[12].mxu1 }
 0x363   : > { %v810_v58 = vsel %vm321_vm3, %v804_v57, -1e+30  ;;  %v1211_v59 = vpop.f32.mrb[13].mxu1 }
 0x364   : > { %v807_v60 = vpop.f32.mrb[14].mxu1  ;;  %v813_v61 = vsel %vm309_vm0, %v810_v58, -inf }
 0x365   : > { %814 = vmax.xlane.f32.xlu1 %v813_v61  ;;  %v1212_v62 = vpop.f32.mrb[15].mxu1 }
 0x3e2   : > { %v519_v1 = vpop.xlane.xlu1 %518 }
 0x3e3   : > { %v1868_v2 = vmax.f32 %v1865_v63, %v519_v1  ;;  %v397_v1 = vld [vmem:[#allocation4] sm:$0xff] }
 0x3e5   : > { %v521_v3 = vsub.f32 %v1865_v63, %v1868_v2  ;;  %602 = vst.msk [vmem:[#allocation2 + $0x8] sm:$0xff] %vm300_vm2, %v1868_v2  ;;  %526 = vperm.xlu1 %1302, %v1868_v2   ;;  %v829_v63 = vld [vmem:[#allocation3 + $0x18] sm:$0xff] }
 0x3e7   : > { %v522_v44 = vmul.f32 1.442695, %v521_v3 }
 0x3ea   : > { %v667_v5 = vpop.xlane.xlu0 %666 }
 0x3eb   : > { %v668_v6 = vmax.f32 %v1875_v4, %v667_v5 }
 0x3ed   : > { %v669_v7 = vsub.f32 %v1875_v4, %v668_v6  ;;  %750 = vst.msk [vmem:[#allocation2 + $0x10] sm:$0xff] %vm300_vm2, %v668_v6  ;;  %674 = vperm.xlu0 %1301, %v668_v6  }
 0x3f2   : > { %v815_v9 = vpop.xlane.xlu1 %814 }
 0x3f3   : > { %v816_v10 = vmax.f32 %v812_v8, %v815_v9 }
 0x3f5   : > { %v817_v11 = vsub.f32 %v812_v8, %v816_v10  ;;  %898 = vst.msk [vmem:[#allocation2 + $0x18] sm:$0xff] %vm300_vm2, %v816_v10  ;;  %822 = vperm.xlu1 %1302, %v816_v10  }
 0x3f7   : > { %v818_v45 = vmul.f32 1.442695, %v817_v11 }
 0x3f9   : > { %552 = vrot.lane.b32.xlu1 %v1309_v12, %s1521_s18 }
 0x3fd   : > { %700 = vrot.lane.b32.xlu1 %v1310_v13, %s1522_s24 }
 0x401   : > { %848 = vrot.lane.b32.xlu1 %v1311_v14, %s1523_s7 }
 0x425   : > { %392 = vadd.xlane.f32.xlu1 %v391_v15 }
 0x464   : > { %v527_v16 = vpop.permute.xlu1 %526 }
 0x465   : > { %v529_v17 = vsub.f32 %v514_v46, %v527_v16  ;;  %v670_v46 = vmul.f32 1.442695, %v669_v7 }
 0x467   : > { %v530_v18 = vmul.f32 1.442695, %v529_v17 }
 0x469   : > { %1314 = vpow2.f32 %v530_v18 }
 0x46c   : > { %v675_v19 = vpop.permute.xlu0 %674 }
 0x46d   : > { %v677_v20 = vsub.f32 %v662_v52, %v675_v19 }
 0x46f   : > { %v678_v22 = vmul.f32 1.442695, %v677_v20 }
 0x471   : > { %1316 = vpow2.f32 %v678_v22 }
 0x473   : > { %v1315_v25 = vpop.eup %1314 }
 0x474   : > { %v823_v26 = vpop.permute.xlu1 %822  ;;  %v535_v27 = vsel %vm309_vm0, %v1315_v25, 0.0  ;;  %v548_v33 = vpack.c.bf16 %v1315_v25, %v1315_v25 }
 0x475   : > { %v825_v28 = vsub.f32 %v810_v58, %v823_v26  ;;  %536 = vadd.xlane.f32.xlu0 %v535_v27  ;;  %v681_v58 = vld [vmem:[#allocation3 + $0x10] sm:$0xff] }
 0x477   : > { %v826_v29 = vmul.f32 1.442695, %v825_v28  ;;  %v689_v28 = vld [vmem:[#allocation4 + $0x10] sm:$0xff] }
 0x478   : > { %v553_v30 = vpop.permute.xlu1 %552 }
 0x479   : > { %1318 = vpow2.f32 %v826_v29  ;;  %v558_v31 = vsel %vm408_vm4, %v553_v30, 0 }
 0x47a   : > { %1190 = vmatpush3.bf16.msra.mxu0 %v558_v31  ;;  %1320 = vpow2.f32 %v379_v42 }
 0x47b   : > { %v1317_v32 = vpop.eup %1316  ;;  %1201 = vmatprep.subr.bf16.mxu0 %v1517_v0  ;;  %1322 = vpow2.f32 %v522_v44 }
 0x47c   : > { %v683_v34 = vsel %vm309_vm0, %v1317_v32, 0.0  ;;  %v701_v35 = vpop.permute.xlu1 %700  ;;  %v696_v39 = vpack.c.bf16 %v1317_v32, %v1317_v32  ;;  %1324 = vpow2.f32 %v818_v45 }
 0x47d   : > { %684 = vadd.xlane.f32.xlu0 %v683_v34  ;;  %1192 = vmatmul.mubr.msk.bf16.vlgmr.msra.gmra.mrb[4].mxu0 %vm309_vm0, %v548_v33  ;;  %v706_v36 = vsel %vm408_vm4, %v701_v35, 0  ;;  %1326 = vpow2.f32 %v670_v46  ;;  %v837_v35 = vld [vmem:[#allocation4 + $0x18] sm:$0xff] }
 0x47e   : > { %1202 = vmatpush3.bf16.msra.mxu0 %v706_v36  ;;  %1203 = vmatprep.mubr.msk.bf16.mxu0 %vm1518_vm1, %v1517_v0 }
 0x47f   : > { %1213 = vmatprep.subr.bf16.mxu0 %v1517_v0 }
 0x480   : > { %v849_v37 = vpop.permute.xlu1 %848 }
 0x481   : > { %v854_v40 = vsel %vm408_vm4, %v849_v37, 0 }
 0x483   : > { %v1319_v38 = vpop.eup %1318 }
 0x484   : > { %v831_v43 = vsel %vm309_vm0, %v1319_v38, 0.0  ;;  %v844_v47 = vpack.c.bf16 %v1319_v38, %v1319_v38  ;;  %v1321_v21 = vpop.eup %1320 }
 0x485   : > { %1204 = vmatmul.mubr.msk.bf16.vlgmr.msra.gmra.mrb[8].mxu0 %vm309_vm0, %v696_v39  ;;  %832 = vadd.xlane.f32.xlu1 %v831_v43  ;;  %v1323_v23 = vpop.eup %1322 }
 0x486   : > { %1214 = vmatpush3.bf16.msra.mxu0 %v854_v40  ;;  %1215 = vmatprep.mubr.msk.bf16.mxu0 %vm1518_vm1, %v1517_v0  ;;  %v1325_v24 = vpop.eup %1324  ;;  %v390_v0 = vmul.f32 %v1321_v21, %v389_v49  ;;  %v534_v55 = vmul.f32 %v1323_v23, %v533_v54 }
 0x487   : > { %v1327_v48 = vpop.eup %1326  ;;  %v830_v2 = vmul.f32 %v1325_v24, %v829_v63 }
 0x488   : > { %v682_v59 = vmul.f32 %v1327_v48, %v681_v58 }
 0x48d   : > { %1216 = vmatmul.mubr.msk.bf16.vlgmr.msra.gmra.mrb[12].mxu0 %vm309_vm0, %v844_v47 }
 0x493   : > { %400 = vperm.xlu0 %1301, %v1321_v21  }
 0x496   : > { %544 = vperm.xlu1 %1302, %v1323_v23  }
 0x497   : > { %840 = vperm.xlu0 %1301, %v1325_v24  }
 0x49a   : > { %692 = vperm.xlu1 %1302, %v1327_v48  }
 0x4b2   : > { %v393_v50 = vpop.xlane.xlu1 %392 }
 0x4b3   : > { %v394_v51 = vadd.f32 %v393_v50, %v390_v0 }
 0x4b5   : > { %396 = vst.msk [vmem:[#allocation3] sm:$0xff] %vm300_vm2, %v394_v51 }
 0x4bc   : > { %v902_v52 = vld [vmem:[#allocation3] sm:$0xff] }
 0x4bd   : > { %1328 = vrcp.f32 %v902_v52 }
 0x4c7   : > { %v1329_v53 = vpop.eup %1328 }
 0x4c8   : > { %907 = vperm.xlu1 %1302, %v1329_v53  }
 0x502   : > { %v537_v56 = vpop.xlane.xlu0 %536 }
 0x503   : > { %v538_v57 = vadd.f32 %v537_v56, %v534_v55 }
 0x505   : > { %539 = vst.msk [vmem:[#allocation3 + $0x8] sm:$0xff] %vm300_vm2, %v538_v57 }
 0x50a   : > { %v685_v60 = vpop.xlane.xlu0 %684 }
 0x50b   : > { %v686_v61 = vadd.f32 %v685_v60, %v682_v59 }
 0x50c   : > { %v914_v62 = vld [vmem:[#allocation3 + $0x8] sm:$0xff] }
 0x50d   : > { %687 = vst.msk [vmem:[#allocation3 + $0x10] sm:$0xff] %vm300_vm2, %v686_v61  ;;  %1330 = vrcp.f32 %v914_v62 }
 0x512   : > { %v833_v3 = vpop.xlane.xlu1 %832  ;;  %v401_v4 = vpop.permute.xlu0 %400 }
 0x513   : > { %v834_v5 = vadd.f32 %v833_v3, %v830_v2  ;;  %v403_v6 = vmul.f32 %v401_v4, %v397_v1 }
 0x514   : > { %v932_v7 = vld [vmem:[#allocation3 + $0x10] sm:$0xff] }
 0x515   : > { %835 = vst.msk [vmem:[#allocation3 + $0x18] sm:$0xff] %vm300_vm2, %v834_v5  ;;  %v452_v8 = vadd.f32 %v1851_v41, %v403_v6  ;;  %1332 = vrcp.f32 %v932_v7  ;;  %v541_v41 = vld [vmem:[#allocation4 + $0x8] sm:$0xff] }
 0x516   : > { %v545_v13 = vpop.permute.xlu1 %544  ;;  %v841_v36 = vpop.permute.xlu0 %840 }
 0x517   : > { %v1331_v9 = vpop.eup %1330  ;;  %453 = vst.msk [vmem:[#allocation4] sm:$0xff] %vm309_vm0, %v452_v8  ;;  %v547_v19 = vmul.f32 %v545_v13, %v541_v41  ;;  %v843_v37 = vmul.f32 %v841_v36, %v837_v35 }
 0x518   : > { %919 = vperm.xlu0 %1301, %v1331_v9  }
 0x51a   : > { %v693_v14 = vpop.permute.xlu1 %692 }
 0x51b   : > { %v695_v29 = vmul.f32 %v693_v14, %v689_v28 }
 0x51c   : > { %v950_v10 = vld [vmem:[#allocation3 + $0x18] sm:$0xff] }
 0x51d   : > { %1334 = vrcp.f32 %v950_v10 }
 0x51e   : > { %v904_v15 = vld [vmem:[#allocation4] sm:$0xff] }
 0x51f   : > { %v1333_v11 = vpop.eup %1332 }
 0x520   : > { %937 = vperm.xlu0 %1301, %v1333_v11  }
 0x527   : > { %v1335_v12 = vpop.eup %1334 }
 0x528   : > { %955 = vperm.xlu0 %1301, %v1335_v12  }
 0x547   : > { %v908_v16 = vpop.permute.xlu1 %907 }
 0x548   : > { %v910_v17 = vmul.f32 %v908_v16, %v904_v15 }
 0x54a   : > { %v911_v18 = vpack.c.bf16 %v910_v17, %v910_v17 }
 0x54c   : > { %913 = vst.msk [vmem:[%s1914_s10] sm:$0xf] %vm912_vm5, %v911_v18 }
 0x550   : > { %v594_v20 = vpop.f32.mrb[4].mxu0 }
 0x551   : > { %v600_v22 = vadd.f32 %v594_v20, %v547_v19  ;;  %v1193_v25 = vpop.f32.mrb[5].mxu0 }
 0x552   : > { %v597_v26 = vpop.f32.mrb[6].mxu0 }
 0x553   : > { %601 = vst.msk [vmem:[#allocation4 + $0x8] sm:$0xff] %vm309_vm0, %v600_v22  ;;  %v1194_v27 = vpop.f32.mrb[7].mxu0 }
 0x558   : > { %v742_v30 = vpop.f32.mrb[8].mxu0 }
 0x559   : > { %v748_v31 = vadd.f32 %v742_v30, %v695_v29  ;;  %v1205_v32 = vpop.f32.mrb[9].mxu0 }
 0x55a   : > { %v745_v33 = vpop.f32.mrb[10].mxu0  ;;  %v916_v44 = vld [vmem:[#allocation4 + $0x8] sm:$0xff] }
 0x55b   : > { %749 = vst.msk [vmem:[#allocation4 + $0x10] sm:$0xff] %vm309_vm0, %v748_v31  ;;  %v1206_v34 = vpop.f32.mrb[11].mxu0 }
 0x560   : > { %v890_v38 = vpop.f32.mrb[12].mxu0 }
 0x561   : > { %v896_v39 = vadd.f32 %v890_v38, %v843_v37  ;;  %v1217_v40 = vpop.f32.mrb[13].mxu0 }
 0x562   : > { %v893_v42 = vpop.f32.mrb[14].mxu0  ;;  %v934_v21 = vld [vmem:[#allocation4 + $0x10] sm:$0xff] }
 0x563   : > { %897 = vst.msk [vmem:[#allocation4 + $0x18] sm:$0xff] %vm309_vm0, %v896_v39  ;;  %v1218_v43 = vpop.f32.mrb[15].mxu0 }
 0x56a   : > { %v952_v49 = vld [vmem:[#allocation4 + $0x18] sm:$0xff] }
 0x597   : > { %v920_v45 = vpop.permute.xlu0 %919 }
 0x598   : > { %v922_v46 = vmul.f32 %v920_v45, %v916_v44 }
 0x59a   : > { %v1152_v47 = vpack.c.bf16 %v922_v46, %v922_v46 }
 0x59c   : > { %927 = vrot.lane.b32.xlu1 %v1152_v47, %s1524_s6 }
 0x59f   : > { %v938_v23 = vpop.permute.xlu0 %937 }
 0x5a0   : > { %v940_v24 = vmul.f32 %v938_v23, %v934_v21 }
 0x5a2   : > { %v1153_v48 = vpack.c.bf16 %v940_v24, %v940_v24 }
 0x5a4   : > { %945 = vrot.lane.b32.xlu1 %v1153_v48, %s1525_s9 }
 0x5a7   : > { %v956_v0 = vpop.permute.xlu0 %955 }
 0x5a8   : > { %v958_v50 = vmul.f32 %v956_v0, %v952_v49 }
 0x5aa   : > { %v1154_v51 = vpack.c.bf16 %v958_v50, %v958_v50 }
 0x5ac   : > { %963 = vrot.lane.b32.xlu1 %v1154_v51, %s1526_s22 }
 0x60e   : > { %v928_v52 = vpop.permute.xlu1 %927 }
 0x60f   : > { %931 = vst.msk [vmem:[%s1914_s10] sm:$0xf] %vm930_vm6, %v928_v52 }
 0x616   : > { %v946_v53 = vpop.permute.xlu1 %945 }
 0x617   : > { %949 = vst.msk [vmem:[%s1914_s10] sm:$0xf] %vm948_vm7, %v946_v53 }
 0x61e   : > { %v964_v54 = vpop.permute.xlu1 %963 }
 0x61f   : > { %967 = vst.msk [vmem:[%s1914_s10] sm:$0xf] %vm966_vm8, %v964_v54 }
 0x620   : > { %1439 = shalt.err (!%p1436_p13)
}
 0x621   : > { %s1440_s21 = scalar_lea.hbm %s1927_s5, 64  ;;  %s1444_s19 = scalar_lea.hbm %s1980_s3, 128 }
 0x622   : > { %p1441_p11 = scmp.ne.s32.totalorder %s1927_s5, %s1440_s21  ;;  %p1445_p7 = scmp.lt.u32.totalorder %s1927_s5, %s1980_s3 }
 0x623   : > { %p1446_p3 = scmp.lt.u32.totalorder %s1444_s19, %s1440_s21  ;;  %p1448_p4 = scmp.lt.u32.totalorder %s1440_s21, %s1927_s5 }
 0x624   : > { %p1442_p2 = pnand %p1441_p11, %p2003_p10 }
 0x625   : > { %p1447_p0 = por %p1446_p3, %p1445_p7 }
 0x626   : > { %p1443_p5 = pneg %p1442_p2 }
 0x627   : > { %p1449_p12 = por %p1448_p4, %p1447_p0 }
 0x629   : > { %p1450_p1 = pnand %p1449_p12, %p1443_p5 }
 0x62b   : > { %1453 = shalt.err (!%p1450_p1)
}
 0x62c   : > { %1225 = dma.vmem_to_hbm [thread:$0]  (%p2003_p10), %s1929_s30, 64, %s1927_s5, %s969_s23  }
 0x62d PF: > { %s995_s7 = sand.u32 1, %s1492_s12   ;;  %p2004_p8 = scmp.ne.s32.totalorder %s1993_s27, 0 }
 0x62e   : > { %p2005_p9 = scmp.ge.s32.totalorder %s1512_s17, 2  ;;  %s996_s20 = scalar_lea.sflag [#allocation7], %s995_s7 }
 0x630   : > { %p1238_p6 = pnand %p2005_p9, %p2004_p8 }
 0x632   : > { %1487 = dma.done.wait (!%p1238_p6), %s996_s20, 64  }
 0x633   : > { %1489 = vsyncadd (!%p1238_p6), %s996_s20, 4294967232  ;;  %s22_s17 = sadd.s32 1, %s1512_s17   ;;  %s2006_s25 = sld [smem:[#allocation17_spill]] }
 0x634   : > { %p19_p13 = scmp.ge.s32.totalorder %s22_s17, 4   ;;  %s2007_s15 = sld [smem:[#allocation15_spill]] }
 0x635   : > { %s2008_s16 = sld [smem:[#allocation16_spill]]  ;;  %s2009_s12 = smov %s1496_s13 }
 0x636   : > { %s2010_s13 = smov %s1500_s14  ;;  %21 = sbr.rel (!%p19_p13) target bundleno = 10 (0xa), region = 118 }
 0x639   : > { %s2011_s14 = smov %s2006_s25 }
 0x63d   :  { %1001 = vsyncpa [#allocation6], 1 }
 0x63e   :  { %1003 = vsyncpa [#allocation6 + $0x1], 1 }
 0x63f   :  { %1004 = vsyncpa [#allocation9], 1 }
 0x640   :  { %1006 = vsyncpa [#allocation9 + $0x1], 1 }
 0x641   :  { %1007 = vsyncpa [#allocation7], 1 }
 0x642   :  { %1009 = vsyncpa [#allocation7 + $0x1], 1 }

// kernel: text_decoder_forward.31
= control target key start
LH: loop header
LB: loop body
LE: loop exit
PB: predicated region body
PF: predicated region fallthrough
CT: control target
= control target key end

     0   :  { %7 = vsyncpa [#allocation4], 0  ;;  %s367_s0 = inlined_call_operand.hbm [shape: f32[32,32], index: 0, kind: input, shape index: {}]   ;;  %s368_s1 = inlined_call_operand.hbm [shape: bf16[32,32], index: 1, kind: input, shape index: {}]   ;;  %s369_s2 = inlined_call_operand.hbm [shape: bf16[32,32], index: 2, kind: output, shape index: {}]  }
   0x1   :  { %8 = vsyncpa [#allocation7], 0 }
   0x2   :  { %9 = vsyncpa [#allocation5], 0  ;;  %s292_s9 = smov [#allocation3]   ;;  %s220_s13 = scalar_lea.hbm %s367_s0, 512 }
   0x3   :  { %s15_s10 = sshll.u32 %s292_s9, 4  ;;  %p221_p0 = scmp.ne.s32.totalorder %s367_s0, %s220_s13  ;;  %s16_s10 = int_to_ptr.vmem [resolvable:$true] %s15_s10 }
   0x4   :  { %p224_p1 = scmp.lt.u32.totalorder %s220_s13, %s367_s0 }
   0x6   :  { %p226_p2 = pnand %p224_p1, %p221_p0 }
   0x8   :  { %229 = shalt.err (!%p226_p2)
}
   0x9   :  { %s230_s18 = scalar_lea.vmem %s16_s10, 512  ;;  %p235_p4 = scmp.lt.s32.totalorder %s16_s10, %s16_s10 }
   0xa   :  { %p231_p3 = scmp.ne.s32.totalorder %s16_s10, %s230_s18  ;;  %p236_p5 = scmp.lt.s32.totalorder %s230_s18, %s230_s18 }
   0xc   :  { %p237_p6 = por %p236_p5, %p235_p4 }
   0xe   :  { %p238_p7 = pnand %p237_p6, %p231_p3 }
  0x10   :  { %241 = shalt.err (!%p238_p7)
}
  0x11   :  { %s293_s19 = smov 128   ;;  %s294_s20 = smov 8  }
  0x12   :  { %21 = dma.hbm_to_vmem [thread:$0]  %s367_s0, 512, %s16_s10, [#allocation4], %s293_s19, %s293_s19, %s294_s20  }
  0x13   :  { %s295_s23 = smov [#allocation6]   ;;  %s242_s27 = scalar_lea.hbm %s368_s1, 256 }
  0x14   :  { %s27_s24 = sshll.u32 %s295_s23, 4  ;;  %p243_p8 = scmp.ne.s32.totalorder %s368_s1, %s242_s27  ;;  %s28_s24 = int_to_ptr.vmem [resolvable:$true] %s27_s24 }
  0x15   :  { %p246_p9 = scmp.lt.u32.totalorder %s242_s27, %s368_s1 }
  0x17   :  { %p248_p10 = pnand %p246_p9, %p243_p8 }
  0x19   :  { %251 = shalt.err (!%p248_p10)
}
  0x1a   :  { %s252_s4 = scalar_lea.vmem %s28_s24, 256  ;;  %p257_p12 = scmp.lt.s32.totalorder %s28_s24, %s28_s24 }
  0x1b   :  { %p253_p11 = scmp.ne.s32.totalorder %s28_s24, %s252_s4  ;;  %p258_p13 = scmp.lt.s32.totalorder %s252_s4, %s252_s4 }
  0x1d   :  { %p259_p0 = por %p258_p13, %p257_p12 }
  0x1f   :  { %p260_p1 = pnand %p259_p0, %p253_p11 }
  0x21   :  { %263 = shalt.err (!%p260_p1)
}
  0x22   :  { %s296_s0 = smov 64   ;;  %s297_s5 = smov 4  }
  0x23   :  { %33 = dma.hbm_to_vmem [thread:$0]  %s368_s1, 256, %s28_s24, [#allocation7], %s296_s0, %s296_s0, %s297_s5  }
  0x24   :  { %286 = dma.done.wait [#allocation4], 512  }
  0x25   :  { %287 = vsyncadd [#allocation4], 4294966784 }
  0x26   :  { %288 = dma.done.wait [#allocation7], 256  }
  0x27   :  { %289 = vsyncadd [#allocation7], 4294967040  ;;  %vm45_vm0 = vcmask 261120   ;;  %v298_v0 = vmov 0.0   ;;  %v218_v1 = vld [vmem:[#allocation6] sm:$0xff]   ;;  %v219_v2 = vld [vmem:[#allocation6 + $0x8] sm:$0xff]  }
  0x28   :  { %48 = vst.msk [vmem:[#allocation2 + $0x10] sm:$0xff] %vm45_vm0, %v298_v0  ;;  %46 = vst.msk [vmem:[#allocation2] sm:$0xff] %vm45_vm0, %v298_v0  ;;  %202 = vmatprep.subr.bf16.mxu0 %v218_v1  ;;  %v50_v3 = vld [vmem:[#allocation3] sm:$0xff]  ;;  %v51_v4 = vld [vmem:[#allocation3 + $0x8] sm:$0xff]  ;;  %vm163_vm1 = vcmask 257024   ;;  %s299_s1 = smov [#allocation8]  }
  0x29   :  { %47 = vst.msk [vmem:[#allocation2 + $0x8] sm:$0xff] %vm45_vm0, %v298_v0  ;;  %49 = vst.msk [vmem:[#allocation2 + $0x18] sm:$0xff] %vm45_vm0, %v298_v0  ;;  %203 = vmatpush3.bf16.msra.mxu0 %v218_v1  ;;  %v54_v5 = vpack.c.bf16 %v51_v4, %v50_v3  ;;  %v52_v6 = vld [vmem:[#allocation3 + $0x10] sm:$0xff]  ;;  %v53_v7 = vld [vmem:[#allocation3 + $0x18] sm:$0xff]  ;;  %s173_s8 = sshll.u32 %s299_s1, 4  ;;  %s174_s8 = int_to_ptr.vmem [resolvable:$true] %s173_s8 }
  0x2a   :  { %204 = vmatprep.subr.bf16.mxu0 %v219_v2  ;;  %v55_v8 = vpack.c.bf16 %v53_v7, %v52_v6  ;;  %s264_s9 = scalar_lea.vmem %s174_s8, 256  ;;  %p269_p3 = scmp.lt.s32.totalorder %s174_s8, %s174_s8 }
  0x2b   :  { %206 = vmatprep.mubr.msk.bf16.mxu0 %vm45_vm0, %v54_v5  ;;  %p265_p2 = scmp.ne.s32.totalorder %s174_s8, %s264_s9  ;;  %p270_p4 = scmp.lt.s32.totalorder %s264_s9, %s264_s9 }
  0x2d   :  { %205 = vmatpush3.bf16.msra.mxu0 %v219_v2  ;;  %p271_p5 = por %p270_p4, %p269_p3 }
  0x2f   :  { %v58_v9 = vld [vmem:[#allocation2 + $0x10] sm:$0xff]  ;;  %v56_v10 = vld [vmem:[#allocation2] sm:$0xff]  ;;  %p272_p6 = pnand %p271_p5, %p265_p2 }
  0x30   :  { %207 = vmatmul.mubr.msk.bf16.vlgmr.msra.gmra.mrb[0].mxu0 %vm45_vm0, %v55_v8  ;;  %v59_v12 = vld [vmem:[#allocation2 + $0x18] sm:$0xff]  ;;  %v57_v15 = vld [vmem:[#allocation2 + $0x8] sm:$0xff] }
 0x103   :  { %v208_v11 = vpop.f32.mrb[0].mxu0 }
 0x104   :  { %v134_v13 = vadd.f32 %v208_v11, %v58_v9  ;;  %v117_v14 = vpop.f32.mrb[1].mxu0 }
 0x105   :  { %v132_v16 = vadd.f32 %v117_v14, %v56_v10  ;;  %v209_v17 = vpop.f32.mrb[2].mxu0 }
 0x106   :  { %138 = vst.msk [vmem:[#allocation2 + $0x10] sm:$0xff] %vm45_vm0, %v134_v13  ;;  %v135_v18 = vadd.f32 %v209_v17, %v59_v12  ;;  %v120_v19 = vpop.f32.mrb[3].mxu0 }
 0x107   :  { %136 = vst.msk [vmem:[#allocation2] sm:$0xff] %vm45_vm0, %v132_v16  ;;  %v133_v20 = vadd.f32 %v120_v19, %v57_v15 }
 0x108   :  { %139 = vst.msk [vmem:[#allocation2 + $0x18] sm:$0xff] %vm45_vm0, %v135_v18 }
 0x109   :  { %137 = vst.msk [vmem:[#allocation2 + $0x8] sm:$0xff] %vm45_vm0, %v133_v20 }
 0x10d   :  { %v145_v21 = vld [vmem:[#allocation2 + $0x10] sm:$0xff] }
 0x10e   :  { %v143_v22 = vld [vmem:[#allocation2] sm:$0xff]  ;;  %v196_v23 = vpack.c.bf16 %v145_v21, %v145_v21 }
 0x10f   :  { %v146_v24 = vld [vmem:[#allocation2 + $0x18] sm:$0xff]  ;;  %v194_v25 = vpack.c.bf16 %v143_v22, %v143_v22 }
 0x110   :  { %v144_v26 = vld [vmem:[#allocation2 + $0x8] sm:$0xff]  ;;  %v197_v27 = vpack.c.bf16 %v146_v24, %v146_v24  ;;  %166 = vst.msk [vmem:[#allocation8 + $0x8] sm:$0xf] %vm163_vm1, %v196_v23 }
 0x111   :  { %v195_v28 = vpack.c.bf16 %v144_v26, %v144_v26  ;;  %164 = vst.msk [vmem:[#allocation8] sm:$0xf] %vm163_vm1, %v194_v25 }
 0x112   :  { %167 = vst.msk [vmem:[#allocation8 + $0xc] sm:$0xf] %vm163_vm1, %v197_v27 }
 0x113   :  { %165 = vst.msk [vmem:[#allocation8 + $0x4] sm:$0xf] %vm163_vm1, %v195_v28 }
 0x114   :  { %275 = shalt.err (!%p272_p6)
}
 0x115   :  { %s276_s12 = scalar_lea.hbm %s369_s2, 256 }
 0x116   :  { %p277_p7 = scmp.ne.s32.totalorder %s369_s2, %s276_s12  ;;  %p280_p8 = scmp.lt.u32.totalorder %s276_s12, %s369_s2 }
 0x118   :  { %p282_p9 = pnand %p280_p8, %p277_p7 }
 0x11a   :  { %285 = shalt.err (!%p282_p9)
}
 0x11b   :  { %179 = dma.vmem_to_hbm [thread:$0]  %s174_s8, 256, %s369_s2, [#allocation5], %s296_s0, %s296_s0, %s297_s5  }
 0x11c   :  { %290 = dma.done.wait [#allocation5], 256  }
 0x11d   :  { %291 = vsyncadd [#allocation5], 4294967040 }
 0x11e   :  { %183 = vsyncpa [#allocation4], 1 }
 0x11f   :  { %184 = vsyncpa [#allocation7], 1 }
 0x120   :  { %185 = vsyncpa [#allocation5], 1 }

// kernel: text_decoder_forward.32
= control target key start
LH: loop header
LB: loop body
LE: loop exit
PB: predicated region body
PF: predicated region fallthrough
CT: control target
= control target key end

     0   :  { %8 = vsyncpa [#allocation4], 0  ;;  %s434_s0 = inlined_call_operand.hbm [shape: f32[32,32], index: 0, kind: input, shape index: {}]   ;;  %s435_s1 = inlined_call_operand.hbm [shape: bf16[32,32], index: 1, kind: input, shape index: {}]   ;;  %s436_s2 = inlined_call_operand.hbm [shape: f32[1,32], index: 2, kind: input, shape index: {}]   ;;  %s437_s3 = inlined_call_operand.hbm [shape: bf16[32,32], index: 3, kind: output, shape index: {}]  }
   0x1   :  { %9 = vsyncpa [#allocation7], 0 }
   0x2   :  { %10 = vsyncpa [#allocation5], 0  ;;  %s341_s12 = smov [#allocation6]   ;;  %s247_s16 = scalar_lea.hbm %s435_s1, 256 }
   0x3   :  { %s28_s13 = sshll.u32 %s341_s12, 4  ;;  %p248_p0 = scmp.ne.s32.totalorder %s435_s1, %s247_s16  ;;  %s29_s13 = int_to_ptr.vmem [resolvable:$true] %s28_s13 }
   0x4   :  { %p251_p1 = scmp.lt.u32.totalorder %s247_s16, %s435_s1 }
   0x6   :  { %p253_p2 = pnand %p251_p1, %p248_p0 }
   0x8   :  { %256 = shalt.err (!%p253_p2)
}
   0x9   :  { %s257_s21 = scalar_lea.vmem %s29_s13, 256  ;;  %p262_p4 = scmp.lt.s32.totalorder %s29_s13, %s29_s13 }
   0xa   :  { %p258_p3 = scmp.ne.s32.totalorder %s29_s13, %s257_s21  ;;  %p263_p5 = scmp.lt.s32.totalorder %s257_s21, %s257_s21 }
   0xc   :  { %p264_p6 = por %p263_p5, %p262_p4 }
   0xe   :  { %p265_p7 = pnand %p264_p6, %p258_p3 }
  0x10   :  { %268 = shalt.err (!%p265_p7)
}
  0x11   :  { %s342_s22 = smov 64   ;;  %s343_s23 = smov 4  }
  0x12   :  { %34 = dma.hbm_to_vmem [thread:$0]  %s435_s1, 256, %s29_s13, [#allocation7], %s342_s22, %s342_s22, %s343_s23  }
  0x13   :  { %s344_s26 = smov [#allocation3]   ;;  %s269_s30 = scalar_lea.hbm %s434_s0, 512 }
  0x14   :  { %s16_s27 = sshll.u32 %s344_s26, 4  ;;  %p270_p8 = scmp.ne.s32.totalorder %s434_s0, %s269_s30  ;;  %s17_s27 = int_to_ptr.vmem [resolvable:$true] %s16_s27 }
  0x15   :  { %p273_p9 = scmp.lt.u32.totalorder %s269_s30, %s434_s0 }
  0x17   :  { %p275_p10 = pnand %p273_p9, %p270_p8 }
  0x19   :  { %278 = shalt.err (!%p275_p10)
}
  0x1a   :  { %s279_s8 = scalar_lea.vmem %s17_s27, 512  ;;  %p284_p12 = scmp.lt.s32.totalorder %s17_s27, %s17_s27 }
  0x1b   :  { %p280_p11 = scmp.ne.s32.totalorder %s17_s27, %s279_s8  ;;  %p285_p13 = scmp.lt.s32.totalorder %s279_s8, %s279_s8 }
  0x1d   :  { %p286_p0 = por %p285_p13, %p284_p12 }
  0x1f   :  { %p287_p1 = pnand %p286_p0, %p280_p11 }
  0x21   :  { %290 = shalt.err (!%p287_p1)
}
  0x22   :  { %s345_s1 = smov 128   ;;  %s346_s9 = smov 8  }
  0x23   :  { %22 = dma.hbm_to_vmem [thread:$0]  %s434_s0, 512, %s17_s27, [#allocation4], %s345_s1, %s345_s1, %s346_s9  }
  0x24   :  { %s347_s12 = smov [#allocation8]   ;;  %s291_s16 = scalar_lea.hbm %s436_s2, 16 }
  0x25   :  { %s41_s13 = sshll.u32 %s347_s12, 4  ;;  %p292_p2 = scmp.ne.s32.totalorder %s436_s2, %s291_s16  ;;  %s42_s13 = int_to_ptr.vmem [resolvable:$true] %s41_s13 }
  0x26   :  { %p295_p3 = scmp.lt.u32.totalorder %s291_s16, %s436_s2 }
  0x28   :  { %p297_p4 = pnand %p295_p3, %p292_p2 }
  0x2a   :  { %300 = shalt.err (!%p297_p4)
}
  0x2b   :  { %s301_s21 = scalar_lea.vmem %s42_s13, 16  ;;  %s305_s0 = scalar_lea.vmem %s42_s13, 32 }
  0x2c   :  { %p302_p5 = scmp.ne.s32.totalorder %s42_s13, %s301_s21  ;;  %p306_p6 = scmp.lt.s32.totalorder %s42_s13, %s42_s13 }
  0x2d   :  { %p307_p7 = scmp.lt.s32.totalorder %s305_s0, %s301_s21 }
  0x2f   :  { %p308_p8 = por %p307_p7, %p306_p6 }
  0x31   :  { %p309_p9 = pnand %p308_p8, %p302_p5 }
  0x33   :  { %312 = shalt.err (!%p309_p9)
}
  0x34   :  { %44 = dma.hbm_to_vmem [thread:$0]  %s436_s2, 16, %s42_s13, [#allocation7]  }
  0x35   :  { %335 = dma.done.wait [#allocation4], 512  }
  0x36   :  { %336 = vsyncadd [#allocation4], 4294966784 }
  0x37   :  { %337 = dma.done.wait [#allocation7], 272  }
  0x38   :  { %338 = vsyncadd [#allocation7], 4294967024  ;;  %vm59_vm0 = vcmask 261120   ;;  %v348_v0 = vmov 0.0   ;;  %v245_v1 = vld [vmem:[#allocation6] sm:$0xff]   ;;  %v246_v2 = vld [vmem:[#allocation6 + $0x8] sm:$0xff]  }
  0x39   :  { %62 = vst.msk [vmem:[#allocation2 + $0x10] sm:$0xff] %vm59_vm0, %v348_v0  ;;  %60 = vst.msk [vmem:[#allocation2] sm:$0xff] %vm59_vm0, %v348_v0  ;;  %228 = vmatprep.subr.bf16.mxu0 %v245_v1  ;;  %v64_v3 = vld [vmem:[#allocation3] sm:$0xff]  ;;  %v65_v4 = vld [vmem:[#allocation3 + $0x8] sm:$0xff]  ;;  %vm188_vm1 = vcmask 257024   ;;  %s349_s2 = smov [#allocation9]  }
  0x3a   :  { %61 = vst.msk [vmem:[#allocation2 + $0x8] sm:$0xff] %vm59_vm0, %v348_v0  ;;  %63 = vst.msk [vmem:[#allocation2 + $0x18] sm:$0xff] %vm59_vm0, %v348_v0  ;;  %229 = vmatpush3.bf16.msra.mxu0 %v245_v1  ;;  %v68_v5 = vpack.c.bf16 %v65_v4, %v64_v3  ;;  %v66_v6 = vld [vmem:[#allocation3 + $0x10] sm:$0xff]  ;;  %v67_v7 = vld [vmem:[#allocation3 + $0x18] sm:$0xff]  ;;  %s198_s26 = sshll.u32 %s349_s2, 4  ;;  %s199_s26 = int_to_ptr.vmem [resolvable:$true] %s198_s26 }
  0x3b   :  { %230 = vmatprep.subr.bf16.mxu0 %v246_v2  ;;  %v69_v8 = vpack.c.bf16 %v67_v7, %v66_v6  ;;  %v215_v21 = vld [vmem:[#allocation8] ss:$0 sm:$0xff]  ;;  %s313_s27 = scalar_lea.vmem %s199_s26, 256  ;;  %p318_p11 = scmp.lt.s32.totalorder %s199_s26, %s199_s26 }
  0x3c   :  { %232 = vmatprep.mubr.msk.bf16.mxu0 %vm59_vm0, %v68_v5  ;;  %p314_p10 = scmp.ne.s32.totalorder %s199_s26, %s313_s27  ;;  %p319_p12 = scmp.lt.s32.totalorder %s313_s27, %s313_s27 }
  0x3e   :  { %231 = vmatpush3.bf16.msra.mxu0 %v246_v2  ;;  %p320_p13 = por %p319_p12, %p318_p11 }
  0x40   :  { %v72_v9 = vld [vmem:[#allocation2 + $0x10] sm:$0xff]  ;;  %v70_v10 = vld [vmem:[#allocation2] sm:$0xff]  ;;  %p321_p0 = pnand %p320_p13, %p314_p10 }
  0x41   :  { %233 = vmatmul.mubr.msk.bf16.vlgmr.msra.gmra.mrb[0].mxu0 %vm59_vm0, %v69_v8  ;;  %v73_v12 = vld [vmem:[#allocation2 + $0x18] sm:$0xff]  ;;  %v71_v15 = vld [vmem:[#allocation2 + $0x8] sm:$0xff] }
 0x114   :  { %v234_v11 = vpop.f32.mrb[0].mxu0 }
 0x115   :  { %v148_v13 = vadd.f32 %v234_v11, %v72_v9  ;;  %v131_v14 = vpop.f32.mrb[1].mxu0 }
 0x116   :  { %v146_v16 = vadd.f32 %v131_v14, %v70_v10  ;;  %v235_v17 = vpop.f32.mrb[2].mxu0 }
 0x117   :  { %152 = vst.msk [vmem:[#allocation2 + $0x10] sm:$0xff] %vm59_vm0, %v148_v13  ;;  %v149_v18 = vadd.f32 %v235_v17, %v73_v12  ;;  %v134_v19 = vpop.f32.mrb[3].mxu0 }
 0x118   :  { %150 = vst.msk [vmem:[#allocation2] sm:$0xff] %vm59_vm0, %v146_v16  ;;  %v147_v20 = vadd.f32 %v134_v19, %v71_v15 }
 0x119   :  { %153 = vst.msk [vmem:[#allocation2 + $0x18] sm:$0xff] %vm59_vm0, %v149_v18 }
 0x11a   :  { %151 = vst.msk [vmem:[#allocation2 + $0x8] sm:$0xff] %vm59_vm0, %v147_v20 }
 0x11e   :  { %v159_v22 = vld [vmem:[#allocation2 + $0x10] sm:$0xff] }
 0x11f   :  { %v157_v23 = vld [vmem:[#allocation2] sm:$0xff]  ;;  %v170_v24 = vadd.f32 %v215_v21, %v159_v22 }
 0x120   :  { %v160_v25 = vld [vmem:[#allocation2 + $0x18] sm:$0xff]  ;;  %v168_v26 = vadd.f32 %v215_v21, %v157_v23 }
 0x121   :  { %v158_v27 = vld [vmem:[#allocation2 + $0x8] sm:$0xff]  ;;  %v171_v28 = vadd.f32 %v215_v21, %v160_v25  ;;  %v222_v29 = vpack.c.bf16 %v170_v24, %v170_v24 }
 0x122   :  { %v169_v30 = vadd.f32 %v215_v21, %v158_v27  ;;  %v220_v31 = vpack.c.bf16 %v168_v26, %v168_v26 }
 0x123   :  { %v223_v32 = vpack.c.bf16 %v171_v28, %v171_v28  ;;  %191 = vst.msk [vmem:[#allocation9 + $0x8] sm:$0xf] %vm188_vm1, %v222_v29 }
 0x124   :  { %v221_v33 = vpack.c.bf16 %v169_v30, %v169_v30  ;;  %189 = vst.msk [vmem:[#allocation9] sm:$0xf] %vm188_vm1, %v220_v31 }
 0x125   :  { %192 = vst.msk [vmem:[#allocation9 + $0xc] sm:$0xf] %vm188_vm1, %v223_v32 }
 0x126   :  { %190 = vst.msk [vmem:[#allocation9 + $0x4] sm:$0xf] %vm188_vm1, %v221_v33 }
 0x127   :  { %324 = shalt.err (!%p321_p0)
}
 0x128   :  { %s325_s30 = scalar_lea.hbm %s437_s3, 256 }
 0x129   :  { %p326_p1 = scmp.ne.s32.totalorder %s437_s3, %s325_s30  ;;  %p329_p2 = scmp.lt.u32.totalorder %s325_s30, %s437_s3 }
 0x12b   :  { %p331_p3 = pnand %p329_p2, %p326_p1 }
 0x12d   :  { %334 = shalt.err (!%p331_p3)
}
 0x12e   :  { %204 = dma.vmem_to_hbm [thread:$0]  %s199_s26, 256, %s437_s3, [#allocation5], %s342_s22, %s342_s22, %s343_s23  }
 0x12f   :  { %339 = dma.done.wait [#allocation5], 256  }
 0x130   :  { %340 = vsyncadd [#allocation5], 4294967040 }
 0x131   :  { %208 = vsyncpa [#allocation4], 1 }
 0x132   :  { %209 = vsyncpa [#allocation7], 1 }
 0x133   :  { %210 = vsyncpa [#allocation5], 1 }

// kernel: text_decoder_forward.33
= control target key start
LH: loop header
LB: loop body
LE: loop exit
PB: predicated region body
PF: predicated region fallthrough
CT: control target
= control target key end

     0   :  { %s2000_s0 = inlined_call_operand.hbm [shape: bf16[16,32], index: 0, kind: input, shape index: {}]   ;;  %s2001_s1 = inlined_call_operand.hbm [shape: bf16[32,32], index: 1, kind: input, shape index: {}]   ;;  %s2002_s2 = inlined_call_operand.hbm [shape: bf16[32,32], index: 2, kind: input, shape index: {}]   ;;  %s2003_s3 = inlined_call_operand.hbm [shape: bf16[16,32], index: 3, kind: output, shape index: {}]  }
   0x1   :  { %2011 = sst [smem:[#allocation18_spill]] %s2001_s1 }
   0x2   :  { %8 = vsyncpa [#allocation6], 0 }
   0x3   :  { %10 = vsyncpa [#allocation6 + $0x1], 0 }
   0x4   :  { %11 = vsyncpa [#allocation9], 0 }
   0x5   :  { %13 = vsyncpa [#allocation9 + $0x1], 0 }
   0x6   :  { %14 = vsyncpa [#allocation7], 0 }
   0x7   :  { %16 = vsyncpa [#allocation7 + $0x1], 0  ;;  %s1590_s12 = smov 0   ;;  %s1592_s13 = smov 0  }
   0x8   :  { %s1594_s14 = smov 0   ;;  %s1596_s15 = smov 0  }
   0x9   :  { %s1598_s16 = smov 0   ;;  %s1600_s17 = smov 0  }
   0xa LB: > { %2012 = sst [smem:[#allocation15_spill]] %s1540_s14  ;;  %s1621_s18 = sadd.s32 4294967295, %s1552_s17   ;;  %s1552_s17 = sphi %s1600_s17, %s22_s17   ;;  %s1548_s16 = sphi %s1598_s16, %s2037_s16   ;;  %s1544_s15 = sphi %s1596_s15, %s2036_s15   ;;  %s1540_s14 = sphi %s1594_s14, %s2035_s14   ;;  %s1536_s13 = sphi %s1592_s13, %s2034_s13   ;;  %s1532_s12 = sphi %s1590_s12, %s2033_s12  }
   0xb   : > { %s1144_s19 = sadd.s32 4294967294, %s1552_s17   ;;  %s41_s20 = sadd.s32 1, %s1548_s16 }
   0xc   : > { %s50_s21 = sadd.s32 1, %s1540_s14  ;;  %p43_p0 = scmp.ge.s32.totalorder %s41_s20, 2 }
   0xd   : > { %p57_p1 = scmp.ne.s32.totalorder %s1540_s14, %s1536_s13  ;;  %p58_p2 = scmp.eq.s32.totalorder %s1552_s17, 0 }
   0xe   : > { %p63_p3 = scmp.ne.s32.totalorder %s1536_s13, %s1532_s12  ;;  %s2039_s20 = smov (%p43_p0, %s41_s20), 0 }
   0xf   : > { %2013 = sst [smem:[#allocation16_spill]] %s2039_s20  ;;  %p1633_p4 = por %p58_p2, %p57_p1 }
  0x10   : > { %p64_p5 = scmp.eq.s32.totalorder %s1621_s18, 0  ;;  %s45_s23 = ssub.s32 %s1548_s16, %s2039_s20 }
  0x11   : > { %p149_p6 = scmp.eq.s32.totalorder %s1621_s18, 1  ;;  %p48_p7 = scmp.eq.s32.totalorder %s45_s23, 0 }
  0x12   : > { %p1641_p8 = por %p64_p5, %p63_p3  ;;  %p155_p10 = scmp.eq.s32.totalorder %s1144_s19, 1 }
  0x13   : > { %p1645_p9 = por %p149_p6, %p57_p1  ;;  %p1277_p13 = scmp.lt.s32.totalorder %s1552_s17, 2 }
  0x14   : > { %s2015_s24 = scalar_select %p1641_p8, 1, 0 }
  0x15   : > { %s2016_s25 = scalar_select %p1645_p9, 1, 0 }
  0x16   : > { %s1650_s26 = scalar_select %p48_p7, %s1540_s14, %s50_s21  }
  0x17   : > { %p1652_p11 = por %p155_p10, %p63_p3  ;;  %s1659_s28 = sand.u32 1, %s1540_s14  }
  0x18   : > { %2017 = sst [smem:[#allocation17_spill]] %s1650_s26  ;;  %s194_s29 = sand.u32 1, %s1552_s17  }
  0x19   : > { %s2018_s27 = scalar_select %p1652_p11, 1, 0 }
  0x1a   : > { %s1149_s30 = sshll.u32 %s1659_s28, 3  ;;  %p1665_p0 = pnand %p1277_p13, %p1633_p4 }
  0x1b   : > { %s1186_s5 = sshll.u32 %s1548_s16, 7  ;;  %s2020_s1 = sld [smem:[#allocation18_spill]] }
  0x1c   : > { %s2019_s4 = scalar_select %p1665_p0, 1, 0 }
  0x1d   : > { %s198_s9 = scalar_lea.vmem [#allocation8], %s1149_s30  ;;  %s1681_s11 = scalar_lea.sflag [#allocation9], %s194_s29 }
  0x1e   : > { %s207_s10 = sshll.u32 %s198_s9, 4  ;;  %p1687_p2 = pneg %p1665_p0  ;;  %s1679_s10 = int_to_ptr.vmem [resolvable:$true] %s207_s10 }
  0x21   : > { %s1675_s8 = scalar_lea.hbm %s2020_s1, %s1186_s5  ;;  %s1381_s6 = scalar_lea.hbm %s2020_s1, 256 }
  0x22   : > { %s1376_s19 = scalar_lea.hbm %s1675_s8, 128  ;;  %p1382_p5 = scmp.lt.u32.totalorder %s1675_s8, %s2020_s1 }
  0x23   : > { %p1377_p1 = scmp.ne.s32.totalorder %s1675_s8, %s1376_s19  ;;  %p1383_p6 = scmp.lt.u32.totalorder %s1381_s6, %s1376_s19 }
  0x24   : > { %p1385_p10 = scmp.lt.u32.totalorder %s1376_s19, %s1675_s8 }
  0x25   : > { %p1379_p3 = pnand %p1687_p2, %p1377_p1  ;;  %p1384_p7 = por %p1383_p6, %p1382_p5 }
  0x27   : > { %p1380_p4 = pneg %p1379_p3  ;;  %p1386_p13 = por %p1385_p10, %p1384_p7 }
  0x29   : > { %p1387_p12 = pnand %p1386_p13, %p1380_p4 }
  0x2b   : > { %1390 = shalt.err (!%p1387_p12)
}
  0x2c   : > { %s1391_s29 = scalar_lea.vmem %s1679_s10, 128  ;;  %s1554_s22 = smov [#allocation8]  }
  0x2d   : > { %p1392_p1 = scmp.ne.s32.totalorder %s1679_s10, %s1391_s29  ;;  %s1396_s23 = sshll.u32 %s1554_s22, 4  ;;  %s1397_s23 = int_to_ptr.vmem [resolvable:$false] %s1396_s23 }
  0x2e   : > { %s1398_s7 = scalar_lea.vmem %s1397_s23, 256  ;;  %p1399_p9 = scmp.lt.s32.totalorder %s1679_s10, %s1397_s23 }
  0x2f   : > { %p1394_p3 = pnand %p1392_p1, %p1687_p2  ;;  %p1400_p8 = scmp.lt.s32.totalorder %s1398_s7, %s1391_s29 }
  0x31   : > { %p1395_p11 = pneg %p1394_p3  ;;  %p1401_p5 = por %p1400_p8, %p1399_p9 }
  0x33   : > { %p1402_p6 = pnand %p1401_p5, %p1395_p11 }
  0x35   : > { %1405 = shalt.err (!%p1402_p6)
}
  0x36   : > { %s2008_s19 = smov 64   ;;  %s1556_s6 = smov 4  }
  0x37   : > { %1269 = dma.hbm_to_vmem [thread:$0]  (!%p1665_p0), %s1675_s8, 128, %s1679_s10, %s1681_s11, %s2008_s19, %s2008_s19, %s1556_s6  }
  0x38   : > { %s1719_s22 = scalar_lea.hbm %s2002_s2, %s1186_s5  ;;  %p1155_p8 = scmp.ge.s32.totalorder %s1552_s17, 1 }
  0x39   : > { %s221_s23 = scalar_lea.vmem [#allocation10], %s1149_s30  ;;  %p238_p9 = scmp.lt.s32.totalorder %s1552_s17, 3 }
  0x3a   : > { %s230_s7 = sshll.u32 %s221_s23, 4  ;;  %s1147_s20 = sshll.u32 %s1659_s28, 2  ;;  %s1736_s7 = int_to_ptr.vmem [resolvable:$true] %s230_s7 }
  0x3b   : > { %p1725_p11 = pnand %p1155_p8, %p238_p9  ;;  %s1148_s26 = sshll.u32 %s1548_s16, 6 }
  0x3c   : > { %s1734_s10 = scalar_lea.hbm %s2000_s0, %s1148_s26  ;;  %s179_s30 = scalar_lea.vmem [#allocation5], %s1147_s20 }
  0x3d   : > { %s2022_s1 = scalar_select %p1725_p11, 1, 0 }
  0x3e   : > { %s187_s5 = sshll.u32 %s179_s30, 4  ;;  %s176_s9 = scalar_lea.sflag [#allocation6], %s1659_s28  ;;  %s188_s5 = int_to_ptr.vmem [resolvable:$true] %s187_s5 }
  0x3f   : > { %s1406_s29 = scalar_lea.hbm %s1734_s10, 64  ;;  %s1411_s14 = scalar_lea.hbm %s2000_s0, 128 }
  0x40   : > { %p1407_p12 = scmp.ne.s32.totalorder %s1734_s10, %s1406_s29  ;;  %p1412_p10 = scmp.lt.u32.totalorder %s1734_s10, %s2000_s0 }
  0x41   : > { %p1413_p13 = scmp.lt.u32.totalorder %s1411_s14, %s1406_s29  ;;  %p1415_p3 = scmp.lt.u32.totalorder %s1406_s29, %s1734_s10 }
  0x42   : > { %p1409_p4 = pnand %p1407_p12, %p1687_p2 }
  0x43   : > { %p1414_p1 = por %p1413_p13, %p1412_p10 }
  0x44   : > { %p1410_p7 = pneg %p1409_p4 }
  0x45   : > { %p1416_p5 = por %p1415_p3, %p1414_p1 }
  0x47   : > { %p1417_p6 = pnand %p1416_p5, %p1410_p7 }
  0x49   : > { %1420 = shalt.err (!%p1417_p6)
}
  0x4a   : > { %s1421_s20 = scalar_lea.vmem %s188_s5, 64  ;;  %s1557_s28 = smov [#allocation5]  }
  0x4b   : > { %p1422_p8 = scmp.ne.s32.totalorder %s188_s5, %s1421_s20  ;;  %s1426_s30 = sshll.u32 %s1557_s28, 4  ;;  %s1427_s30 = int_to_ptr.vmem [resolvable:$false] %s1426_s30 }
  0x4c   : > { %s1428_s19 = scalar_lea.vmem %s1427_s30, 128  ;;  %p1429_p4 = scmp.lt.s32.totalorder %s188_s5, %s1427_s30 }
  0x4d   : > { %p1424_p9 = pnand %p1422_p8, %p1687_p2  ;;  %p1430_p11 = scmp.lt.s32.totalorder %s1428_s19, %s1421_s20 }
  0x4f   : > { %p1425_p12 = pneg %p1424_p9  ;;  %p1431_p0 = por %p1430_p11, %p1429_p4 }
  0x51   : > { %p1432_p10 = pnand %p1431_p0, %p1425_p12 }
  0x53   : > { %1435 = shalt.err (!%p1432_p10)
}
  0x54   : > { %p2023_p13 = scmp.ne.s32.totalorder %s2019_s4, 0  ;;  %s1436_s29 = scalar_lea.hbm %s1719_s22, 128 }
  0x55   : > { %p1437_p7 = scmp.ne.s32.totalorder %s1719_s22, %s1436_s29  ;;  %s1441_s26 = scalar_lea.hbm %s2002_s2, 256 }
  0x56   : > { %1266 = dma.hbm_to_vmem [thread:$0]  (!%p2023_p13), %s1734_s10, 64, %s188_s5, %s176_s9  }
  0x57   : > { %p1439_p1 = pnand %p1437_p7, %p1687_p2  ;;  %p1442_p0 = scmp.lt.u32.totalorder %s1719_s22, %s2002_s2 }
  0x58   : > { %p1443_p11 = scmp.lt.u32.totalorder %s1441_s26, %s1436_s29  ;;  %p1445_p6 = scmp.lt.u32.totalorder %s1436_s29, %s1719_s22 }
  0x59   : > { %p1440_p3 = pneg %p1439_p1 }
  0x5a   : > { %p1444_p5 = por %p1443_p11, %p1442_p0 }
  0x5c   : > { %p1446_p8 = por %p1445_p6, %p1444_p5 }
  0x5e   : > { %p1447_p9 = pnand %p1446_p8, %p1440_p3 }
  0x60   : > { %1450 = shalt.err (!%p1447_p9)
}
  0x61   : > { %s1451_s10 = scalar_lea.vmem %s1736_s7, 128  ;;  %s1558_s5 = smov [#allocation10]  }
  0x62   : > { %p1452_p12 = scmp.ne.s32.totalorder %s1736_s7, %s1451_s10  ;;  %s1456_s9 = sshll.u32 %s1558_s5, 4  ;;  %s1457_s9 = int_to_ptr.vmem [resolvable:$false] %s1456_s9 }
  0x63   : > { %s1458_s28 = scalar_lea.vmem %s1457_s9, 256  ;;  %p1459_p7 = scmp.lt.s32.totalorder %s1736_s7, %s1457_s9 }
  0x64   : > { %p1454_p4 = pnand %p1452_p12, %p1687_p2  ;;  %p1460_p1 = scmp.lt.s32.totalorder %s1458_s28, %s1451_s10 }
  0x66   : > { %p1455_p10 = pneg %p1454_p4  ;;  %p1461_p0 = por %p1460_p1, %p1459_p7 }
  0x68   : > { %p1462_p11 = pnand %p1461_p0, %p1455_p10 }
  0x6a   : > { %1465 = shalt.err (!%p1462_p11)
}
  0x6b   : > { %s2024_s30 = smov 64   ;;  %p2025_p2 = scmp.ne.s32.totalorder %s2022_s1, 0 }
  0x6c   : > { %1272 = dma.hbm_to_vmem [thread:$0]  (!%p2023_p13), %s1719_s22, 128, %s1736_s7, %s1681_s11, %s2024_s30, %s2024_s30, %s1556_s6  }
  0x6d   : > { %242 = sbr.rel (%p2025_p2) target bundleno = 1583 (0x62f), region = 32  ;;  %s1784_s21 = sand.u32 (!%p2025_p2), 1, %s1536_s13  }
  0x6e   : > { %s1156_s19 = sshll.u32 (!%p2025_p2), %s1784_s21, 2  ;;  %s245_s29 = scalar_lea.sflag (!%p2025_p2), [#allocation6], %s1784_s21 }
  0x6f   : > { %s1790_s4 = scalar_lea.vmem (!%p2025_p2), [#allocation5], %s1156_s19  ;;  %p2026_p3 = scmp.ne.s32.totalorder (!%p2025_p2), %s2015_s24, 0 }
  0x74   : > { %1519 = dma.done.wait (%p2026_p3), %s245_s29, 64  }
  0x75   : > { %1521 = vsyncadd (%p2026_p3), %s245_s29, 4294967232  ;;  %s253_s1 = sand.u32 1, %s1621_s18   ;;  %s1157_s11 = sshll.u32 %s1784_s21, 3 }
  0x76   : > { %s254_s6 = scalar_lea.sflag [#allocation9], %s253_s1  ;;  %s1800_s22 = scalar_lea.vmem [#allocation8], %s1157_s11 }
  0x77   : > { %1523 = dma.done.wait (%p2026_p3), %s254_s6, 256  }
  0x78   : > { %1525 = vsyncadd (%p2026_p3), %s254_s6, 4294967040  ;;  %vm317_vm0 = vcmask 64512   ;;  %v1559_v0 = vmov 0.0   ;;  %vm1560_vm1 = vmmov 0   ;;  %v1341_v1 = vld [vmem:[%s1800_s22] sm:$0xff]   ;;  %vm308_vm2 = vcmask 7168  }
  0x79   : > { %1207 = vmatprep.subr.bf16.mxu0 %v1559_v0  ;;  %318 = vst.msk [vmem:[#allocation4] sm:$0xff] %vm317_vm0, %v1559_v0  ;;  %319 = vst.msk [vmem:[#allocation4 + $0x8] sm:$0xff] %vm317_vm0, %v1559_v0  ;;  %1209 = vmatprep.mubr.msk.bf16.mxu0 %vm1560_vm1, %v1559_v0  ;;  %v343_v2 = vsel %vm317_vm0, %v1341_v1, 0  ;;  %v328_v3 = vld [vmem:[%s1790_s4] sm:$0xf]  ;;  %v322_v5 = vlaneseq  ;;  %vm387_vm4 = vcmask 130048  }
  0x7a   : > { %320 = vst.msk [vmem:[#allocation4 + $0x10] sm:$0xff] %vm317_vm0, %v1559_v0  ;;  %321 = vst.msk [vmem:[#allocation4 + $0x18] sm:$0xff] %vm317_vm0, %v1559_v0  ;;  %1213 = vmatprep.subr.bf16.mxu1 %v1559_v0  ;;  %1215 = vmatprep.mubr.msk.bf16.mxu1 %vm1560_vm1, %v1559_v0  ;;  %v1561_v4 = vmov -1e+30   ;;  %v1562_v13 = vmov 0   ;;  %v1342_v14 = vld [vmem:[%s1800_s22] sm:$0xff]  }
  0x7b   : > { %1208 = vmatpush3.bf16.xpose.msra.mxu0 %v343_v2  ;;  %309 = vst.msk [vmem:[#allocation2] sm:$0xff] %vm308_vm2, %v1561_v4  ;;  %310 = vst.msk [vmem:[#allocation2 + $0x8] sm:$0xff] %vm308_vm2, %v1561_v4  ;;  %v1839_v6 = vand.u32 127, %v322_v5  ;;  %1339 = vset.pattern.permute.xlu0 %v1562_v13  ;;  %s1563_s18 = smov 120   ;;  %v1343_v15 = vld [vmem:[%s1790_s4] ss:$0 sps:$4 sm:$0xff]  }
  0x7c   : > { %1225 = vmatprep.subr.bf16.mxu0 %v1559_v0  ;;  %311 = vst.msk [vmem:[#allocation2 + $0x10] sm:$0xff] %vm308_vm2, %v1561_v4  ;;  %312 = vst.msk [vmem:[#allocation2 + $0x18] sm:$0xff] %vm308_vm2, %v1561_v4  ;;  %1340 = vset.pattern.permute.xlu1 %v1562_v13  ;;  %v1344_v16 = vld [vmem:[%s1800_s22] sm:$0xff]   ;;  %s1564_s24 = smov 112   ;;  %v1345_v17 = vld [vmem:[%s1790_s4] ss:$0 sps:$4 sm:$0xff]  }
  0x7d   : > { %313 = vst.msk [vmem:[#allocation3] sm:$0xff] %vm308_vm2, %v1559_v0  ;;  %314 = vst.msk [vmem:[#allocation3 + $0x8] sm:$0xff] %vm308_vm2, %v1559_v0  ;;  %vm327_vm3 = vcmp.lt.s32.totalorder %v1839_v6, 12  ;;  %486 = vrot.lane.b32.xlu1 %v1342_v14, %s1563_s18  ;;  %v1346_v18 = vld [vmem:[%s1800_s22] sm:$0xff]   ;;  %s1565_s7 = smov 104   ;;  %s1869_s23 = scalar_lea.vmem [#allocation10], %s1157_s11 }
  0x7e   : > { %315 = vst.msk [vmem:[#allocation3 + $0x10] sm:$0xff] %vm308_vm2, %v1559_v0  ;;  %316 = vst.msk [vmem:[#allocation3 + $0x18] sm:$0xff] %vm308_vm2, %v1559_v0  ;;  %v1347_v19 = vld [vmem:[%s1790_s4] ss:$0 sps:$4 sm:$0xff]   ;;  %vm940_vm5 = vcmask 60416   ;;  %s1937_s14 = scalar_lea.vmem [#allocation11], %s1156_s19 }
  0x7f   : > { %v1348_v24 = vld [vmem:[%s1869_s23] sm:$0xff]   ;;  %s1566_s26 = smov 8   ;;  %s1567_s8 = smov 16   ;;  %vm958_vm6 = vcmask 126016   ;;  %vm976_vm7 = vcmask 191616   ;;  %vm994_vm8 = vcmask 257216  }
  0x80   : > { %1214 = vmatpush3.bf16.msra.mxu1 %v1348_v24  ;;  %s1568_s20 = smov 24   ;;  %s1183_s10 = sshll.u32 %s1544_s15, 6 }
  0x81   : > { %479 = vrot.lane.b32.xlu1 %v1343_v15, %s1563_s18  ;;  %1219 = vmatprep.subr.bf16.mxu1 %v1559_v0  ;;  %s1011_s5 = sshll.u32 %s1937_s14, 4  ;;  %s1950_s30 = scalar_lea.hbm %s2003_s3, %s1183_s10  ;;  %s1952_s5 = int_to_ptr.vmem [resolvable:$true] %s1011_s5 }
  0x82   : > { %1210 = vmatmul.mubr.msk.bf16.vlgmr.msra.gmra.mrb[0].mxu0 %vm317_vm0, %v328_v3  ;;  %v1857_v20 = vld [vmem:[#allocation2] sm:$0xff]  ;;  %v536_v61 = vld [vmem:[#allocation2 + $0x8] sm:$0xff]  ;;  %s997_s19 = scalar_lea.sflag [#allocation7], %s1784_s21  ;;  %s1466_s29 = scalar_lea.vmem %s1952_s5, 64 }
  0x83   : > { %1227 = vmatprep.mubr.msk.bf16.mxu0 %vm1560_vm1, %v1559_v0  ;;  %v688_v2 = vld [vmem:[#allocation2 + $0x10] sm:$0xff]  ;;  %v840_v6 = vld [vmem:[#allocation2 + $0x18] sm:$0xff]  ;;  %p1467_p13 = scmp.ne.s32.totalorder %s1952_s5, %s1466_s29  ;;  %p2027_p5 = scmp.ne.s32.totalorder %s2016_s25, 0 }
  0x84   : > { %s1569_s15 = smov [#allocation11]  }
  0x85   : > { %638 = vrot.lane.b32.xlu1 %v1344_v16, %s1564_s24  ;;  %p1468_p6 = pnand %p1467_p13, %p2027_p5  ;;  %s1470_s4 = sshll.u32 %s1569_s15, 4  ;;  %s1471_s4 = int_to_ptr.vmem [resolvable:$false] %s1470_s4 }
  0x86   : > { %s1472_s1 = scalar_lea.vmem %s1471_s4, 128  ;;  %p1473_p9 = scmp.lt.s32.totalorder %s1952_s5, %s1471_s4 }
  0x87   : > { %p1469_p8 = pneg %p1468_p6  ;;  %p1474_p12 = scmp.lt.s32.totalorder %s1472_s1, %s1466_s29 }
  0x89   : > { %631 = vrot.lane.b32.xlu1 %v1345_v17, %s1564_s24  ;;  %p1475_p4 = por %p1474_p12, %p1473_p9 }
  0x8b   : > { %p1476_p10 = pnand %p1475_p4, %p1469_p8 }
  0x8d   : > { %790 = vrot.lane.b32.xlu1 %v1346_v18, %s1565_s7 }
  0x91   : > { %783 = vrot.lane.b32.xlu1 %v1347_v19, %s1565_s7 }
  0xef   : > { %v487_v28 = vpop.permute.xlu1 %486 }
  0xf0   : > { %v492_v31 = vsel %vm317_vm0, %v487_v28, 0 }
  0xf3   : > { %v480_v29 = vpop.permute.xlu1 %479 }
  0xf7   : > { %v639_v33 = vpop.permute.xlu1 %638 }
  0xf8   : > { %v644_v35 = vsel %vm317_vm0, %v639_v33, 0 }
  0xfb   : > { %v632_v34 = vpop.permute.xlu1 %631 }
  0xff   : > { %v791_v36 = vpop.permute.xlu1 %790 }
 0x100   : > { %v796_v37 = vsel %vm317_vm0, %v791_v36, 0 }
 0x103   : > { %v784_v38 = vpop.permute.xlu1 %783 }
 0x155   : > { %v379_v7 = vpop.f32.mrb[0].mxu0 }
 0x156   : > { %v385_v8 = vsel %vm327_vm3, %v379_v7, -1e+30  ;;  %v1211_v9 = vpop.f32.mrb[1].mxu0 }
 0x157   : > { %v382_v10 = vpop.f32.mrb[2].mxu0  ;;  %v388_v11 = vsel %vm387_vm4, %v385_v8, -inf }
 0x158   : > { %389 = vmax.xlane.f32.xlu0 %v388_v11  ;;  %v1212_v12 = vpop.f32.mrb[3].mxu0  ;;  %v1349_v10 = vld [vmem:[%s1869_s23] sm:$0xff]  }
 0x159   : > { %v1350_v11 = vld [vmem:[%s1869_s23] sm:$0xff]  }
 0x15a   : > { %v1351_v12 = vld [vmem:[%s1869_s23] sm:$0xff]  }
 0x1e5   : > { %v390_v21 = vpop.xlane.xlu0 %389 }
 0x1e6   : > { %v1860_v22 = vmax.f32 %v1857_v20, %v390_v21 }
 0x1e8   : > { %v392_v23 = vsub.f32 %v1857_v20, %v1860_v22  ;;  %470 = vst.msk [vmem:[#allocation2] sm:$0xff] %vm308_vm2, %v1860_v22  ;;  %397 = vperm.xlu0 %1339, %v1860_v22  }
 0x1ea   : > { %v393_v36 = vmul.f32 1.442695, %v392_v23 }
 0x267   : > { %v398_v25 = vpop.permute.xlu0 %397 }
 0x268   : > { %v400_v26 = vsub.f32 %v385_v8, %v398_v25 }
 0x26a   : > { %v401_v27 = vmul.f32 1.442695, %v400_v26 }
 0x26c   : > { %1352 = vpow2.f32 %v401_v27 }
 0x276   : > { %v1873_v30 = vpop.eup %1352 }
 0x277   : > { %v418_v32 = vpack.c.bf16 %v1873_v30, %v1873_v30  ;;  %v405_v13 = vsel %vm387_vm4, %v1873_v30, 0.0 }
 0x279   : > { %1216 = vmatmul.mubr.msk.bf16.vlgmr.msra.gmra.mrb[0].mxu1 %vm387_vm4, %v418_v32 }
 0x27a   : > { %1220 = vmatpush3.bf16.xpose.msra.mxu1 %v492_v31  ;;  %1221 = vmatprep.mubr.msk.bf16.mxu1 %vm1560_vm1, %v1559_v0 }
 0x27b   : > { %1231 = vmatprep.subr.bf16.mxu1 %v1559_v0 }
 0x281   : > { %1222 = vmatmul.mubr.msk.bf16.vlgmr.msra.gmra.mrb[4].mxu1 %vm317_vm0, %v480_v29 }
 0x282   : > { %1232 = vmatpush3.bf16.xpose.msra.mxu1 %v644_v35  ;;  %1233 = vmatprep.mubr.msk.bf16.mxu1 %vm1560_vm1, %v1559_v0 }
 0x283   : > { %1243 = vmatprep.subr.bf16.mxu1 %v1559_v0 }
 0x289   : > { %1234 = vmatmul.mubr.msk.bf16.vlgmr.msra.gmra.mrb[8].mxu1 %vm317_vm0, %v632_v34 }
 0x28a   : > { %1244 = vmatpush3.bf16.xpose.msra.mxu1 %v796_v37  ;;  %1245 = vmatprep.mubr.msk.bf16.mxu1 %vm1560_vm1, %v1559_v0 }
 0x291   : > { %1246 = vmatmul.mubr.msk.bf16.vlgmr.msra.gmra.mrb[12].mxu1 %vm317_vm0, %v784_v38 }
 0x34c   : > { %v1892_v39 = vpop.f32.mrb[0].mxu1 }
 0x34d   : > { %v1217_v40 = vpop.f32.mrb[1].mxu1 }
 0x34e   : > { %v465_v41 = vpop.f32.mrb[2].mxu1 }
 0x34f   : > { %v1218_v42 = vpop.f32.mrb[3].mxu1 }
 0x354   : > { %v528_v43 = vpop.f32.mrb[4].mxu1 }
 0x355   : > { %v534_v44 = vsel %vm327_vm3, %v528_v43, -1e+30  ;;  %v1223_v45 = vpop.f32.mrb[5].mxu1 }
 0x356   : > { %v531_v46 = vpop.f32.mrb[6].mxu1  ;;  %v537_v47 = vsel %vm387_vm4, %v534_v44, -inf }
 0x357   : > { %538 = vmax.xlane.f32.xlu1 %v537_v47  ;;  %v1224_v48 = vpop.f32.mrb[7].mxu1 }
 0x35c   : > { %v680_v49 = vpop.f32.mrb[8].mxu1 }
 0x35d   : > { %v686_v50 = vsel %vm327_vm3, %v680_v49, -1e+30  ;;  %v1235_v51 = vpop.f32.mrb[9].mxu1  ;;  %v553_v49 = vld [vmem:[#allocation3 + $0x8] sm:$0xff] }
 0x35e   : > { %v683_v52 = vpop.f32.mrb[10].mxu1  ;;  %v689_v53 = vsel %vm387_vm4, %v686_v50, -inf }
 0x35f   : > { %690 = vmax.xlane.f32.xlu0 %v689_v53  ;;  %v1236_v54 = vpop.f32.mrb[11].mxu1  ;;  %v705_v53 = vld [vmem:[#allocation3 + $0x10] sm:$0xff] }
 0x364   : > { %v832_v55 = vpop.f32.mrb[12].mxu1 }
 0x365   : > { %v838_v56 = vsel %vm327_vm3, %v832_v55, -1e+30  ;;  %v1247_v57 = vpop.f32.mrb[13].mxu1 }
 0x366   : > { %v835_v58 = vpop.f32.mrb[14].mxu1  ;;  %v841_v59 = vsel %vm387_vm4, %v838_v56, -inf }
 0x367   : > { %842 = vmax.xlane.f32.xlu1 %v841_v59  ;;  %v1248_v60 = vpop.f32.mrb[15].mxu1  ;;  %v857_v58 = vld [vmem:[#allocation3 + $0x18] sm:$0xff]  ;;  %v411_v59 = vld [vmem:[#allocation4] sm:$0xff] }
 0x3e4   : > { %v539_v62 = vpop.xlane.xlu1 %538 }
 0x3e5   : > { %v540_v63 = vmax.f32 %v536_v61, %v539_v62 }
 0x3e7   : > { %v541_v1 = vsub.f32 %v536_v61, %v540_v63  ;;  %622 = vst.msk [vmem:[#allocation2 + $0x8] sm:$0xff] %vm308_vm2, %v540_v63  ;;  %546 = vperm.xlu1 %1340, %v540_v63  }
 0x3e9   : > { %v542_v38 = vmul.f32 1.442695, %v541_v1 }
 0x3ec   : > { %v691_v3 = vpop.xlane.xlu0 %690 }
 0x3ed   : > { %v692_v4 = vmax.f32 %v688_v2, %v691_v3 }
 0x3ef   : > { %v693_v5 = vsub.f32 %v688_v2, %v692_v4  ;;  %774 = vst.msk [vmem:[#allocation2 + $0x10] sm:$0xff] %vm308_vm2, %v692_v4  ;;  %698 = vperm.xlu0 %1339, %v692_v4  }
 0x3f1   : > { %v694_v42 = vmul.f32 1.442695, %v693_v5 }
 0x3f4   : > { %v843_v7 = vpop.xlane.xlu1 %842 }
 0x3f5   : > { %v844_v8 = vmax.f32 %v840_v6, %v843_v7 }
 0x3f7   : > { %v845_v9 = vsub.f32 %v840_v6, %v844_v8  ;;  %926 = vst.msk [vmem:[#allocation2 + $0x18] sm:$0xff] %vm308_vm2, %v844_v8  ;;  %850 = vperm.xlu1 %1340, %v844_v8  }
 0x3f9   : > { %v846_v40 = vmul.f32 1.442695, %v845_v9 }
 0x3fb   : > { %574 = vrot.lane.b32.xlu1 %v1349_v10, %s1563_s18 }
 0x3ff   : > { %726 = vrot.lane.b32.xlu1 %v1350_v11, %s1564_s24 }
 0x403   : > { %878 = vrot.lane.b32.xlu1 %v1351_v12, %s1565_s7 }
 0x427   : > { %406 = vadd.xlane.f32.xlu1 %v405_v13 }
 0x466   : > { %v547_v14 = vpop.permute.xlu1 %546 }
 0x467   : > { %v549_v15 = vsub.f32 %v534_v44, %v547_v14  ;;  %v403_v44 = vld [vmem:[#allocation3] sm:$0xff] }
 0x469   : > { %v550_v16 = vmul.f32 1.442695, %v549_v15 }
 0x46b   : > { %1354 = vpow2.f32 %v550_v16 }
 0x46e   : > { %v699_v17 = vpop.permute.xlu0 %698 }
 0x46f   : > { %v701_v18 = vsub.f32 %v686_v50, %v699_v17 }
 0x471   : > { %v702_v19 = vmul.f32 1.442695, %v701_v18 }
 0x473   : > { %1356 = vpow2.f32 %v702_v19 }
 0x475   : > { %v1355_v21 = vpop.eup %1354 }
 0x476   : > { %v851_v24 = vpop.permute.xlu1 %850  ;;  %v555_v25 = vsel %vm387_vm4, %v1355_v21, 0.0  ;;  %v568_v29 = vpack.c.bf16 %v1355_v21, %v1355_v21  ;;  %v713_v21 = vld [vmem:[#allocation4 + $0x10] sm:$0xff] }
 0x477   : > { %v853_v26 = vsub.f32 %v838_v56, %v851_v24  ;;  %556 = vadd.xlane.f32.xlu0 %v555_v25 }
 0x479   : > { %v854_v27 = vmul.f32 1.442695, %v853_v26 }
 0x47a   : > { %v575_v28 = vpop.permute.xlu1 %574 }
 0x47b   : > { %1358 = vpow2.f32 %v854_v27  ;;  %1226 = vmatpush3.bf16.msra.mxu0 %v575_v28 }
 0x47c   : > { %1237 = vmatprep.subr.bf16.mxu0 %v1559_v0  ;;  %1360 = vpow2.f32 %v393_v36 }
 0x47d   : > { %v1357_v30 = vpop.eup %1356  ;;  %1362 = vpow2.f32 %v542_v38 }
 0x47e   : > { %1228 = vmatmul.mubr.msk.bf16.vlgmr.msra.gmra.mrb[4].mxu0 %vm387_vm4, %v568_v29  ;;  %v707_v31 = vsel %vm387_vm4, %v1357_v30, 0.0  ;;  %v727_v32 = vpop.permute.xlu1 %726  ;;  %v720_v33 = vpack.c.bf16 %v1357_v30, %v1357_v30  ;;  %1364 = vpow2.f32 %v846_v40  ;;  %v865_v30 = vld [vmem:[#allocation4 + $0x18] sm:$0xff] }
 0x47f   : > { %708 = vadd.xlane.f32.xlu0 %v707_v31  ;;  %1238 = vmatpush3.bf16.msra.mxu0 %v727_v32  ;;  %1366 = vpow2.f32 %v694_v42 }
 0x480   : > { %1239 = vmatprep.mubr.msk.bf16.mxu0 %vm1560_vm1, %v1559_v0  ;;  %1249 = vmatprep.subr.bf16.mxu0 %v1559_v0 }
 0x482   : > { %v879_v34 = vpop.permute.xlu1 %878 }
 0x485   : > { %v1359_v35 = vpop.eup %1358 }
 0x486   : > { %1240 = vmatmul.mubr.msk.bf16.vlgmr.msra.gmra.mrb[8].mxu0 %vm387_vm4, %v720_v33  ;;  %v859_v37 = vsel %vm387_vm4, %v1359_v35, 0.0  ;;  %v872_v41 = vpack.c.bf16 %v1359_v35, %v1359_v35  ;;  %v1361_v20 = vpop.eup %1360 }
 0x487   : > { %860 = vadd.xlane.f32.xlu1 %v859_v37  ;;  %1250 = vmatpush3.bf16.msra.mxu0 %v879_v34  ;;  %v1363_v22 = vpop.eup %1362 }
 0x488   : > { %1251 = vmatprep.mubr.msk.bf16.mxu0 %vm1560_vm1, %v1559_v0  ;;  %v1365_v23 = vpop.eup %1364  ;;  %v404_v0 = vmul.f32 %v1361_v20, %v403_v44  ;;  %v554_v50 = vmul.f32 %v1363_v22, %v553_v49 }
 0x489   : > { %v1367_v43 = vpop.eup %1366  ;;  %v858_v60 = vmul.f32 %v1365_v23, %v857_v58 }
 0x48a   : > { %v706_v54 = vmul.f32 %v1367_v43, %v705_v53 }
 0x48e   : > { %1252 = vmatmul.mubr.msk.bf16.vlgmr.msra.gmra.mrb[12].mxu0 %vm387_vm4, %v872_v41 }
 0x495   : > { %414 = vperm.xlu0 %1339, %v1361_v20  }
 0x498   : > { %564 = vperm.xlu1 %1340, %v1363_v22  }
 0x499   : > { %868 = vperm.xlu0 %1339, %v1365_v23  }
 0x49c   : > { %716 = vperm.xlu1 %1340, %v1367_v43  }
 0x4b4   : > { %v407_v45 = vpop.xlane.xlu1 %406 }
 0x4b5   : > { %v408_v46 = vadd.f32 %v407_v45, %v404_v0 }
 0x4b7   : > { %410 = vst.msk [vmem:[#allocation3] sm:$0xff] %vm308_vm2, %v408_v46 }
 0x4be   : > { %v930_v47 = vld [vmem:[#allocation3] sm:$0xff] }
 0x4bf   : > { %1368 = vrcp.f32 %v930_v47 }
 0x4c9   : > { %v1369_v48 = vpop.eup %1368 }
 0x4ca   : > { %935 = vperm.xlu1 %1340, %v1369_v48  }
 0x504   : > { %v557_v51 = vpop.xlane.xlu0 %556 }
 0x505   : > { %v558_v52 = vadd.f32 %v557_v51, %v554_v50 }
 0x507   : > { %559 = vst.msk [vmem:[#allocation3 + $0x8] sm:$0xff] %vm308_vm2, %v558_v52 }
 0x50c   : > { %v709_v55 = vpop.xlane.xlu0 %708 }
 0x50d   : > { %v710_v56 = vadd.f32 %v709_v55, %v706_v54 }
 0x50e   : > { %v942_v57 = vld [vmem:[#allocation3 + $0x8] sm:$0xff] }
 0x50f   : > { %711 = vst.msk [vmem:[#allocation3 + $0x10] sm:$0xff] %vm308_vm2, %v710_v56  ;;  %1370 = vrcp.f32 %v942_v57 }
 0x514   : > { %v861_v61 = vpop.xlane.xlu1 %860  ;;  %v415_v62 = vpop.permute.xlu0 %414 }
 0x515   : > { %v862_v63 = vadd.f32 %v861_v61, %v858_v60  ;;  %v417_v1 = vmul.f32 %v415_v62, %v411_v59 }
 0x516   : > { %v960_v2 = vld [vmem:[#allocation3 + $0x10] sm:$0xff] }
 0x517   : > { %863 = vst.msk [vmem:[#allocation3 + $0x18] sm:$0xff] %vm308_vm2, %v862_v63  ;;  %v468_v3 = vadd.f32 %v1892_v39, %v417_v1  ;;  %1372 = vrcp.f32 %v960_v2  ;;  %v561_v39 = vld [vmem:[#allocation4 + $0x8] sm:$0xff] }
 0x518   : > { %v565_v8 = vpop.permute.xlu1 %564  ;;  %v869_v31 = vpop.permute.xlu0 %868 }
 0x519   : > { %v1371_v4 = vpop.eup %1370  ;;  %469 = vst.msk [vmem:[#allocation4] sm:$0xff] %vm317_vm0, %v468_v3  ;;  %v567_v14 = vmul.f32 %v565_v8, %v561_v39  ;;  %v871_v32 = vmul.f32 %v869_v31, %v865_v30 }
 0x51a   : > { %947 = vperm.xlu0 %1339, %v1371_v4  }
 0x51c   : > { %v717_v9 = vpop.permute.xlu1 %716 }
 0x51d   : > { %v719_v24 = vmul.f32 %v717_v9, %v713_v21 }
 0x51e   : > { %v978_v5 = vld [vmem:[#allocation3 + $0x18] sm:$0xff] }
 0x51f   : > { %1374 = vrcp.f32 %v978_v5 }
 0x520   : > { %v932_v10 = vld [vmem:[#allocation4] sm:$0xff] }
 0x521   : > { %v1373_v6 = vpop.eup %1372 }
 0x522   : > { %965 = vperm.xlu0 %1339, %v1373_v6  }
 0x529   : > { %v1375_v7 = vpop.eup %1374 }
 0x52a   : > { %983 = vperm.xlu0 %1339, %v1375_v7  }
 0x549   : > { %v936_v11 = vpop.permute.xlu1 %935 }
 0x54a   : > { %v938_v12 = vmul.f32 %v936_v11, %v932_v10 }
 0x54c   : > { %v939_v13 = vpack.c.bf16 %v938_v12, %v938_v12 }
 0x54e   : > { %941 = vst.msk [vmem:[%s1937_s14] sm:$0xf] %vm940_vm5, %v939_v13 }
 0x551   : > { %v614_v15 = vpop.f32.mrb[4].mxu0 }
 0x552   : > { %v620_v16 = vadd.f32 %v614_v15, %v567_v14  ;;  %v1229_v17 = vpop.f32.mrb[5].mxu0 }
 0x553   : > { %v617_v18 = vpop.f32.mrb[6].mxu0 }
 0x554   : > { %621 = vst.msk [vmem:[#allocation4 + $0x8] sm:$0xff] %vm317_vm0, %v620_v16  ;;  %v1230_v19 = vpop.f32.mrb[7].mxu0 }
 0x559   : > { %v766_v25 = vpop.f32.mrb[8].mxu0 }
 0x55a   : > { %v772_v26 = vadd.f32 %v766_v25, %v719_v24  ;;  %v1241_v27 = vpop.f32.mrb[9].mxu0 }
 0x55b   : > { %v769_v28 = vpop.f32.mrb[10].mxu0  ;;  %v944_v38 = vld [vmem:[#allocation4 + $0x8] sm:$0xff] }
 0x55c   : > { %773 = vst.msk [vmem:[#allocation4 + $0x10] sm:$0xff] %vm317_vm0, %v772_v26  ;;  %v1242_v29 = vpop.f32.mrb[11].mxu0 }
 0x561   : > { %v918_v33 = vpop.f32.mrb[12].mxu0 }
 0x562   : > { %v924_v34 = vadd.f32 %v918_v33, %v871_v32  ;;  %v1253_v35 = vpop.f32.mrb[13].mxu0 }
 0x563   : > { %v921_v36 = vpop.f32.mrb[14].mxu0  ;;  %v962_v20 = vld [vmem:[#allocation4 + $0x10] sm:$0xff] }
 0x564   : > { %925 = vst.msk [vmem:[#allocation4 + $0x18] sm:$0xff] %vm317_vm0, %v924_v34  ;;  %v1254_v37 = vpop.f32.mrb[15].mxu0 }
 0x56b   : > { %v980_v44 = vld [vmem:[#allocation4 + $0x18] sm:$0xff] }
 0x599   : > { %v948_v40 = vpop.permute.xlu0 %947 }
 0x59a   : > { %v950_v41 = vmul.f32 %v948_v40, %v944_v38 }
 0x59c   : > { %v1188_v42 = vpack.c.bf16 %v950_v41, %v950_v41 }
 0x59e   : > { %955 = vrot.lane.b32.xlu1 %v1188_v42, %s1566_s26 }
 0x5a1   : > { %v966_v22 = vpop.permute.xlu0 %965 }
 0x5a2   : > { %v968_v23 = vmul.f32 %v966_v22, %v962_v20 }
 0x5a4   : > { %v1189_v43 = vpack.c.bf16 %v968_v23, %v968_v23 }
 0x5a6   : > { %973 = vrot.lane.b32.xlu1 %v1189_v43, %s1567_s8 }
 0x5a9   : > { %v984_v0 = vpop.permute.xlu0 %983 }
 0x5aa   : > { %v986_v45 = vmul.f32 %v984_v0, %v980_v44 }
 0x5ac   : > { %v1190_v46 = vpack.c.bf16 %v986_v45, %v986_v45 }
 0x5ae   : > { %991 = vrot.lane.b32.xlu1 %v1190_v46, %s1568_s20 }
 0x610   : > { %v956_v47 = vpop.permute.xlu1 %955 }
 0x611   : > { %959 = vst.msk [vmem:[%s1937_s14] sm:$0xf] %vm958_vm6, %v956_v47 }
 0x618   : > { %v974_v48 = vpop.permute.xlu1 %973 }
 0x619   : > { %977 = vst.msk [vmem:[%s1937_s14] sm:$0xf] %vm976_vm7, %v974_v48 }
 0x620   : > { %v992_v49 = vpop.permute.xlu1 %991 }
 0x621   : > { %995 = vst.msk [vmem:[%s1937_s14] sm:$0xf] %vm994_vm8, %v992_v49 }
 0x622   : > { %1479 = shalt.err (!%p1476_p10)
}
 0x623   : > { %s1480_s21 = scalar_lea.hbm %s1950_s30, 64  ;;  %s1484_s22 = scalar_lea.hbm %s2003_s3, 128 }
 0x624   : > { %p1481_p7 = scmp.ne.s32.totalorder %s1950_s30, %s1480_s21  ;;  %p1485_p11 = scmp.lt.u32.totalorder %s1950_s30, %s2003_s3 }
 0x625   : > { %p1486_p2 = scmp.lt.u32.totalorder %s1484_s22, %s1480_s21  ;;  %p1488_p13 = scmp.lt.u32.totalorder %s1480_s21, %s1950_s30 }
 0x626   : > { %p1482_p1 = pnand %p1481_p7, %p2027_p5 }
 0x627   : > { %p1487_p3 = por %p1486_p2, %p1485_p11 }
 0x628   : > { %p1483_p0 = pneg %p1482_p1 }
 0x629   : > { %p1489_p6 = por %p1488_p13, %p1487_p3 }
 0x62b   : > { %p1490_p8 = pnand %p1489_p6, %p1483_p0 }
 0x62d   : > { %1493 = shalt.err (!%p1490_p8)
}
 0x62e   : > { %1261 = dma.vmem_to_hbm [thread:$0]  (%p2027_p5), %s1952_s5, 64, %s1950_s30, %s997_s19  }
 0x62f PF: > { %s1023_s7 = sand.u32 1, %s1532_s12   ;;  %p2028_p9 = scmp.ne.s32.totalorder %s2018_s27, 0 }
 0x630   : > { %p2029_p12 = scmp.ge.s32.totalorder %s1552_s17, 2  ;;  %s1024_s23 = scalar_lea.sflag [#allocation7], %s1023_s7 }
 0x632   : > { %p1274_p4 = pnand %p2029_p12, %p2028_p9 }
 0x634   : > { %1527 = dma.done.wait (!%p1274_p4), %s1024_s23, 64  }
 0x635   : > { %1529 = vsyncadd (!%p1274_p4), %s1024_s23, 4294967232  ;;  %s22_s17 = sadd.s32 1, %s1552_s17   ;;  %s2030_s14 = sld [smem:[#allocation15_spill]] }
 0x636   : > { %p19_p10 = scmp.ge.s32.totalorder %s22_s17, 4   ;;  %s2031_s25 = sld [smem:[#allocation17_spill]] }
 0x637   : > { %s2032_s26 = sld [smem:[#allocation16_spill]]  ;;  %s2033_s12 = smov %s1536_s13 }
 0x638   : > { %s2036_s15 = smov %s1548_s16  ;;  %21 = sbr.rel (!%p19_p10) target bundleno = 10 (0xa), region = 118 }
 0x63b   : > { %s2034_s13 = smov %s2030_s14 }
 0x63c   : > { %s2035_s14 = smov %s2031_s25 }
 0x63d   : > { %s2037_s16 = smov %s2032_s26 }
 0x63f   :  { %1029 = vsyncpa [#allocation6], 1 }
 0x640   :  { %1031 = vsyncpa [#allocation6 + $0x1], 1 }
 0x641   :  { %1032 = vsyncpa [#allocation9], 1 }
 0x642   :  { %1034 = vsyncpa [#allocation9 + $0x1], 1 }
 0x643   :  { %1035 = vsyncpa [#allocation7], 1 }
 0x644   :  { %1037 = vsyncpa [#allocation7 + $0x1], 1 }

// kernel: text_decoder_forward.35
= control target key start
LH: loop header
LB: loop body
LE: loop exit
PB: predicated region body
PF: predicated region fallthrough
CT: control target
= control target key end

     0   :  { %10 = vsyncpa [#allocation5], 0  ;;  %s579_s0 = inlined_call_operand.hbm [shape: f32[16,32], index: 0, kind: input, shape index: {}]   ;;  %s580_s1 = inlined_call_operand.hbm [shape: bf16[32,128], index: 1, kind: input, shape index: {}]   ;;  %s581_s2 = inlined_call_operand.hbm [shape: f32[1,32], index: 2, kind: input, shape index: {}]   ;;  %s582_s3 = inlined_call_operand.hbm [shape: f32[1,32], index: 3, kind: input, shape index: {}]   ;;  %s583_s4 = inlined_call_operand.hbm [shape: f32[1,128], index: 4, kind: input, shape index: {}]   ;;  %s584_s5 = inlined_call_operand.hbm [shape: bf16[16,128], index: 5, kind: output, shape index: {}]  }
   0x1   :  { %11 = vsyncpa [#allocation8], 0 }
   0x2   :  { %12 = vsyncpa [#allocation11], 0 }
   0x3   :  { %13 = vsyncpa [#allocation6], 0  ;;  %s453_s18 = smov [#allocation7]   ;;  %s313_s22 = scalar_lea.hbm %s580_s1, 256 }
   0x4   :  { %s31_s19 = sshll.u32 %s453_s18, 4  ;;  %p314_p0 = scmp.ne.s32.totalorder %s580_s1, %s313_s22  ;;  %s32_s19 = int_to_ptr.vmem [resolvable:$true] %s31_s19 }
   0x5   :  { %p317_p1 = scmp.lt.u32.totalorder %s313_s22, %s580_s1 }
   0x7   :  { %p319_p2 = pnand %p317_p1, %p314_p0 }
   0x9   :  { %322 = shalt.err (!%p319_p2)
}
   0xa   :  { %s323_s27 = scalar_lea.vmem %s32_s19, 256  ;;  %p328_p4 = scmp.lt.s32.totalorder %s32_s19, %s32_s19 }
   0xb   :  { %p324_p3 = scmp.ne.s32.totalorder %s32_s19, %s323_s27  ;;  %p329_p5 = scmp.lt.s32.totalorder %s323_s27, %s323_s27 }
   0xd   :  { %p330_p6 = por %p329_p5, %p328_p4 }
   0xf   :  { %p331_p7 = pnand %p330_p6, %p324_p3 }
  0x11   :  { %334 = shalt.err (!%p331_p7)
}
  0x12   :  { %s454_s28 = smov 64   ;;  %s455_s29 = smov 4  }
  0x13   :  { %37 = dma.hbm_to_vmem [thread:$0]  %s580_s1, 256, %s32_s19, [#allocation8], %s454_s28, %s454_s28, %s455_s29  }
  0x14   :  { %s456_s7 = smov [#allocation10]   ;;  %s457_s9 = smov [#allocation4]  }
  0x15   :  { %s54_s8 = sshll.u32 %s456_s7, 4  ;;  %s19_s10 = sshll.u32 %s457_s9, 4  ;;  %s55_s8 = int_to_ptr.vmem [resolvable:$true] %s54_s8  ;;  %s20_s10 = int_to_ptr.vmem [resolvable:$true] %s19_s10 }
  0x16   :  { %s335_s13 = scalar_lea.hbm %s582_s3, 16 }
  0x17   :  { %p336_p8 = scmp.ne.s32.totalorder %s582_s3, %s335_s13  ;;  %p339_p9 = scmp.lt.u32.totalorder %s335_s13, %s582_s3 }
  0x19   :  { %p341_p10 = pnand %p339_p9, %p336_p8 }
  0x1b   :  { %344 = shalt.err (!%p341_p10)
}
  0x1c   :  { %s345_s1 = scalar_lea.vmem %s55_s8, 16  ;;  %s349_s18 = scalar_lea.vmem %s55_s8, 32 }
  0x1d   :  { %p346_p11 = scmp.ne.s32.totalorder %s55_s8, %s345_s1  ;;  %p350_p12 = scmp.lt.s32.totalorder %s55_s8, %s55_s8 }
  0x1e   :  { %p351_p13 = scmp.lt.s32.totalorder %s349_s18, %s345_s1 }
  0x20   :  { %p352_p0 = por %p351_p13, %p350_p12 }
  0x22   :  { %p353_p1 = pnand %p352_p0, %p346_p11 }
  0x24   :  { %356 = shalt.err (!%p353_p1)
}
  0x25   :  { %57 = dma.hbm_to_vmem [thread:$0]  %s582_s3, 16, %s55_s8, [#allocation11]  }
  0x26   :  { %s357_s23 = scalar_lea.hbm %s579_s0, 256 }
  0x27   :  { %p358_p2 = scmp.ne.s32.totalorder %s579_s0, %s357_s23  ;;  %p361_p3 = scmp.lt.u32.totalorder %s357_s23, %s579_s0 }
  0x29   :  { %p363_p4 = pnand %p361_p3, %p358_p2 }
  0x2b   :  { %366 = shalt.err (!%p363_p4)
}
  0x2c   :  { %s367_s30 = scalar_lea.vmem %s20_s10, 256  ;;  %p372_p6 = scmp.lt.s32.totalorder %s20_s10, %s20_s10 }
  0x2d   :  { %p368_p5 = scmp.ne.s32.totalorder %s20_s10, %s367_s30  ;;  %p373_p7 = scmp.lt.s32.totalorder %s367_s30, %s367_s30 }
  0x2f   :  { %p374_p8 = por %p373_p7, %p372_p6 }
  0x31   :  { %p375_p9 = pnand %p374_p8, %p368_p5 }
  0x33   :  { %378 = shalt.err (!%p375_p9)
}
  0x34   :  { %s458_s3 = smov 128   ;;  %s459_s6 = smov 8  }
  0x35   :  { %25 = dma.hbm_to_vmem [thread:$0]  %s579_s0, 256, %s20_s10, [#allocation5], %s458_s3, %s458_s3, %s459_s6  }
  0x36   :  { %s460_s9 = smov [#allocation9]   ;;  %s461_s12 = smov [#allocation12]  }
  0x37   :  { %s44_s11 = sshll.u32 %s460_s9, 4  ;;  %s64_s13 = sshll.u32 %s461_s12, 4  ;;  %s45_s11 = int_to_ptr.vmem [resolvable:$true] %s44_s11  ;;  %s65_s13 = int_to_ptr.vmem [resolvable:$true] %s64_s13 }
  0x38   :  { %s379_s16 = scalar_lea.hbm %s581_s2, 16 }
  0x39   :  { %p380_p10 = scmp.ne.s32.totalorder %s581_s2, %s379_s16  ;;  %p383_p11 = scmp.lt.u32.totalorder %s379_s16, %s581_s2 }
  0x3b   :  { %p385_p12 = pnand %p383_p11, %p380_p10 }
  0x3d   :  { %388 = shalt.err (!%p385_p12)
}
  0x3e   :  { %s389_s0 = scalar_lea.vmem %s45_s11, 16  ;;  %s393_s10 = scalar_lea.vmem %s45_s11, 32 }
  0x3f   :  { %p390_p13 = scmp.ne.s32.totalorder %s45_s11, %s389_s0  ;;  %p394_p0 = scmp.lt.s32.totalorder %s45_s11, %s45_s11 }
  0x40   :  { %p395_p1 = scmp.lt.s32.totalorder %s393_s10, %s389_s0 }
  0x42   :  { %p396_p2 = por %p395_p1, %p394_p0 }
  0x44   :  { %p397_p3 = pnand %p396_p2, %p390_p13 }
  0x46   :  { %400 = shalt.err (!%p397_p3)
}
  0x47   :  { %47 = dma.hbm_to_vmem [thread:$0]  %s581_s2, 16, %s45_s11, [#allocation8]  }
  0x48   :  { %s401_s24 = scalar_lea.hbm %s583_s4, 16 }
  0x49   :  { %p402_p4 = scmp.ne.s32.totalorder %s583_s4, %s401_s24  ;;  %p405_p5 = scmp.lt.u32.totalorder %s401_s24, %s583_s4 }
  0x4b   :  { %p407_p6 = pnand %p405_p5, %p402_p4 }
  0x4d   :  { %410 = shalt.err (!%p407_p6)
}
  0x4e   :  { %s411_s3 = scalar_lea.vmem %s65_s13, 16  ;;  %s415_s6 = scalar_lea.vmem %s65_s13, 32 }
  0x4f   :  { %p412_p7 = scmp.ne.s32.totalorder %s65_s13, %s411_s3  ;;  %p416_p8 = scmp.lt.s32.totalorder %s65_s13, %s65_s13 }
  0x50   :  { %p417_p9 = scmp.lt.s32.totalorder %s415_s6, %s411_s3 }
  0x52   :  { %p418_p10 = por %p417_p9, %p416_p8 }
  0x54   :  { %p419_p11 = pnand %p418_p10, %p412_p7 }
  0x56   :  { %422 = shalt.err (!%p419_p11)
}
  0x57   :  { %67 = dma.hbm_to_vmem [thread:$0]  %s583_s4, 16, %s65_s13, [#allocation11]  }
  0x58   :  { %445 = dma.done.wait [#allocation5], 256  }
  0x59   :  { %446 = vsyncadd [#allocation5], 4294967040 }
  0x5a   :  { %447 = dma.done.wait [#allocation8], 272  }
  0x5b   :  { %448 = vsyncadd [#allocation8], 4294967024 }
  0x5c   :  { %449 = dma.done.wait [#allocation11], 32  }
  0x5d   :  { %450 = vsyncadd [#allocation11], 4294967264  ;;  %vm96_vm0 = vcmask 261120   ;;  %v94_v0 = vld [vmem:[#allocation4] sm:$0xff]  ;;  %v95_v1 = vld [vmem:[#allocation4 + $0x8] sm:$0xff]  ;;  %v462_v15 = vmov 0.0  }
  0x5e   :  { %v97_v2 = vsel %vm96_vm0, %v94_v0, 0.0  ;;  %v100_v3 = vsel %vm96_vm0, %v95_v1, 0.0  ;;  %v303_v14 = vld [vmem:[#allocation7] sm:$0xff]   ;;  %283 = vmatprep.subr.bf16.mxu0 %v462_v15  ;;  %v304_v16 = vld [vmem:[#allocation7 + $0x8] sm:$0xff]   ;;  %vm463_vm1 = vmmov 0   ;;  %s464_s4 = smov [#allocation13]  }
  0x5f   :  { %98 = vadd.xlane.f32.xlu0 %v97_v2  ;;  %284 = vmatpush3.bf16.msra.mxu0 %v303_v14  ;;  %v265_v25 = vld [vmem:[#allocation9] ss:$0 sm:$0xff]  ;;  %v266_v29 = vld [vmem:[#allocation10] ss:$0 sm:$0xff]  ;;  %v270_v35 = vld [vmem:[#allocation12] ss:$0 sm:$0xff] }
  0x60   :  { %287 = vmatprep.mubr.msk.bf16.mxu0 %vm463_vm1, %v462_v15  ;;  %285 = vmatprep.subr.bf16.mxu0 %v462_v15  ;;  %s251_s8 = sshll.u32 %s464_s4, 4  ;;  %s252_s8 = int_to_ptr.vmem [resolvable:$true] %s251_s8 }
  0x61   :  { %s423_s9 = scalar_lea.vmem %s252_s8, 128  ;;  %p428_p13 = scmp.lt.s32.totalorder %s252_s8, %s252_s8 }
  0x62   :  { %p424_p12 = scmp.ne.s32.totalorder %s252_s8, %s423_s9  ;;  %p429_p0 = scmp.lt.s32.totalorder %s423_s9, %s423_s9 }
  0x63   :  { %101 = vadd.xlane.f32.xlu0 %v100_v3  ;;  %286 = vmatpush3.bf16.msra.mxu0 %v304_v16 }
  0x64   :  { %p430_p1 = por %p429_p0, %p428_p13 }
  0x66   :  { %p431_p2 = pnand %p430_p1, %p424_p12 }
  0xec   :  { %v99_v4 = vpop.xlane.xlu0 %98 }
  0xed   :  { %v104_v5 = vmul.f32 0.03125, %v99_v4 }
  0xef   :  { %v106_v6 = vsub.f32 %v94_v0, %v104_v5 }
  0xf0   :  { %v102_v7 = vpop.xlane.xlu0 %101 }
  0xf1   :  { %v105_v8 = vmul.f32 0.03125, %v102_v7  ;;  %v108_v9 = vmul.f32 %v106_v6, %v106_v6 }
  0xf3   :  { %v107_v10 = vsub.f32 %v95_v1, %v105_v8  ;;  %v110_v11 = vsel %vm96_vm0, %v108_v9, 0.0 }
  0xf4   :  { %111 = vadd.xlane.f32.xlu1 %v110_v11 }
  0xf5   :  { %v109_v12 = vmul.f32 %v107_v10, %v107_v10 }
  0xf7   :  { %v113_v13 = vsel %vm96_vm0, %v109_v12, 0.0 }
  0xf8   :  { %114 = vadd.xlane.f32.xlu1 %v113_v13 }
 0x181   :  { %v112_v17 = vpop.xlane.xlu1 %111 }
 0x182   :  { %v116_v18 = vmul.f32 0.03125, %v112_v17 }
 0x184   :  { %v118_v19 = vadd.f32 1e-05, %v116_v18 }
 0x185   :  { %v115_v20 = vpop.xlane.xlu1 %114 }
 0x186   :  { %305 = vrsqrt.f32 %v118_v19  ;;  %v117_v21 = vmul.f32 0.03125, %v115_v20 }
 0x188   :  { %v119_v22 = vadd.f32 1e-05, %v117_v21 }
 0x18a   :  { %307 = vrsqrt.f32 %v119_v22 }
 0x190   :  { %v306_v23 = vpop.eup %305 }
 0x191   :  { %v122_v24 = vmul.f32 %v306_v23, %v106_v6 }
 0x193   :  { %v131_v27 = vmul.f32 %v265_v25, %v122_v24 }
 0x194   :  { %v308_v26 = vpop.eup %307 }
 0x195   :  { %v123_v28 = vmul.f32 %v308_v26, %v107_v10  ;;  %v140_v31 = vadd.f32 %v266_v29, %v131_v27 }
 0x197   :  { %v132_v30 = vmul.f32 %v265_v25, %v123_v28 }
 0x199   :  { %v141_v32 = vadd.f32 %v266_v29, %v132_v30 }
 0x19b   :  { %v142_v33 = vpack.c.bf16 %v141_v32, %v140_v31 }
 0x19d   :  { %143 = vst.msk [vmem:[#allocation3] sm:$0xff] %vm96_vm0, %v142_v33 }
 0x1a4   :  { %v144_v34 = vld [vmem:[#allocation3] sm:$0xff] }
 0x1a5   :  { %288 = vmatmul.mubr.msk.bf16.vlgmr.msra.gmra.mrb[0].mxu0 %vm96_vm0, %v144_v34 }
 0x278   :  { %v201_v36 = vpop.f32.mrb[0].mxu0 }
 0x279   :  { %v224_v37 = vadd.f32 %v270_v35, %v201_v36  ;;  %v289_v38 = vpop.f32.mrb[1].mxu0 }
 0x27a   :  { %v204_v39 = vpop.f32.mrb[2].mxu0 }
 0x27b   :  { %v228_v40 = vmul.f32 0.70710677, %v224_v37  ;;  %v225_v41 = vadd.f32 %v270_v35, %v204_v39  ;;  %v290_v42 = vpop.f32.mrb[3].mxu0  ;;  %v226_v47 = vmul.f32 0.5, %v224_v37 }
 0x27d   :  { %309 = verf.f32 %v228_v40  ;;  %v229_v43 = vmul.f32 0.70710677, %v225_v41  ;;  %v227_v48 = vmul.f32 0.5, %v225_v41 }
 0x27f   :  { %311 = verf.f32 %v229_v43 }
 0x287   :  { %v310_v44 = vpop.eup %309 }
 0x288   :  { %v232_v45 = vadd.f32 1.0, %v310_v44 }
 0x289   :  { %v312_v46 = vpop.eup %311 }
 0x28a   :  { %v233_v49 = vadd.f32 1.0, %v312_v46  ;;  %v234_v50 = vmul.f32 %v232_v45, %v226_v47 }
 0x28c   :  { %v235_v51 = vmul.f32 %v233_v49, %v227_v48 }
 0x28e   :  { %v278_v52 = vpack.c.bf16 %v235_v51, %v234_v50 }
 0x290   :  { %279 = vst [vmem:[#allocation13] sm:$0xff] %v278_v52  }
 0x291   :  { %434 = shalt.err (!%p431_p2)
}
 0x292   :  { %s435_s13 = scalar_lea.hbm %s584_s5, 128 }
 0x293   :  { %p436_p3 = scmp.ne.s32.totalorder %s584_s5, %s435_s13  ;;  %p439_p4 = scmp.lt.u32.totalorder %s435_s13, %s584_s5 }
 0x295   :  { %p441_p5 = pnand %p439_p4, %p436_p3 }
 0x297   :  { %444 = shalt.err (!%p441_p5)
}
 0x298   :  { %257 = dma.vmem_to_hbm [thread:$0]  %s252_s8, 128, %s584_s5, [#allocation6], %s454_s28, %s454_s28, %s455_s29  }
 0x299   :  { %451 = dma.done.wait [#allocation6], 128  }
 0x29a   :  { %452 = vsyncadd [#allocation6], 4294967168 }
 0x29b   :  { %261 = vsyncpa [#allocation5], 1 }
 0x29c   :  { %262 = vsyncpa [#allocation8], 1 }
 0x29d   :  { %263 = vsyncpa [#allocation11], 1 }
 0x29e   :  { %264 = vsyncpa [#allocation6], 1 }

// kernel: text_decoder_forward.36
= control target key start
LH: loop header
LB: loop body
LE: loop exit
PB: predicated region body
PF: predicated region fallthrough
CT: control target
= control target key end

     0   :  { %9 = vsyncpa [#allocation4], 0  ;;  %s537_s0 = inlined_call_operand.hbm [shape: bf16[16,128], index: 0, kind: input, shape index: {}]   ;;  %s538_s1 = inlined_call_operand.hbm [shape: bf16[128,32], index: 1, kind: input, shape index: {}]   ;;  %s539_s2 = inlined_call_operand.hbm [shape: f32[1,32], index: 2, kind: input, shape index: {}]   ;;  %s540_s3 = inlined_call_operand.hbm [shape: f32[16,32], index: 3, kind: input, shape index: {}]   ;;  %s541_s4 = inlined_call_operand.hbm [shape: f32[16,32], index: 4, kind: output, shape index: {}]  }
   0x1   :  { %10 = vsyncpa [#allocation7], 0 }
   0x2   :  { %11 = vsyncpa [#allocation10], 0 }
   0x3   :  { %12 = vsyncpa [#allocation5], 0  ;;  %s415_s15 = smov [#allocation6]   ;;  %s416_s17 = smov [#allocation3]  }
   0x4   :  { %s30_s16 = sshll.u32 %s415_s15, 4  ;;  %s18_s18 = sshll.u32 %s416_s17, 4  ;;  %s31_s16 = int_to_ptr.vmem [resolvable:$true] %s30_s16  ;;  %s451_s18 = int_to_ptr.vmem [resolvable:$true] %s18_s18 }
   0x5   :  { %s297_s21 = scalar_lea.hbm %s538_s1, 1024 }
   0x6   :  { %p298_p0 = scmp.ne.s32.totalorder %s538_s1, %s297_s21  ;;  %p301_p1 = scmp.lt.u32.totalorder %s297_s21, %s538_s1 }
   0x8   :  { %p303_p2 = pnand %p301_p1, %p298_p0 }
   0xa   :  { %306 = shalt.err (!%p303_p2)
}
   0xb   :  { %s307_s26 = scalar_lea.vmem %s31_s16, 1024  ;;  %p312_p4 = scmp.lt.s32.totalorder %s31_s16, %s31_s16 }
   0xc   :  { %p308_p3 = scmp.ne.s32.totalorder %s31_s16, %s307_s26  ;;  %p313_p5 = scmp.lt.s32.totalorder %s307_s26, %s307_s26 }
   0xe   :  { %p314_p6 = por %p313_p5, %p312_p4 }
  0x10   :  { %p315_p7 = pnand %p314_p6, %p308_p3 }
  0x12   :  { %318 = shalt.err (!%p315_p7)
}
  0x13   :  { %s417_s27 = smov 64   ;;  %s418_s28 = smov 4  }
  0x14   :  { %36 = dma.hbm_to_vmem [thread:$0]  %s538_s1, 1024, %s31_s16, [#allocation7], %s417_s27, %s417_s27, %s418_s28  }
  0x15   :  { %s319_s7 = scalar_lea.hbm %s537_s0, 128 }
  0x16   :  { %p320_p8 = scmp.ne.s32.totalorder %s537_s0, %s319_s7  ;;  %p323_p9 = scmp.lt.u32.totalorder %s319_s7, %s537_s0 }
  0x18   :  { %p325_p10 = pnand %p323_p9, %p320_p8 }
  0x1a   :  { %328 = shalt.err (!%p325_p10)
}
  0x1b   :  { %s329_s12 = scalar_lea.vmem %s451_s18, 128  ;;  %p334_p12 = scmp.lt.s32.totalorder %s451_s18, %s451_s18 }
  0x1c   :  { %p330_p11 = scmp.ne.s32.totalorder %s451_s18, %s329_s12  ;;  %p335_p13 = scmp.lt.s32.totalorder %s329_s12, %s329_s12 }
  0x1e   :  { %p336_p0 = por %p335_p13, %p334_p12 }
  0x20   :  { %p337_p1 = pnand %p336_p0, %p330_p11 }
  0x22   :  { %340 = shalt.err (!%p337_p1)
}
  0x23   :  { %24 = dma.hbm_to_vmem [thread:$0]  %s537_s0, 128, %s451_s18, [#allocation4], %s417_s27, %s417_s27, %s418_s28  }
  0x24   :  { %s419_s14 = smov [#allocation8]   ;;  %s420_s16 = smov [#allocation9]  }
  0x25   :  { %s43_s15 = sshll.u32 %s419_s14, 4  ;;  %s52_s17 = sshll.u32 %s420_s16, 4  ;;  %s44_s15 = int_to_ptr.vmem [resolvable:$true] %s43_s15  ;;  %s482_s17 = int_to_ptr.vmem [resolvable:$true] %s52_s17 }
  0x26   :  { %s341_s21 = scalar_lea.hbm %s539_s2, 16 }
  0x27   :  { %p342_p2 = scmp.ne.s32.totalorder %s539_s2, %s341_s21  ;;  %p345_p3 = scmp.lt.u32.totalorder %s341_s21, %s539_s2 }
  0x29   :  { %p347_p4 = pnand %p345_p3, %p342_p2 }
  0x2b   :  { %350 = shalt.err (!%p347_p4)
}
  0x2c   :  { %s351_s0 = scalar_lea.vmem %s44_s15, 16  ;;  %s355_s18 = scalar_lea.vmem %s44_s15, 32 }
  0x2d   :  { %p352_p5 = scmp.ne.s32.totalorder %s44_s15, %s351_s0  ;;  %p356_p6 = scmp.lt.s32.totalorder %s44_s15, %s44_s15 }
  0x2e   :  { %p357_p7 = scmp.lt.s32.totalorder %s355_s18, %s351_s0 }
  0x30   :  { %p358_p8 = por %p357_p7, %p356_p6 }
  0x32   :  { %p359_p9 = pnand %p358_p8, %p352_p5 }
  0x34   :  { %362 = shalt.err (!%p359_p9)
}
  0x35   :  { %46 = dma.hbm_to_vmem [thread:$0]  %s539_s2, 16, %s44_s15, [#allocation7]  }
  0x36   :  { %s363_s30 = scalar_lea.hbm %s540_s3, 256 }
  0x37   :  { %p364_p10 = scmp.ne.s32.totalorder %s540_s3, %s363_s30  ;;  %p367_p11 = scmp.lt.u32.totalorder %s363_s30, %s540_s3 }
  0x39   :  { %p369_p12 = pnand %p367_p11, %p364_p10 }
  0x3b   :  { %372 = shalt.err (!%p369_p12)
}
  0x3c   :  { %s373_s9 = scalar_lea.vmem %s482_s17, 256  ;;  %p378_p0 = scmp.lt.s32.totalorder %s482_s17, %s482_s17 }
  0x3d   :  { %p374_p13 = scmp.ne.s32.totalorder %s482_s17, %s373_s9  ;;  %p379_p1 = scmp.lt.s32.totalorder %s373_s9, %s373_s9 }
  0x3f   :  { %p380_p2 = por %p379_p1, %p378_p0 }
  0x41   :  { %p381_p3 = pnand %p380_p2, %p374_p13 }
  0x43   :  { %384 = shalt.err (!%p381_p3)
}
  0x44   :  { %s421_s2 = smov 128   ;;  %s422_s10 = smov 8  }
  0x45   :  { %58 = dma.hbm_to_vmem [thread:$0]  %s540_s3, 256, %s482_s17, [#allocation10], %s421_s2, %s421_s2, %s422_s10  }
  0x46   :  { %407 = dma.done.wait [#allocation4], 128  }
  0x47   :  { %408 = vsyncadd [#allocation4], 4294967168 }
  0x48   :  { %409 = dma.done.wait [#allocation7], 1040  }
  0x49   :  { %410 = vsyncadd [#allocation7], 4294966256 }
  0x4a   :  { %411 = dma.done.wait [#allocation10], 256  }
  0x4b   :  { %412 = vsyncadd [#allocation10], 4294967040  ;;  %vm76_vm0 = vcmask 261120   ;;  %v423_v0 = vmov 0.0   ;;  %vm424_vm1 = vmmov 0   ;;  %v288_v1 = vld [vmem:[#allocation6] sm:$0xff]  }
  0x4c   :  { %257 = vmatprep.subr.bf16.mxu0 %v423_v0  ;;  %273 = vmatprep.mubr.msk.bf16.mxu0 %vm424_vm1, %v423_v0  ;;  %77 = vst.msk [vmem:[#allocation2] sm:$0xff] %vm76_vm0, %v423_v0  ;;  %78 = vst.msk [vmem:[#allocation2 + $0x8] sm:$0xff] %vm76_vm0, %v423_v0  ;;  %v289_v2 = vld [vmem:[#allocation6 + $0x8] sm:$0xff]   ;;  %v290_v3 = vld [vmem:[#allocation6 + $0x10] sm:$0xff]   ;;  %s425_s3 = smov [#allocation11]  }
  0x4d   :  { %258 = vmatpush3.bf16.msra.mxu0 %v288_v1  ;;  %v291_v4 = vld [vmem:[#allocation6 + $0x18] sm:$0xff]   ;;  %v292_v5 = vld [vmem:[#allocation6 + $0x20] sm:$0xff]   ;;  %v293_v6 = vld [vmem:[#allocation6 + $0x28] sm:$0xff]   ;;  %s224_s1 = sshll.u32 %s425_s3, 4  ;;  %s225_s1 = int_to_ptr.vmem [resolvable:$true] %s224_s1 }
  0x4e   :  { %259 = vmatprep.subr.bf16.mxu0 %v423_v0  ;;  %v294_v7 = vld [vmem:[#allocation6 + $0x30] sm:$0xff]   ;;  %v295_v8 = vld [vmem:[#allocation6 + $0x38] sm:$0xff]   ;;  %v247_v18 = vld [vmem:[#allocation8] ss:$0 sm:$0xff]  ;;  %s385_s13 = scalar_lea.vmem %s225_s1, 256  ;;  %p390_p5 = scmp.lt.s32.totalorder %s225_s1, %s225_s1 }
  0x4f   :  { %v296_v9 = vld [vmem:[#allocation3] sm:$0xff]   ;;  %v213_v20 = vld [vmem:[#allocation9] sm:$0xff]  ;;  %v214_v23 = vld [vmem:[#allocation9 + $0x8] sm:$0xff]  ;;  %p386_p4 = scmp.ne.s32.totalorder %s225_s1, %s385_s13  ;;  %p391_p6 = scmp.lt.s32.totalorder %s385_s13, %s385_s13 }
  0x51   :  { %260 = vmatpush3.bf16.msra.mxu0 %v289_v2  ;;  %p392_p7 = por %p391_p6, %p390_p5 }
  0x52   :  { %261 = vmatprep.subr.bf16.mxu0 %v423_v0 }
  0x53   :  { %v81_v10 = vld [vmem:[#allocation2] sm:$0xff]  ;;  %v82_v12 = vld [vmem:[#allocation2 + $0x8] sm:$0xff]  ;;  %p393_p8 = pnand %p392_p7, %p386_p4 }
  0x55   :  { %262 = vmatpush3.bf16.msra.mxu0 %v290_v3 }
  0x56   :  { %263 = vmatprep.subr.bf16.mxu0 %v423_v0 }
  0x59   :  { %264 = vmatpush3.bf16.msra.mxu0 %v291_v4 }
  0x5a   :  { %265 = vmatprep.subr.bf16.mxu0 %v423_v0 }
  0x5d   :  { %266 = vmatpush3.bf16.msra.mxu0 %v292_v5 }
  0x5e   :  { %267 = vmatprep.subr.bf16.mxu0 %v423_v0 }
  0x61   :  { %268 = vmatpush3.bf16.msra.mxu0 %v293_v6 }
  0x62   :  { %269 = vmatprep.subr.bf16.mxu0 %v423_v0 }
  0x65   :  { %270 = vmatpush3.bf16.msra.mxu0 %v294_v7 }
  0x66   :  { %271 = vmatprep.subr.bf16.mxu0 %v423_v0 }
  0x69   :  { %272 = vmatpush3.bf16.msra.mxu0 %v295_v8 }
  0x6c   :  { %274 = vmatmul.mubr.bf16.vlgmr.msra.gmra.mrb[0].mxu0 %v296_v9 }
 0x13f   :  { %v187_v11 = vpop.f32.mrb[0].mxu0 }
 0x140   :  { %v194_v13 = vadd.f32 %v187_v11, %v81_v10  ;;  %v275_v14 = vpop.f32.mrb[1].mxu0 }
 0x141   :  { %v190_v15 = vpop.f32.mrb[2].mxu0 }
 0x142   :  { %197 = vst.msk [vmem:[#allocation2] sm:$0xff] %vm76_vm0, %v194_v13  ;;  %v195_v16 = vadd.f32 %v190_v15, %v82_v12  ;;  %v276_v17 = vpop.f32.mrb[3].mxu0 }
 0x144   :  { %198 = vst.msk [vmem:[#allocation2 + $0x8] sm:$0xff] %vm76_vm0, %v195_v16 }
 0x149   :  { %v202_v19 = vld [vmem:[#allocation2] sm:$0xff] }
 0x14a   :  { %v211_v21 = vadd.f32 %v247_v18, %v202_v19 }
 0x14b   :  { %v203_v22 = vld [vmem:[#allocation2 + $0x8] sm:$0xff] }
 0x14c   :  { %v212_v24 = vadd.f32 %v247_v18, %v203_v22  ;;  %v215_v25 = vadd.f32 %v213_v20, %v211_v21 }
 0x14e   :  { %v216_v26 = vadd.f32 %v214_v23, %v212_v24  ;;  %217 = vst.msk [vmem:[#allocation11] sm:$0xff] %vm76_vm0, %v215_v25 }
 0x150   :  { %218 = vst.msk [vmem:[#allocation11 + $0x8] sm:$0xff] %vm76_vm0, %v216_v26 }
 0x151   :  { %396 = shalt.err (!%p393_p8)
}
 0x152   :  { %s397_s16 = scalar_lea.hbm %s541_s4, 256 }
 0x153   :  { %p398_p9 = scmp.ne.s32.totalorder %s541_s4, %s397_s16  ;;  %p401_p10 = scmp.lt.u32.totalorder %s397_s16, %s541_s4 }
 0x155   :  { %p403_p11 = pnand %p401_p10, %p398_p9 }
 0x157   :  { %406 = shalt.err (!%p403_p11)
}
 0x158   :  { %230 = dma.vmem_to_hbm [thread:$0]  %s225_s1, 256, %s541_s4, [#allocation5], %s421_s2, %s421_s2, %s422_s10  }
 0x159   :  { %413 = dma.done.wait [#allocation5], 256  }
 0x15a   :  { %414 = vsyncadd [#allocation5], 4294967040 }
 0x15b   :  { %234 = vsyncpa [#allocation4], 1 }
 0x15c   :  { %235 = vsyncpa [#allocation7], 1 }
 0x15d   :  { %236 = vsyncpa [#allocation10], 1 }
 0x15e   :  { %237 = vsyncpa [#allocation5], 1 }

// kernel: text_decoder_forward.49
= control target key start
LH: loop header
LB: loop body
LE: loop exit
PB: predicated region body
PF: predicated region fallthrough
CT: control target
= control target key end

     0   :  { %9 = vsyncpa [#allocation5], 0  ;;  %s599_s0 = inlined_call_operand.hbm [shape: f32[16,32], index: 0, kind: input, shape index: {}]   ;;  %s600_s1 = inlined_call_operand.hbm [shape: bf16[32,512], index: 1, kind: input, shape index: {}]   ;;  %s601_s2 = inlined_call_operand.hbm [shape: f32[1,32], index: 2, kind: input, shape index: {}]   ;;  %s602_s3 = inlined_call_operand.hbm [shape: f32[1,32], index: 3, kind: input, shape index: {}]   ;;  %s603_s4 = inlined_call_operand.hbm [shape: f32[16,512], index: 4, kind: output, shape index: {}]  }
   0x1   :  { %10 = vsyncpa [#allocation8], 0 }
   0x2   :  { %11 = vsyncpa [#allocation11], 0 }
   0x3   :  { %12 = vsyncpa [#allocation6], 0  ;;  %s495_s15 = smov [#allocation7]   ;;  %s377_s19 = scalar_lea.hbm %s600_s1, 1024 }
   0x4   :  { %s30_s16 = sshll.u32 %s495_s15, 4  ;;  %p378_p0 = scmp.ne.s32.totalorder %s600_s1, %s377_s19  ;;  %s31_s16 = int_to_ptr.vmem [resolvable:$true] %s30_s16 }
   0x5   :  { %p381_p1 = scmp.lt.u32.totalorder %s377_s19, %s600_s1 }
   0x7   :  { %p383_p2 = pnand %p381_p1, %p378_p0 }
   0x9   :  { %386 = shalt.err (!%p383_p2)
}
   0xa   :  { %s387_s24 = scalar_lea.vmem %s31_s16, 1024  ;;  %p392_p4 = scmp.lt.s32.totalorder %s31_s16, %s31_s16 }
   0xb   :  { %p388_p3 = scmp.ne.s32.totalorder %s31_s16, %s387_s24  ;;  %p393_p5 = scmp.lt.s32.totalorder %s387_s24, %s387_s24 }
   0xd   :  { %p394_p6 = por %p393_p5, %p392_p4 }
   0xf   :  { %p395_p7 = pnand %p394_p6, %p388_p3 }
  0x11   :  { %398 = shalt.err (!%p395_p7)
}
  0x12   :  { %s496_s25 = smov 256   ;;  %s497_s26 = smov 16  }
  0x13   :  { %36 = dma.hbm_to_vmem [thread:$0]  %s600_s1, 1024, %s31_s16, [#allocation8], %s496_s25, %s496_s25, %s497_s26  }
  0x14   :  { %s498_s29 = smov [#allocation4]   ;;  %s399_s7 = scalar_lea.hbm %s599_s0, 256 }
  0x15   :  { %s18_s30 = sshll.u32 %s498_s29, 4  ;;  %p400_p8 = scmp.ne.s32.totalorder %s599_s0, %s399_s7  ;;  %s19_s30 = int_to_ptr.vmem [resolvable:$true] %s18_s30 }
  0x16   :  { %p403_p9 = scmp.lt.u32.totalorder %s399_s7, %s599_s0 }
  0x18   :  { %p405_p10 = pnand %p403_p9, %p400_p8 }
  0x1a   :  { %408 = shalt.err (!%p405_p10)
}
  0x1b   :  { %s409_s12 = scalar_lea.vmem %s19_s30, 256  ;;  %p414_p12 = scmp.lt.s32.totalorder %s19_s30, %s19_s30 }
  0x1c   :  { %p410_p11 = scmp.ne.s32.totalorder %s19_s30, %s409_s12  ;;  %p415_p13 = scmp.lt.s32.totalorder %s409_s12, %s409_s12 }
  0x1e   :  { %p416_p0 = por %p415_p13, %p414_p12 }
  0x20   :  { %p417_p1 = pnand %p416_p0, %p410_p11 }
  0x22   :  { %420 = shalt.err (!%p417_p1)
}
  0x23   :  { %s499_s1 = smov 128   ;;  %s500_s13 = smov 8  }
  0x24   :  { %24 = dma.hbm_to_vmem [thread:$0]  %s599_s0, 256, %s19_s30, [#allocation5], %s499_s1, %s499_s1, %s500_s13  }
  0x25   :  { %s501_s16 = smov [#allocation9]   ;;  %s502_s18 = smov [#allocation10]  }
  0x26   :  { %s43_s17 = sshll.u32 %s501_s16, 4  ;;  %s53_s19 = sshll.u32 %s502_s18, 4  ;;  %s44_s17 = int_to_ptr.vmem [resolvable:$true] %s43_s17  ;;  %s54_s19 = int_to_ptr.vmem [resolvable:$true] %s53_s19 }
  0x27   :  { %s421_s22 = scalar_lea.hbm %s601_s2, 16 }
  0x28   :  { %p422_p2 = scmp.ne.s32.totalorder %s601_s2, %s421_s22  ;;  %p425_p3 = scmp.lt.u32.totalorder %s421_s22, %s601_s2 }
  0x2a   :  { %p427_p4 = pnand %p425_p3, %p422_p2 }
  0x2c   :  { %430 = shalt.err (!%p427_p4)
}
  0x2d   :  { %s431_s0 = scalar_lea.vmem %s44_s17, 16  ;;  %s435_s27 = scalar_lea.vmem %s44_s17, 32 }
  0x2e   :  { %p432_p5 = scmp.ne.s32.totalorder %s44_s17, %s431_s0  ;;  %p436_p6 = scmp.lt.s32.totalorder %s44_s17, %s44_s17 }
  0x2f   :  { %p437_p7 = scmp.lt.s32.totalorder %s435_s27, %s431_s0 }
  0x31   :  { %p438_p8 = por %p437_p7, %p436_p6 }
  0x33   :  { %p439_p9 = pnand %p438_p8, %p432_p5 }
  0x35   :  { %442 = shalt.err (!%p439_p9)
}
  0x36   :  { %46 = dma.hbm_to_vmem [thread:$0]  %s601_s2, 16, %s44_s17, [#allocation8]  }
  0x37   :  { %s443_s6 = scalar_lea.hbm %s602_s3, 16 }
  0x38   :  { %p444_p10 = scmp.ne.s32.totalorder %s602_s3, %s443_s6  ;;  %p447_p11 = scmp.lt.u32.totalorder %s443_s6, %s602_s3 }
  0x3a   :  { %p449_p12 = pnand %p447_p11, %p444_p10 }
  0x3c   :  { %452 = shalt.err (!%p449_p12)
}
  0x3d   :  { %s453_s11 = scalar_lea.vmem %s54_s19, 16  ;;  %s457_s12 = scalar_lea.vmem %s54_s19, 32 }
  0x3e   :  { %p454_p13 = scmp.ne.s32.totalorder %s54_s19, %s453_s11  ;;  %p458_p0 = scmp.lt.s32.totalorder %s54_s19, %s54_s19 }
  0x3f   :  { %p459_p1 = scmp.lt.s32.totalorder %s457_s12, %s453_s11 }
  0x41   :  { %p460_p2 = por %p459_p1, %p458_p0 }
  0x43   :  { %p461_p3 = pnand %p460_p2, %p454_p13 }
  0x45   :  { %464 = shalt.err (!%p461_p3)
}
  0x46   :  { %56 = dma.hbm_to_vmem [thread:$0]  %s602_s3, 16, %s54_s19, [#allocation11]  }
  0x47   :  { %487 = dma.done.wait [#allocation5], 256  }
  0x48   :  { %488 = vsyncadd [#allocation5], 4294967040 }
  0x49   :  { %489 = dma.done.wait [#allocation8], 1040  }
  0x4a   :  { %490 = vsyncadd [#allocation8], 4294966256 }
  0x4b   :  { %491 = dma.done.wait [#allocation11], 16  }
  0x4c   :  { %492 = vsyncadd [#allocation11], 4294967280  ;;  %vm88_vm0 = vcmask 261120   ;;  %v86_v0 = vld [vmem:[#allocation4] sm:$0xff]  ;;  %v87_v1 = vld [vmem:[#allocation4 + $0x8] sm:$0xff]  ;;  %v503_v22 = vmov 0  }
  0x4d   :  { %v89_v2 = vsel %vm88_vm0, %v86_v0, 0.0  ;;  %v92_v3 = vsel %vm88_vm0, %v87_v1, 0.0  ;;  %v361_v14 = vld [vmem:[#allocation7 + $0x4] ss:$16 sps:$4 sm:$0xff]   ;;  %v363_v15 = vld [vmem:[#allocation7 + $0xc] ss:$16 sps:$4 sm:$0xff]   ;;  %229 = vmatprep.mubr.bf16.mxu0 %v503_v22  ;;  %272 = vmatprep.mubr.bf16.mxu1 %v503_v22 }
  0x4e   :  { %90 = vadd.xlane.f32.xlu0 %v89_v2  ;;  %v365_v16 = vld [vmem:[#allocation7] ss:$16 sps:$4 sm:$0xff]   ;;  %v366_v17 = vld [vmem:[#allocation7 + $0x8] ss:$16 sps:$4 sm:$0xff]   ;;  %197 = vmatprep.subr.bf16.mxu0 %v361_v14  ;;  %v367_v18 = vld [vmem:[#allocation7 + $0x24] ss:$16 sps:$4 sm:$0xff]  }
  0x4f   :  { %240 = vmatprep.subr.bf16.mxu1 %v363_v15  ;;  %v369_v19 = vld [vmem:[#allocation7 + $0x2c] ss:$16 sps:$4 sm:$0xff]   ;;  %198 = vmatpush1.bf16.msra.mxu0 %v365_v16  ;;  %v371_v20 = vld [vmem:[#allocation7 + $0x20] ss:$16 sps:$4 sm:$0xff]   ;;  %v372_v21 = vld [vmem:[#allocation7 + $0x28] ss:$16 sps:$4 sm:$0xff]  }
  0x50   :  { %241 = vmatpush1.bf16.msra.mxu1 %v366_v17  ;;  %199 = vmatprep.subr.bf16.mxu0 %v367_v18  ;;  %v337_v31 = vld [vmem:[#allocation9] ss:$0 sm:$0xff]  ;;  %v338_v35 = vld [vmem:[#allocation10] ss:$0 sm:$0xff]  ;;  %s504_s3 = smov [#allocation12]  }
  0x51   :  { %242 = vmatprep.subr.bf16.mxu1 %v369_v19  ;;  %s323_s13 = sshll.u32 %s504_s3, 4  ;;  %s324_s13 = int_to_ptr.vmem [resolvable:$true] %s323_s13 }
  0x52   :  { %93 = vadd.xlane.f32.xlu0 %v92_v3  ;;  %s465_s14 = scalar_lea.vmem %s324_s13, 1024  ;;  %p470_p5 = scmp.lt.s32.totalorder %s324_s13, %s324_s13 }
  0x53   :  { %200 = vmatpush1.bf16.msra.mxu0 %v371_v20  ;;  %p466_p4 = scmp.ne.s32.totalorder %s324_s13, %s465_s14  ;;  %p471_p6 = scmp.lt.s32.totalorder %s465_s14, %s465_s14 }
  0x54   :  { %243 = vmatpush1.bf16.msra.mxu1 %v372_v21 }
  0x55   :  { %p472_p7 = por %p471_p6, %p470_p5 }
  0x57   :  { %p473_p8 = pnand %p472_p7, %p466_p4 }
  0xdb   :  { %v91_v4 = vpop.xlane.xlu0 %90 }
  0xdc   :  { %v96_v5 = vmul.f32 0.03125, %v91_v4 }
  0xde   :  { %v98_v6 = vsub.f32 %v86_v0, %v96_v5 }
  0xdf   :  { %v94_v7 = vpop.xlane.xlu0 %93 }
  0xe0   :  { %v97_v8 = vmul.f32 0.03125, %v94_v7  ;;  %v100_v9 = vmul.f32 %v98_v6, %v98_v6 }
  0xe2   :  { %v99_v10 = vsub.f32 %v87_v1, %v97_v8  ;;  %v102_v11 = vsel %vm88_vm0, %v100_v9, 0.0 }
  0xe3   :  { %103 = vadd.xlane.f32.xlu1 %v102_v11 }
  0xe4   :  { %v101_v12 = vmul.f32 %v99_v10, %v99_v10 }
  0xe6   :  { %v105_v13 = vsel %vm88_vm0, %v101_v12, 0.0 }
  0xe7   :  { %106 = vadd.xlane.f32.xlu1 %v105_v13 }
 0x170   :  { %v104_v23 = vpop.xlane.xlu1 %103 }
 0x171   :  { %v108_v24 = vmul.f32 0.03125, %v104_v23 }
 0x173   :  { %v110_v25 = vadd.f32 1e-05, %v108_v24 }
 0x174   :  { %v107_v26 = vpop.xlane.xlu1 %106 }
 0x175   :  { %373 = vrsqrt.f32 %v110_v25  ;;  %v109_v27 = vmul.f32 0.03125, %v107_v26 }
 0x177   :  { %v111_v28 = vadd.f32 1e-05, %v109_v27 }
 0x179   :  { %375 = vrsqrt.f32 %v111_v28 }
 0x17f   :  { %v374_v29 = vpop.eup %373 }
 0x180   :  { %v114_v30 = vmul.f32 %v374_v29, %v98_v6 }
 0x182   :  { %v123_v33 = vmul.f32 %v337_v31, %v114_v30 }
 0x183   :  { %v376_v32 = vpop.eup %375 }
 0x184   :  { %v115_v34 = vmul.f32 %v376_v32, %v99_v10  ;;  %v132_v37 = vadd.f32 %v338_v35, %v123_v33 }
 0x186   :  { %v124_v36 = vmul.f32 %v337_v31, %v115_v34 }
 0x188   :  { %v133_v38 = vadd.f32 %v338_v35, %v124_v36 }
 0x18a   :  { %v134_v39 = vpack.c.bf16 %v133_v38, %v132_v37 }
 0x18c   :  { %135 = vst.msk [vmem:[#allocation3] sm:$0xff] %vm88_vm0, %v134_v39 }
 0x193   :  { %v136_v40 = vld [vmem:[#allocation3] sm:$0xff] }
 0x194   :  { %347 = vmatmul.mubr.msk.bf16.vlgmr.msra.gmra.mrb[0].mxu0 %vm88_vm0, %v136_v40  ;;  %348 = vmatmul.mubr.msk.bf16.vlgmr.msra.gmra.mrb[0].mxu1 %vm88_vm0, %v136_v40 }
 0x267   :  { %v231_v41 = vpop.f32.mrb[0].mxu0  ;;  %v274_v42 = vpop.f32.mrb[0].mxu1 }
 0x268   :  { %310 = vst [vmem:[#allocation12] sm:$0xff] %v231_v41  ;;  %312 = vst [vmem:[#allocation12 + $0x10] sm:$0xff] %v274_v42  ;;  %v233_v43 = vpop.f32.mrb[1].mxu0  ;;  %v276_v44 = vpop.f32.mrb[1].mxu1 }
 0x269   :  { %311 = vst [vmem:[#allocation12 + $0x8] sm:$0xff] %v233_v43  ;;  %313 = vst [vmem:[#allocation12 + $0x18] sm:$0xff] %v276_v44  ;;  %v235_v45 = vpop.f32.mrb[2].mxu0  ;;  %v278_v46 = vpop.f32.mrb[2].mxu1 }
 0x26a   :  { %314 = vst [vmem:[#allocation12 + $0x20] sm:$0xff] %v235_v45  ;;  %316 = vst [vmem:[#allocation12 + $0x30] sm:$0xff] %v278_v46  ;;  %v237_v47 = vpop.f32.mrb[3].mxu0  ;;  %v280_v48 = vpop.f32.mrb[3].mxu1 }
 0x26b   :  { %315 = vst [vmem:[#allocation12 + $0x28] sm:$0xff] %v237_v47  ;;  %317 = vst [vmem:[#allocation12 + $0x38] sm:$0xff] %v280_v48 }
 0x26c   :  { %476 = shalt.err (!%p473_p8)
}
 0x26d   :  { %s477_s17 = scalar_lea.hbm %s603_s4, 1024 }
 0x26e   :  { %p478_p9 = scmp.ne.s32.totalorder %s603_s4, %s477_s17  ;;  %p481_p10 = scmp.lt.u32.totalorder %s477_s17, %s603_s4 }
 0x270   :  { %p483_p11 = pnand %p481_p10, %p478_p9 }
 0x272   :  { %486 = shalt.err (!%p483_p11)
}
 0x273   :  { %s505_s22 = smov 512   ;;  %s506_s23 = smov 32  }
 0x274   :  { %329 = dma.vmem_to_hbm [thread:$0]  %s324_s13, 1024, %s603_s4, [#allocation6], %s505_s22, %s505_s22, %s506_s23  }
 0x275   :  { %493 = dma.done.wait [#allocation6], 1024  }
 0x276   :  { %494 = vsyncadd [#allocation6], 4294966272 }
 0x277   :  { %333 = vsyncpa [#allocation5], 1 }
 0x278   :  { %334 = vsyncpa [#allocation8], 1 }
 0x279   :  { %335 = vsyncpa [#allocation11], 1 }
 0x27a   :  { %336 = vsyncpa [#allocation6], 1 }

</bundles_post_ra>
